<compile_context>
chip_gen: v7x
topology: tpu7x:2x2x1
jax: 0.10.0
libtpu: 0.0.40
codegen_flags: <defaults>
</compile_context>

<pallas_src>
import functools

import jax
import jax.numpy as jnp
from jax.experimental import pallas as pl
from jax.experimental.pallas import tpu as pltpu

EPS = 1e-6
NEG_INF = float(jnp.finfo(jnp.float32).min)   # matches np.finfo(np.float32).min


def _pick_tile(n, target):
    """Largest row tile <= target that divides n and keeps legal TPU tiling."""
    if n <= target:
        return n
    for mult in (16, 8):                      # prefer bf16-friendly multiples
        for c in range(target, 0, -1):
            if n % c == 0 and c % mult == 0:
                return c
    return n                                  # fall back to one full block


def _norm_lastdim(x, gain, bias, eps=EPS):
    """torch `Normalize`: unbiased variance (n-1), eps added twice."""
    n = x.shape[-1]
    mu = jnp.mean(x, axis=-1, keepdims=True)
    var = jnp.sum((x - mu) ** 2, axis=-1, keepdims=True) * (1.0 / (n - 1))
    sigma = jnp.sqrt(var + eps)
    inv = pl.reciprocal(sigma + eps, approx=True)    # EUP slot, VPU divide avoided
    return gain * (x - mu) * inv + bias


# --------------------------------------------------------------------------
# kernel 1: row-tiled linear  y = x @ W + b   (W_s, W_t projections)
# --------------------------------------------------------------------------
def _linear_kernel(x_ref, w_ref, b_ref, o_ref):
    acc = jnp.dot(x_ref[...], w_ref[...], preferred_element_type=jnp.float32)
    o_ref[...] = (acc + b_ref[...]).astype(o_ref.dtype)


def linear(x2d, w, b, out_dtype=jnp.float32, tm_target=512):
    n, fin = x2d.shape
    h = w.shape[1]
    tm = _pick_tile(n, tm_target)
    xb = x2d.astype(jnp.bfloat16)
    wb = w.astype(jnp.bfloat16)
    return pl.pallas_call(
        _linear_kernel,
        out_shape=jax.ShapeDtypeStruct((n, h), out_dtype),
        grid=(n // tm,),
        in_specs=[
            pl.BlockSpec((tm, fin), lambda i: (i, 0)),
            pl.BlockSpec((fin, h), lambda i: (0, 0)),
            pl.BlockSpec((1, h), lambda i: (0, 0)),
        ],
        out_specs=pl.BlockSpec((tm, h), lambda i: (i, 0)),
        compiler_params=pltpu.CompilerParams(dimension_semantics=("parallel",)),
    )(xb, wb, b)


# --------------------------------------------------------------------------
# kernel 2: EAttentionLayer (NeighborAttention + residual + Normalize + mask)
# batched: TN nodes per grid step, neighbors unrolled (K is small & static)
# --------------------------------------------------------------------------
def _attn_layer_kernel(hV_ref, hE_ref, hKV_ref, mcat_ref,
                       wq_ref, wk1v_ref, wk2v_ref, wo_ref, bd_ref,
                       g_ref, b_ref, o_ref, *, K, H):
    hV = hV_ref[...]                                    # (TN, H)   f32
    hE = hE_ref[...]                                    # (TN, K*H) bf16
    hKV = hKV_ref[...]                                  # (TN, K*H) bf16
    mc = mcat_ref[...]                                  # (TN, 1+K) f32
    m_node = mc[:, 0:1]

    Q = jnp.dot(hV.astype(jnp.bfloat16), wq_ref[...],
                preferred_element_type=jnp.float32)     # (TN, H)

    lg, vp, msk = [], [], []
    for j in range(K):
        sl = slice(j * H, (j + 1) * H)
        kv1 = jnp.dot(hE[:, sl], wk1v_ref[...],
                      preferred_element_type=jnp.float32)   # (TN,2H) = [K1 | V_e]
        kv2 = jnp.dot(hKV[:, sl], wk2v_ref[...],
                      preferred_element_type=jnp.float32)   # (TN,2H) = [K2 | V_kv]
        p = Q * kv1[:, :H] * kv2[:, :H]
        # per-head sum over d and /d, broadcast back over the head's columns
        logits = jnp.dot(p, bd_ref[...], preferred_element_type=jnp.float32)
        m_j = mc[:, j + 1:j + 2]                             # (TN, 1)
        lg.append(jnp.where(m_j > 0.0, logits, NEG_INF))
        vp.append(kv1[:, H:] + kv2[:, H:])                   # V = W_V([h_E | h_KV])
        msk.append(m_j)

    # masked, numerically-stable softmax over the K neighbors (per head)
    mx = lg[0]
    for j in range(1, K):
        mx = jnp.maximum(mx, lg[j])
    es = [jnp.exp(lg[j] - mx) for j in range(K)]
    s = es[0]
    for j in range(1, K):
        s = s + es[j]
    inv_s = pl.reciprocal(s, approx=True)

    upd = (msk[0] * es[0] * inv_s) * vp[0]
    for j in range(1, K):
        upd = upd + (msk[j] * es[j] * inv_s) * vp[j]          # (TN, H)

    dh = jnp.dot(upd.astype(jnp.bfloat16), wo_ref[...],
                 preferred_element_type=jnp.float32)          # (TN, H)

    # residual + Normalize + node mask (dropout = identity, eval mode)
    y = _norm_lastdim(hV + dh, g_ref[...], b_ref[...])
    o_ref[...] = m_node * y


def attention_layer(h_V, h_E_flat, h_KV_flat, mcat, lp, nheads, K, H,
                    tn_target=128):
    BL = h_V.shape[0]
    tn = _pick_tile(BL, tn_target)
    d = H // nheads

    # fused / split weights (bf16 MXU path, f32 accumulation)
    wq = lp["wq"].astype(jnp.bfloat16)
    wk1v = jnp.concatenate([lp["wk1"], lp["wv"][:H]], axis=1).astype(jnp.bfloat16)
    wk2v = jnp.concatenate([lp["wk2"], lp["wv"][H:]], axis=1).astype(jnp.bfloat16)
    wo = lp["wo"].astype(jnp.bfloat16)
    cols = jnp.arange(H)
    bd = ((cols[:, None] // d) == (cols[None, :] // d)).astype(jnp.float32) / float(d)

    def full(arr):
        nd = arr.ndim
        return pl.BlockSpec(arr.shape, lambda i, _n=nd: (0,) * _n)

    return pl.pallas_call(
        functools.partial(_attn_layer_kernel, K=K, H=H),
        out_shape=jax.ShapeDtypeStruct((BL, H), jnp.float32),
        grid=(BL // tn,),
        in_specs=[
            pl.BlockSpec((tn, H), lambda i: (i, 0)),
            pl.BlockSpec((tn, K * H), lambda i: (i, 0)),
            pl.BlockSpec((tn, K * H), lambda i: (i, 0)),
            pl.BlockSpec((tn, 1 + K), lambda i: (i, 0)),
            full(wq), full(wk1v), full(wk2v), full(wo), full(bd),
            full(lp["gain"]), full(lp["bias"]),
        ],
        out_specs=pl.BlockSpec((tn, H), lambda i: (i, 0)),
        compiler_params=pltpu.CompilerParams(dimension_semantics=("parallel",)),
    )(h_V, h_E_flat, h_KV_flat, mcat,
      wq, wk1v, wk2v, wo, bd, lp["gain"], lp["bias"])


# --------------------------------------------------------------------------
# kernel 3: edge update  h_E = Normalize(relu(fc1([h_E | gather(h_V) | h_V])))
# fc1 row-split -> no (B,L,K,3H) concat / broadcast is ever materialized
# --------------------------------------------------------------------------
def _edge_kernel(hE_ref, hKVn_ref, hV_ref, we_ref, wkv_ref, wv_ref, b_ref,
                 g_ref, bias_ref, o_ref, *, K, H):
    hE = hE_ref[...]                                    # (TN, K*H) bf16
    hKVn = hKVn_ref[...]                                # (TN, K*H) bf16
    hVb = hV_ref[...].astype(jnp.bfloat16)              # (TN, H)
    yv = jnp.dot(hVb, wv_ref[...], preferred_element_type=jnp.float32) + b_ref[...]

    outs = []
    for j in range(K):
        sl = slice(j * H, (j + 1) * H)
        y = (jnp.dot(hE[:, sl], we_ref[...], preferred_element_type=jnp.float32)
             + jnp.dot(hKVn[:, sl], wkv_ref[...], preferred_element_type=jnp.float32)
             + yv)
        y = jnp.maximum(y, 0.0)
        outs.append(_norm_lastdim(y, g_ref[...], bias_ref[...]))
    # one lane-dense (TN, K*H) store
    o_ref[...] = jnp.concatenate(outs, axis=-1).astype(o_ref.dtype)


def edge_update(h_E_flat, h_KVn_flat, h_V, fc1_w, fc1_b, gain, bias, K, H,
                tn_target=128):
    BL = h_V.shape[0]
    tn = _pick_tile(BL, tn_target)
    we = fc1_w[:H].astype(jnp.bfloat16)          # multiplies h_E
    wkv = fc1_w[H:2 * H].astype(jnp.bfloat16)    # multiplies gathered new h_V
    wv = fc1_w[2 * H:].astype(jnp.bfloat16)      # multiplies broadcast h_V

    def full(arr):
        nd = arr.ndim
        return pl.BlockSpec(arr.shape, lambda i, _n=nd: (0,) * _n)

    return pl.pallas_call(
        functools.partial(_edge_kernel, K=K, H=H),
        out_shape=jax.ShapeDtypeStruct((BL, K * H), jnp.bfloat16),
        grid=(BL // tn,),
        in_specs=[
            pl.BlockSpec((tn, K * H), lambda i: (i, 0)),
            pl.BlockSpec((tn, K * H), lambda i: (i, 0)),
            pl.BlockSpec((tn, H), lambda i: (i, 0)),
            full(we), full(wkv), full(wv), full(fc1_b), full(gain), full(bias),
        ],
        out_specs=pl.BlockSpec((tn, K * H), lambda i: (i, 0)),
        compiler_params=pltpu.CompilerParams(dimension_semantics=("parallel",)),
    )(h_E_flat, h_KVn_flat, h_V, we, wkv, wv, fc1_b, gain, bias)


# --------------------------------------------------------------------------
# plain-JAX glue (data-dependent gather), mirroring torch gather_nodes
# --------------------------------------------------------------------------
def gather_nodes(nodes, e_idx):
    # nodes: (B, L, C), e_idx: (B, L, K) -> (B, L, K, C)
    B, L, K = e_idx.shape
    C = nodes.shape[-1]
    idx = e_idx.reshape(B, L * K)[:, :, None]
    g = jnp.take_along_axis(nodes, idx, axis=1)
    return g.reshape(B, L, K, C)


def pema_forward(params, V, E, E_idx, mask, nheads):
    B, L, K = E_idx.shape
    H = params["Ws"].shape[1]
    BL = B * L
    mask = mask.astype(jnp.float32)

    h_V = linear(V.reshape(BL, -1), params["Ws"], params["bs"],
                 out_dtype=jnp.float32)                                   # (BL, H)
    h_E = linear(E.reshape(BL * K, -1), params["Wt"], params["bt"],
                 out_dtype=jnp.bfloat16).reshape(BL, K * H)               # (BL, K*H)

    mask_attend = gather_nodes(mask[..., None], E_idx)[..., 0]            # (B,L,K)
    mask_attend = mask[:, :, None] * mask_attend
    mcat = jnp.concatenate([mask.reshape(BL, 1),
                            mask_attend.reshape(BL, K)], axis=1)          # (BL, 1+K)

    for lp in params["layers"]:
        h_KV = gather_nodes(h_V.reshape(B, L, H), E_idx)
        h_KV = h_KV.astype(jnp.bfloat16).reshape(BL, K * H)
        h_V = attention_layer(h_V, h_E, h_KV, mcat, lp, nheads, K, H)

        h_KV_new = gather_nodes(h_V.reshape(B, L, H), E_idx)
        h_KV_new = h_KV_new.astype(jnp.bfloat16).reshape(BL, K * H)
        h_E = edge_update(h_E, h_KV_new, h_V, params["fc1_w"], params["fc1_b"],
                          params["norm_gain"], params["norm_bias"], K, H)
    return h_V.reshape(B, L, H)


# --------------------------------------------------------------------------
# deterministic synthetic parameter init (xavier-uniform for matrices)
# --------------------------------------------------------------------------
def init_params(key, node_features, edge_features, hidden_dim, nheads):
    H = hidden_dim[0]
    n_layers = len(hidden_dim)
    keys = iter(jax.random.split(key, 6 + 5 * n_layers))

    def xav(shape):
        fi, fo = shape
        lim = (6.0 / (fi + fo)) ** 0.5
        return jax.random.uniform(next(keys), shape, jnp.float32, -lim, lim)

    def unif_bias(fan_in):
        lim = 1.0 / (fan_in ** 0.5)
        return jax.random.uniform(next(keys), (1, H), jnp.float32, -lim, lim)

    params = {
        "Ws": xav((node_features, H)), "bs": unif_bias(node_features),
        "Wt": xav((edge_features, H)), "bt": unif_bias(edge_features),
        "fc1_w": xav((3 * H, H)), "fc1_b": unif_bias(3 * H),
        "norm_gain": jnp.ones((1, H), jnp.float32),
        "norm_bias": jnp.zeros((1, H), jnp.float32),
        "layers": [],
    }
    for _ in range(n_layers):
        params["layers"].append({
            "wq": xav((H, H)), "wk1": xav((H, H)), "wk2": xav((H, H)),
            "wv": xav((2 * H, H)), "wo": xav((H, H)),
            "gain": jnp.ones((1, H), jnp.float32),
            "bias": jnp.zeros((1, H), jnp.float32),
        })
    return params


# --------------------------------------------------------------------------
if __name__ == "__main__":
    B, L, K = 2, 16, 4
    node_features, edge_features = 6, 7
    hidden_dim = [32, 32]     # two encoder layers; fc1/norm shared as in PEMA
    nheads = 4

    root = jax.random.PRNGKey(0)
    kV, kE, kI, kM, kP = jax.random.split(root, 5)

    V = jax.random.normal(kV, (B, L, node_features), jnp.float32)
    E = jax.random.normal(kE, (B, L, K, edge_features), jnp.float32)
    E_idx = jax.random.randint(kI, (B, L, K), 0, L, dtype=jnp.int32)
    mask = (jax.random.uniform(kM, (B, L)) > 0.2).astype(jnp.float32)

    params = init_params(kP, node_features, edge_features, hidden_dim, nheads)

    fwd = jax.jit(functools.partial(pema_forward, nheads=nheads))
    h_V_out = fwd(params, V, E, E_idx, mask)
    jax.block_until_ready(h_V_out)
    assert h_V_out.shape == (B, L, hidden_dim[0])
    assert bool(jnp.all(jnp.isfinite(h_V_out)))
    print("KERNEL_OK")
</pallas_src>

<mosaic_0001>
module attributes {stable_mosaic.version = 11 : i64} {
  func.func @_linear_kernel(%arg0: i32, %arg1: memref<32x6xbf16, #tpu.memory_space<vmem>>, %arg2: memref<6x32xbf16, #tpu.memory_space<vmem>>, %arg3: memref<1x32xf32, #tpu.memory_space<vmem>>, %arg4: memref<32x32xf32, #tpu.memory_space<vmem>>) attributes {dimension_semantics = [#tpu.dimension_semantics<parallel>], iteration_bounds = array<i64: 1>, scalar_prefetch = 0 : i64, scratch_operands = 0 : i64, tpu.core_type = #tpu.core_type<tc>, window_params = [{transform_indices = @transform_0, window_bounds = array<i64: 32, 6>}, {pipeline_mode = #tpu.pipeline_mode<synchronous>, transform_indices = @transform_1, window_bounds = array<i64: 6, 32>}, {pipeline_mode = #tpu.pipeline_mode<synchronous>, transform_indices = @transform_2, window_bounds = array<i64: 1, 32>}, {transform_indices = @transform_3, window_bounds = array<i64: 32, 32>}]} {
    %c0 = arith.constant 0 : index
    %c0_0 = arith.constant 0 : index
    %0 = vector.load %arg1[%c0, %c0_0] : memref<32x6xbf16, #tpu.memory_space<vmem>>, vector<32x6xbf16>
    %c0_1 = arith.constant 0 : index
    %c0_2 = arith.constant 0 : index
    %1 = vector.load %arg2[%c0_1, %c0_2] : memref<6x32xbf16, #tpu.memory_space<vmem>>, vector<6x32xbf16>
    %cst = arith.constant dense<0.000000e+00> : vector<32x32xf32>
    %2 = tpu.matmul %0, %1, %cst {dimension_numbers = #tpu.dot_dimension_numbers<[1], [0], [0], [1], [0, 0, 1, 1], [], []>} : vector<32x6xbf16>, vector<6x32xbf16>, vector<32x32xf32> -> vector<32x32xf32>
    %c0_3 = arith.constant 0 : index
    %c0_4 = arith.constant 0 : index
    %3 = vector.load %arg3[%c0_3, %c0_4] : memref<1x32xf32, #tpu.memory_space<vmem>>, vector<1x32xf32>
    %4 = vector.broadcast %3 : vector<1x32xf32> to vector<32x32xf32>
    %5 = arith.addf %2, %4 : vector<32x32xf32>
    %c0_5 = arith.constant 0 : index
    %c0_6 = arith.constant 0 : index
    %6 = vector.load %arg4[%c0_5, %c0_6] : memref<32x32xf32, #tpu.memory_space<vmem>>, vector<32x32xf32>
    tpu.vector_store %arg4[%c0_5, %c0_6], %5 {strides = array<i32>} : memref<32x32xf32, #tpu.memory_space<vmem>>, vector<32x32xf32>,
    return
  }
  func.func @transform_0(%arg0: i32) -> (i32, i32) {
    %c0_i32 = arith.constant 0 : i32
    %c0_i32_0 = arith.constant 0 : i32
    return %arg0, %c0_i32 : i32, i32
  }
  func.func @transform_1(%arg0: i32) -> (i32, i32) {
    %c0_i32 = arith.constant 0 : i32
    %c0_i32_0 = arith.constant 0 : i32
    %c0_i32_1 = arith.constant 0 : i32
    return %c0_i32, %c0_i32_0 : i32, i32
  }
  func.func @transform_2(%arg0: i32) -> (i32, i32) {
    %c0_i32 = arith.constant 0 : i32
    %c0_i32_0 = arith.constant 0 : i32
    %c0_i32_1 = arith.constant 0 : i32
    return %c0_i32, %c0_i32_0 : i32, i32
  }
  func.func @transform_3(%arg0: i32) -> (i32, i32) {
    %c0_i32 = arith.constant 0 : i32
    %c0_i32_0 = arith.constant 0 : i32
    return %arg0, %c0_i32 : i32, i32
  }
}

module attributes {stable_mosaic.version = 11 : i64} {
  func.func @_linear_kernel(%arg0: i32, %arg1: memref<128x7xbf16, #tpu.memory_space<vmem>>, %arg2: memref<7x32xbf16, #tpu.memory_space<vmem>>, %arg3: memref<1x32xf32, #tpu.memory_space<vmem>>, %arg4: memref<128x32xbf16, #tpu.memory_space<vmem>>) attributes {dimension_semantics = [#tpu.dimension_semantics<parallel>], iteration_bounds = array<i64: 1>, scalar_prefetch = 0 : i64, scratch_operands = 0 : i64, tpu.core_type = #tpu.core_type<tc>, window_params = [{transform_indices = @transform_0, window_bounds = array<i64: 128, 7>}, {pipeline_mode = #tpu.pipeline_mode<synchronous>, transform_indices = @transform_1, window_bounds = array<i64: 7, 32>}, {pipeline_mode = #tpu.pipeline_mode<synchronous>, transform_indices = @transform_2, window_bounds = array<i64: 1, 32>}, {transform_indices = @transform_3, window_bounds = array<i64: 128, 32>}]} {
    %c0 = arith.constant 0 : index
    %c0_0 = arith.constant 0 : index
    %0 = vector.load %arg1[%c0, %c0_0] : memref<128x7xbf16, #tpu.memory_space<vmem>>, vector<128x7xbf16>
    %c0_1 = arith.constant 0 : index
    %c0_2 = arith.constant 0 : index
    %1 = vector.load %arg2[%c0_1, %c0_2] : memref<7x32xbf16, #tpu.memory_space<vmem>>, vector<7x32xbf16>
    %cst = arith.constant dense<0.000000e+00> : vector<128x32xf32>
    %2 = tpu.matmul %0, %1, %cst {dimension_numbers = #tpu.dot_dimension_numbers<[1], [0], [0], [1], [0, 0, 1, 1], [], []>} : vector<128x7xbf16>, vector<7x32xbf16>, vector<128x32xf32> -> vector<128x32xf32>
    %c0_3 = arith.constant 0 : index
    %c0_4 = arith.constant 0 : index
    %3 = vector.load %arg3[%c0_3, %c0_4] : memref<1x32xf32, #tpu.memory_space<vmem>>, vector<1x32xf32>
    %4 = vector.broadcast %3 : vector<1x32xf32> to vector<128x32xf32>
    %5 = arith.addf %2, %4 : vector<128x32xf32>
    %6 = arith.truncf %5 : vector<128x32xf32> to vector<128x32xbf16>
    %c0_5 = arith.constant 0 : index
    %c0_6 = arith.constant 0 : index
    %7 = vector.load %arg4[%c0_5, %c0_6] : memref<128x32xbf16, #tpu.memory_space<vmem>>, vector<128x32xbf16>
    tpu.vector_store %arg4[%c0_5, %c0_6], %6 {strides = array<i32>} : memref<128x32xbf16, #tpu.memory_space<vmem>>, vector<128x32xbf16>,
    return
  }
  func.func @transform_0(%arg0: i32) -> (i32, i32) {
    %c0_i32 = arith.constant 0 : i32
    %c0_i32_0 = arith.constant 0 : i32
    return %arg0, %c0_i32 : i32, i32
  }
  func.func @transform_1(%arg0: i32) -> (i32, i32) {
    %c0_i32 = arith.constant 0 : i32
    %c0_i32_0 = arith.constant 0 : i32
    %c0_i32_1 = arith.constant 0 : i32
    return %c0_i32, %c0_i32_0 : i32, i32
  }
  func.func @transform_2(%arg0: i32) -> (i32, i32) {
    %c0_i32 = arith.constant 0 : i32
    %c0_i32_0 = arith.constant 0 : i32
    %c0_i32_1 = arith.constant 0 : i32
    return %c0_i32, %c0_i32_0 : i32, i32
  }
  func.func @transform_3(%arg0: i32) -> (i32, i32) {
    %c0_i32 = arith.constant 0 : i32
    %c0_i32_0 = arith.constant 0 : i32
    return %arg0, %c0_i32 : i32, i32
  }
}

module attributes {stable_mosaic.version = 11 : i64} {
  func.func @_attn_layer_kernel(%arg0: i32, %arg1: memref<32x32xf32, #tpu.memory_space<vmem>>, %arg2: memref<32x128xbf16, #tpu.memory_space<vmem>>, %arg3: memref<32x128xbf16, #tpu.memory_space<vmem>>, %arg4: memref<32x5xf32, #tpu.memory_space<vmem>>, %arg5: memref<32x32xbf16, #tpu.memory_space<vmem>>, %arg6: memref<32x64xbf16, #tpu.memory_space<vmem>>, %arg7: memref<32x64xbf16, #tpu.memory_space<vmem>>, %arg8: memref<32x32xbf16, #tpu.memory_space<vmem>>, %arg9: memref<32x32xf32, #tpu.memory_space<vmem>>, %arg10: memref<1x32xf32, #tpu.memory_space<vmem>>, %arg11: memref<1x32xf32, #tpu.memory_space<vmem>>, %arg12: memref<32x32xf32, #tpu.memory_space<vmem>>) attributes {dimension_semantics = [#tpu.dimension_semantics<parallel>], iteration_bounds = array<i64: 1>, scalar_prefetch = 0 : i64, scratch_operands = 0 : i64, tpu.core_type = #tpu.core_type<tc>, window_params = [{transform_indices = @transform_0, window_bounds = array<i64: 32, 32>}, {transform_indices = @transform_1, window_bounds = array<i64: 32, 128>}, {transform_indices = @transform_2, window_bounds = array<i64: 32, 128>}, {transform_indices = @transform_3, window_bounds = array<i64: 32, 5>}, {pipeline_mode = #tpu.pipeline_mode<synchronous>, transform_indices = @transform_4, window_bounds = array<i64: 32, 32>}, {pipeline_mode = #tpu.pipeline_mode<synchronous>, transform_indices = @transform_5, window_bounds = array<i64: 32, 64>}, {pipeline_mode = #tpu.pipeline_mode<synchronous>, transform_indices = @transform_6, window_bounds = array<i64: 32, 64>}, {pipeline_mode = #tpu.pipeline_mode<synchronous>, transform_indices = @transform_7, window_bounds = array<i64: 32, 32>}, {pipeline_mode = #tpu.pipeline_mode<synchronous>, transform_indices = @transform_8, window_bounds = array<i64: 32, 32>}, {pipeline_mode = #tpu.pipeline_mode<synchronous>, transform_indices = @transform_9, window_bounds = array<i64: 1, 32>}, {pipeline_mode = #tpu.pipeline_mode<synchronous>, transform_indices = @transform_10, window_bounds = array<i64: 1, 32>}, {transform_indices = @transform_11, window_bounds = array<i64: 32, 32>}]} {
    %c0 = arith.constant 0 : index
    %c0_0 = arith.constant 0 : index
    %0 = vector.load %arg1[%c0, %c0_0] : memref<32x32xf32, #tpu.memory_space<vmem>>, vector<32x32xf32>
    %c0_1 = arith.constant 0 : index
    %c0_2 = arith.constant 0 : index
    %1 = vector.load %arg2[%c0_1, %c0_2] : memref<32x128xbf16, #tpu.memory_space<vmem>>, vector<32x128xbf16>
    %c0_3 = arith.constant 0 : index
    %c0_4 = arith.constant 0 : index
    %2 = vector.load %arg3[%c0_3, %c0_4] : memref<32x128xbf16, #tpu.memory_space<vmem>>, vector<32x128xbf16>
    %c0_5 = arith.constant 0 : index
    %c0_6 = arith.constant 0 : index
    %3 = vector.load %arg4[%c0_5, %c0_6] : memref<32x5xf32, #tpu.memory_space<vmem>>, vector<32x5xf32>
    %4 = vector.extract_strided_slice %3 {offsets = [0, 0], sizes = [32, 1], strides = [1, 1]} : vector<32x5xf32> to vector<32x1xf32>
    %5 = arith.truncf %0 : vector<32x32xf32> to vector<32x32xbf16>
    %c0_7 = arith.constant 0 : index
    %c0_8 = arith.constant 0 : index
    %6 = vector.load %arg5[%c0_7, %c0_8] : memref<32x32xbf16, #tpu.memory_space<vmem>>, vector<32x32xbf16>
    %cst = arith.constant dense<0.000000e+00> : vector<32x32xf32>
    %7 = tpu.matmul %5, %6, %cst {dimension_numbers = #tpu.dot_dimension_numbers<[1], [0], [0], [1], [0, 0, 1, 1], [], []>} : vector<32x32xbf16>, vector<32x32xbf16>, vector<32x32xf32> -> vector<32x32xf32>
    %8 = vector.extract_strided_slice %1 {offsets = [0, 0], sizes = [32, 32], strides = [1, 1]} : vector<32x128xbf16> to vector<32x32xbf16>
    %c0_9 = arith.constant 0 : index
    %c0_10 = arith.constant 0 : index
    %9 = vector.load %arg6[%c0_9, %c0_10] : memref<32x64xbf16, #tpu.memory_space<vmem>>, vector<32x64xbf16>
    %cst_11 = arith.constant dense<0.000000e+00> : vector<32x64xf32>
    %10 = tpu.matmul %8, %9, %cst_11 {dimension_numbers = #tpu.dot_dimension_numbers<[1], [0], [0], [1], [0, 0, 1, 1], [], []>} : vector<32x32xbf16>, vector<32x64xbf16>, vector<32x64xf32> -> vector<32x64xf32>
    %11 = vector.extract_strided_slice %2 {offsets = [0, 0], sizes = [32, 32], strides = [1, 1]} : vector<32x128xbf16> to vector<32x32xbf16>
    %c0_12 = arith.constant 0 : index
    %c0_13 = arith.constant 0 : index
    %12 = vector.load %arg7[%c0_12, %c0_13] : memref<32x64xbf16, #tpu.memory_space<vmem>>, vector<32x64xbf16>
    %cst_14 = arith.constant dense<0.000000e+00> : vector<32x64xf32>
    %13 = tpu.matmul %11, %12, %cst_14 {dimension_numbers = #tpu.dot_dimension_numbers<[1], [0], [0], [1], [0, 0, 1, 1], [], []>} : vector<32x32xbf16>, vector<32x64xbf16>, vector<32x64xf32> -> vector<32x64xf32>
    %14 = vector.extract_strided_slice %10 {offsets = [0, 0], sizes = [32, 32], strides = [1, 1]} : vector<32x64xf32> to vector<32x32xf32>
    %15 = arith.mulf %7, %14 : vector<32x32xf32>
    %16 = vector.extract_strided_slice %13 {offsets = [0, 0], sizes = [32, 32], strides = [1, 1]} : vector<32x64xf32> to vector<32x32xf32>
    %17 = arith.mulf %15, %16 : vector<32x32xf32>
    %c0_15 = arith.constant 0 : index
    %c0_16 = arith.constant 0 : index
    %18 = vector.load %arg9[%c0_15, %c0_16] : memref<32x32xf32, #tpu.memory_space<vmem>>, vector<32x32xf32>
    %cst_17 = arith.constant dense<0.000000e+00> : vector<32x32xf32>
    %19 = tpu.matmul %17, %18, %cst_17 {dimension_numbers = #tpu.dot_dimension_numbers<[1], [0], [0], [1], [0, 0, 1, 1], [], []>} : vector<32x32xf32>, vector<32x32xf32>, vector<32x32xf32> -> vector<32x32xf32>
    %20 = vector.extract_strided_slice %3 {offsets = [0, 1], sizes = [32, 1], strides = [1, 1]} : vector<32x5xf32> to vector<32x1xf32>
    %cst_18 = arith.constant 0.000000e+00 : f32
    %21 = vector.broadcast %cst_18 : f32 to vector<32x1xf32>
    %22 = arith.cmpf ogt, %20, %21 : vector<32x1xf32>
    %cst_19 = arith.constant -3.40282347E+38 : f32
    %23 = vector.shape_cast %22 : vector<32x1xi1> to vector<32x1xi1>
    %24 = vector.broadcast %23 : vector<32x1xi1> to vector<32x32xi1>
    %25 = vector.broadcast %cst_19 : f32 to vector<32x32xf32>
    %26 = arith.select %24, %19, %25 : vector<32x32xi1>, vector<32x32xf32>
    %27 = vector.extract_strided_slice %10 {offsets = [0, 32], sizes = [32, 32], strides = [1, 1]} : vector<32x64xf32> to vector<32x32xf32>
    %28 = vector.extract_strided_slice %13 {offsets = [0, 32], sizes = [32, 32], strides = [1, 1]} : vector<32x64xf32> to vector<32x32xf32>
    %29 = arith.addf %27, %28 : vector<32x32xf32>
    %30 = vector.extract_strided_slice %1 {offsets = [0, 32], sizes = [32, 32], strides = [1, 1]} : vector<32x128xbf16> to vector<32x32xbf16>
    %c0_20 = arith.constant 0 : index
    %c0_21 = arith.constant 0 : index
    %31 = vector.load %arg6[%c0_20, %c0_21] : memref<32x64xbf16, #tpu.memory_space<vmem>>, vector<32x64xbf16>
    %cst_22 = arith.constant dense<0.000000e+00> : vector<32x64xf32>
    %32 = tpu.matmul %30, %31, %cst_22 {dimension_numbers = #tpu.dot_dimension_numbers<[1], [0], [0], [1], [0, 0, 1, 1], [], []>} : vector<32x32xbf16>, vector<32x64xbf16>, vector<32x64xf32> -> vector<32x64xf32>
    %33 = vector.extract_strided_slice %2 {offsets = [0, 32], sizes = [32, 32], strides = [1, 1]} : vector<32x128xbf16> to vector<32x32xbf16>
    %c0_23 = arith.constant 0 : index
    %c0_24 = arith.constant 0 : index
    %34 = vector.load %arg7[%c0_23, %c0_24] : memref<32x64xbf16, #tpu.memory_space<vmem>>, vector<32x64xbf16>
    %cst_25 = arith.constant dense<0.000000e+00> : vector<32x64xf32>
    %35 = tpu.matmul %33, %34, %cst_25 {dimension_numbers = #tpu.dot_dimension_numbers<[1], [0], [0], [1], [0, 0, 1, 1], [], []>} : vector<32x32xbf16>, vector<32x64xbf16>, vector<32x64xf32> -> vector<32x64xf32>
    %36 = vector.extract_strided_slice %32 {offsets = [0, 0], sizes = [32, 32], strides = [1, 1]} : vector<32x64xf32> to vector<32x32xf32>
    %37 = arith.mulf %7, %36 : vector<32x32xf32>
    %38 = vector.extract_strided_slice %35 {offsets = [0, 0], sizes = [32, 32], strides = [1, 1]} : vector<32x64xf32> to vector<32x32xf32>
    %39 = arith.mulf %37, %38 : vector<32x32xf32>
    %c0_26 = arith.constant 0 : index
    %c0_27 = arith.constant 0 : index
    %40 = vector.load %arg9[%c0_26, %c0_27] : memref<32x32xf32, #tpu.memory_space<vmem>>, vector<32x32xf32>
    %cst_28 = arith.constant dense<0.000000e+00> : vector<32x32xf32>
    %41 = tpu.matmul %39, %40, %cst_28 {dimension_numbers = #tpu.dot_dimension_numbers<[1], [0], [0], [1], [0, 0, 1, 1], [], []>} : vector<32x32xf32>, vector<32x32xf32>, vector<32x32xf32> -> vector<32x32xf32>
    %42 = vector.extract_strided_slice %3 {offsets = [0, 2], sizes = [32, 1], strides = [1, 1]} : vector<32x5xf32> to vector<32x1xf32>
    %cst_29 = arith.constant 0.000000e+00 : f32
    %43 = vector.broadcast %cst_29 : f32 to vector<32x1xf32>
    %44 = arith.cmpf ogt, %42, %43 : vector<32x1xf32>
    %cst_30 = arith.constant -3.40282347E+38 : f32
    %45 = vector.shape_cast %44 : vector<32x1xi1> to vector<32x1xi1>
    %46 = vector.broadcast %45 : vector<32x1xi1> to vector<32x32xi1>
    %47 = vector.broadcast %cst_30 : f32 to vector<32x32xf32>
    %48 = arith.select %46, %41, %47 : vector<32x32xi1>, vector<32x32xf32>
    %49 = vector.extract_strided_slice %32 {offsets = [0, 32], sizes = [32, 32], strides = [1, 1]} : vector<32x64xf32> to vector<32x32xf32>
    %50 = vector.extract_strided_slice %35 {offsets = [0, 32], sizes = [32, 32], strides = [1, 1]} : vector<32x64xf32> to vector<32x32xf32>
    %51 = arith.addf %49, %50 : vector<32x32xf32>
    %52 = vector.extract_strided_slice %1 {offsets = [0, 64], sizes = [32, 32], strides = [1, 1]} : vector<32x128xbf16> to vector<32x32xbf16>
    %c0_31 = arith.constant 0 : index
    %c0_32 = arith.constant 0 : index
    %53 = vector.load %arg6[%c0_31, %c0_32] : memref<32x64xbf16, #tpu.memory_space<vmem>>, vector<32x64xbf16>
    %cst_33 = arith.constant dense<0.000000e+00> : vector<32x64xf32>
    %54 = tpu.matmul %52, %53, %cst_33 {dimension_numbers = #tpu.dot_dimension_numbers<[1], [0], [0], [1], [0, 0, 1, 1], [], []>} : vector<32x32xbf16>, vector<32x64xbf16>, vector<32x64xf32> -> vector<32x64xf32>
    %55 = vector.extract_strided_slice %2 {offsets = [0, 64], sizes = [32, 32], strides = [1, 1]} : vector<32x128xbf16> to vector<32x32xbf16>
    %c0_34 = arith.constant 0 : index
    %c0_35 = arith.constant 0 : index
    %56 = vector.load %arg7[%c0_34, %c0_35] : memref<32x64xbf16, #tpu.memory_space<vmem>>, vector<32x64xbf16>
    %cst_36 = arith.constant dense<0.000000e+00> : vector<32x64xf32>
    %57 = tpu.matmul %55, %56, %cst_36 {dimension_numbers = #tpu.dot_dimension_numbers<[1], [0], [0], [1], [0, 0, 1, 1], [], []>} : vector<32x32xbf16>, vector<32x64xbf16>, vector<32x64xf32> -> vector<32x64xf32>
    %58 = vector.extract_strided_slice %54 {offsets = [0, 0], sizes = [32, 32], strides = [1, 1]} : vector<32x64xf32> to vector<32x32xf32>
    %59 = arith.mulf %7, %58 : vector<32x32xf32>
    %60 = vector.extract_strided_slice %57 {offsets = [0, 0], sizes = [32, 32], strides = [1, 1]} : vector<32x64xf32> to vector<32x32xf32>
    %61 = arith.mulf %59, %60 : vector<32x32xf32>
    %c0_37 = arith.constant 0 : index
    %c0_38 = arith.constant 0 : index
    %62 = vector.load %arg9[%c0_37, %c0_38] : memref<32x32xf32, #tpu.memory_space<vmem>>, vector<32x32xf32>
    %cst_39 = arith.constant dense<0.000000e+00> : vector<32x32xf32>
    %63 = tpu.matmul %61, %62, %cst_39 {dimension_numbers = #tpu.dot_dimension_numbers<[1], [0], [0], [1], [0, 0, 1, 1], [], []>} : vector<32x32xf32>, vector<32x32xf32>, vector<32x32xf32> -> vector<32x32xf32>
    %64 = vector.extract_strided_slice %3 {offsets = [0, 3], sizes = [32, 1], strides = [1, 1]} : vector<32x5xf32> to vector<32x1xf32>
    %cst_40 = arith.constant 0.000000e+00 : f32
    %65 = vector.broadcast %cst_40 : f32 to vector<32x1xf32>
    %66 = arith.cmpf ogt, %64, %65 : vector<32x1xf32>
    %cst_41 = arith.constant -3.40282347E+38 : f32
    %67 = vector.shape_cast %66 : vector<32x1xi1> to vector<32x1xi1>
    %68 = vector.broadcast %67 : vector<32x1xi1> to vector<32x32xi1>
    %69 = vector.broadcast %cst_41 : f32 to vector<32x32xf32>
    %70 = arith.select %68, %63, %69 : vector<32x32xi1>, vector<32x32xf32>
    %71 = vector.extract_strided_slice %54 {offsets = [0, 32], sizes = [32, 32], strides = [1, 1]} : vector<32x64xf32> to vector<32x32xf32>
    %72 = vector.extract_strided_slice %57 {offsets = [0, 32], sizes = [32, 32], strides = [1, 1]} : vector<32x64xf32> to vector<32x32xf32>
    %73 = arith.addf %71, %72 : vector<32x32xf32>
    %74 = vector.extract_strided_slice %1 {offsets = [0, 96], sizes = [32, 32], strides = [1, 1]} : vector<32x128xbf16> to vector<32x32xbf16>
    %c0_42 = arith.constant 0 : index
    %c0_43 = arith.constant 0 : index
    %75 = vector.load %arg6[%c0_42, %c0_43] : memref<32x64xbf16, #tpu.memory_space<vmem>>, vector<32x64xbf16>
    %cst_44 = arith.constant dense<0.000000e+00> : vector<32x64xf32>
    %76 = tpu.matmul %74, %75, %cst_44 {dimension_numbers = #tpu.dot_dimension_numbers<[1], [0], [0], [1], [0, 0, 1, 1], [], []>} : vector<32x32xbf16>, vector<32x64xbf16>, vector<32x64xf32> -> vector<32x64xf32>
    %77 = vector.extract_strided_slice %2 {offsets = [0, 96], sizes = [32, 32], strides = [1, 1]} : vector<32x128xbf16> to vector<32x32xbf16>
    %c0_45 = arith.constant 0 : index
    %c0_46 = arith.constant 0 : index
    %78 = vector.load %arg7[%c0_45, %c0_46] : memref<32x64xbf16, #tpu.memory_space<vmem>>, vector<32x64xbf16>
    %cst_47 = arith.constant dense<0.000000e+00> : vector<32x64xf32>
    %79 = tpu.matmul %77, %78, %cst_47 {dimension_numbers = #tpu.dot_dimension_numbers<[1], [0], [0], [1], [0, 0, 1, 1], [], []>} : vector<32x32xbf16>, vector<32x64xbf16>, vector<32x64xf32> -> vector<32x64xf32>
    %80 = vector.extract_strided_slice %76 {offsets = [0, 0], sizes = [32, 32], strides = [1, 1]} : vector<32x64xf32> to vector<32x32xf32>
    %81 = arith.mulf %7, %80 : vector<32x32xf32>
    %82 = vector.extract_strided_slice %79 {offsets = [0, 0], sizes = [32, 32], strides = [1, 1]} : vector<32x64xf32> to vector<32x32xf32>
    %83 = arith.mulf %81, %82 : vector<32x32xf32>
    %c0_48 = arith.constant 0 : index
    %c0_49 = arith.constant 0 : index
    %84 = vector.load %arg9[%c0_48, %c0_49] : memref<32x32xf32, #tpu.memory_space<vmem>>, vector<32x32xf32>
    %cst_50 = arith.constant dense<0.000000e+00> : vector<32x32xf32>
    %85 = tpu.matmul %83, %84, %cst_50 {dimension_numbers = #tpu.dot_dimension_numbers<[1], [0], [0], [1], [0, 0, 1, 1], [], []>} : vector<32x32xf32>, vector<32x32xf32>, vector<32x32xf32> -> vector<32x32xf32>
    %86 = vector.extract_strided_slice %3 {offsets = [0, 4], sizes = [32, 1], strides = [1, 1]} : vector<32x5xf32> to vector<32x1xf32>
    %cst_51 = arith.constant 0.000000e+00 : f32
    %87 = vector.broadcast %cst_51 : f32 to vector<32x1xf32>
    %88 = arith.cmpf ogt, %86, %87 : vector<32x1xf32>
    %cst_52 = arith.constant -3.40282347E+38 : f32
    %89 = vector.shape_cast %88 : vector<32x1xi1> to vector<32x1xi1>
    %90 = vector.broadcast %89 : vector<32x1xi1> to vector<32x32xi1>
    %91 = vector.broadcast %cst_52 : f32 to vector<32x32xf32>
    %92 = arith.select %90, %85, %91 : vector<32x32xi1>, vector<32x32xf32>
    %93 = vector.extract_strided_slice %76 {offsets = [0, 32], sizes = [32, 32], strides = [1, 1]} : vector<32x64xf32> to vector<32x32xf32>
    %94 = vector.extract_strided_slice %79 {offsets = [0, 32], sizes = [32, 32], strides = [1, 1]} : vector<32x64xf32> to vector<32x32xf32>
    %95 = arith.addf %93, %94 : vector<32x32xf32>
    %96 = arith.maximumf %26, %48 : vector<32x32xf32>
    %97 = arith.maximumf %96, %70 : vector<32x32xf32>
    %98 = arith.maximumf %97, %92 : vector<32x32xf32>
    %99 = arith.subf %26, %98 : vector<32x32xf32>
    %100 = math.exp %99 : vector<32x32xf32>
    %101 = arith.subf %48, %98 : vector<32x32xf32>
    %102 = math.exp %101 : vector<32x32xf32>
    %103 = arith.subf %70, %98 : vector<32x32xf32>
    %104 = math.exp %103 : vector<32x32xf32>
    %105 = arith.subf %92, %98 : vector<32x32xf32>
    %106 = math.exp %105 : vector<32x32xf32>
    %107 = arith.addf %100, %102 : vector<32x32xf32>
    %108 = arith.addf %107, %104 : vector<32x32xf32>
    %109 = arith.addf %108, %106 : vector<32x32xf32>
    %110 = tpu.reciprocal %109 {approx = true} : vector<32x32xf32> -> vector<32x32xf32>
    %111 = vector.broadcast %20 : vector<32x1xf32> to vector<32x32xf32>
    %112 = arith.mulf %111, %100 : vector<32x32xf32>
    %113 = arith.mulf %112, %110 : vector<32x32xf32>
    %114 = arith.mulf %113, %29 : vector<32x32xf32>
    %115 = vector.broadcast %42 : vector<32x1xf32> to vector<32x32xf32>
    %116 = arith.mulf %115, %102 : vector<32x32xf32>
    %117 = arith.mulf %116, %110 : vector<32x32xf32>
    %118 = arith.mulf %117, %51 : vector<32x32xf32>
    %119 = arith.addf %114, %118 : vector<32x32xf32>
    %120 = vector.broadcast %64 : vector<32x1xf32> to vector<32x32xf32>
    %121 = arith.mulf %120, %104 : vector<32x32xf32>
    %122 = arith.mulf %121, %110 : vector<32x32xf32>
    %123 = arith.mulf %122, %73 : vector<32x32xf32>
    %124 = arith.addf %119, %123 : vector<32x32xf32>
    %125 = vector.broadcast %86 : vector<32x1xf32> to vector<32x32xf32>
    %126 = arith.mulf %125, %106 : vector<32x32xf32>
    %127 = arith.mulf %126, %110 : vector<32x32xf32>
    %128 = arith.mulf %127, %95 : vector<32x32xf32>
    %129 = arith.addf %124, %128 : vector<32x32xf32>
    %130 = arith.truncf %129 : vector<32x32xf32> to vector<32x32xbf16>
    %c0_53 = arith.constant 0 : index
    %c0_54 = arith.constant 0 : index
    %131 = vector.load %arg8[%c0_53, %c0_54] : memref<32x32xbf16, #tpu.memory_space<vmem>>, vector<32x32xbf16>
    %cst_55 = arith.constant dense<0.000000e+00> : vector<32x32xf32>
    %132 = tpu.matmul %130, %131, %cst_55 {dimension_numbers = #tpu.dot_dimension_numbers<[1], [0], [0], [1], [0, 0, 1, 1], [], []>} : vector<32x32xbf16>, vector<32x32xbf16>, vector<32x32xf32> -> vector<32x32xf32>
    %133 = arith.addf %0, %132 : vector<32x32xf32>
    %c0_56 = arith.constant 0 : index
    %c0_57 = arith.constant 0 : index
    %134 = vector.load %arg10[%c0_56, %c0_57] : memref<1x32xf32, #tpu.memory_space<vmem>>, vector<1x32xf32>
    %c0_58 = arith.constant 0 : index
    %c0_59 = arith.constant 0 : index
    %135 = vector.load %arg11[%c0_58, %c0_59] : memref<1x32xf32, #tpu.memory_space<vmem>>, vector<1x32xf32>
    %cst_60 = arith.constant dense<0.000000e+00> : vector<32xf32>
    %136 = vector.multi_reduction <add>, %133, %cst_60 [1] : vector<32x32xf32> to vector<32xf32>
    %137 = vector.shape_cast %136 : vector<32xf32> to vector<32x1xf32>
    %cst_61 = arith.constant 3.200000e+01 : f32
    %138 = vector.broadcast %cst_61 : f32 to vector<32x1xf32>
    %139 = arith.divf %137, %138 : vector<32x1xf32>
    %140 = vector.broadcast %139 : vector<32x1xf32> to vector<32x32xf32>
    %141 = arith.subf %133, %140 : vector<32x32xf32>
    %142 = arith.mulf %141, %141 : vector<32x32xf32>
    %cst_62 = arith.constant dense<0.000000e+00> : vector<32xf32>
    %143 = vector.multi_reduction <add>, %142, %cst_62 [1] : vector<32x32xf32> to vector<32xf32>
    %144 = vector.shape_cast %143 : vector<32xf32> to vector<32x1xf32>
    %cst_63 = arith.constant 0.0322580636 : f32
    %145 = vector.broadcast %cst_63 : f32 to vector<32x1xf32>
    %146 = arith.mulf %144, %145 : vector<32x1xf32>
    %cst_64 = arith.constant 9.99999997E-7 : f32
    %147 = vector.broadcast %cst_64 : f32 to vector<32x1xf32>
    %148 = arith.addf %146, %147 : vector<32x1xf32>
    %149 = math.sqrt %148 : vector<32x1xf32>
    %cst_65 = arith.constant 9.99999997E-7 : f32
    %150 = vector.broadcast %cst_65 : f32 to vector<32x1xf32>
    %151 = arith.addf %149, %150 : vector<32x1xf32>
    %152 = tpu.reciprocal %151 {approx = true} : vector<32x1xf32> -> vector<32x1xf32>
    %153 = vector.broadcast %139 : vector<32x1xf32> to vector<32x32xf32>
    %154 = arith.subf %133, %153 : vector<32x32xf32>
    %155 = vector.broadcast %134 : vector<1x32xf32> to vector<32x32xf32>
    %156 = arith.mulf %155, %154 : vector<32x32xf32>
    %157 = vector.broadcast %152 : vector<32x1xf32> to vector<32x32xf32>
    %158 = arith.mulf %156, %157 : vector<32x32xf32>
    %159 = vector.broadcast %135 : vector<1x32xf32> to vector<32x32xf32>
    %160 = arith.addf %158, %159 : vector<32x32xf32>
    %161 = vector.broadcast %4 : vector<32x1xf32> to vector<32x32xf32>
    %162 = arith.mulf %161, %160 : vector<32x32xf32>
    %c0_66 = arith.constant 0 : index
    %c0_67 = arith.constant 0 : index
    %163 = vector.load %arg12[%c0_66, %c0_67] : memref<32x32xf32, #tpu.memory_space<vmem>>, vector<32x32xf32>
    tpu.vector_store %arg12[%c0_66, %c0_67], %162 {strides = array<i32>} : memref<32x32xf32, #tpu.memory_space<vmem>>, vector<32x32xf32>,
    return
  }
  func.func @transform_0(%arg0: i32) -> (i32, i32) {
    %c0_i32 = arith.constant 0 : i32
    %c0_i32_0 = arith.constant 0 : i32
    return %arg0, %c0_i32 : i32, i32
  }
  func.func @transform_1(%arg0: i32) -> (i32, i32) {
    %c0_i32 = arith.constant 0 : i32
    %c0_i32_0 = arith.constant 0 : i32
    return %arg0, %c0_i32 : i32, i32
  }
  func.func @transform_2(%arg0: i32) -> (i32, i32) {
    %c0_i32 = arith.constant 0 : i32
    %c0_i32_0 = arith.constant 0 : i32
    return %arg0, %c0_i32 : i32, i32
  }
  func.func @transform_3(%arg0: i32) -> (i32, i32) {
    %c0_i32 = arith.constant 0 : i32
    %c0_i32_0 = arith.constant 0 : i32
    return %arg0, %c0_i32 : i32, i32
  }
  func.func @transform_4(%arg0: i32) -> (i32, i32) {
    %c0_i32 = arith.constant 0 : i32
    %c0_i32_0 = arith.constant 0 : i32
    %c0_i32_1 = arith.constant 0 : i32
    return %c0_i32, %c0_i32_0 : i32, i32
  }
  func.func @transform_5(%arg0: i32) -> (i32, i32) {
    %c0_i32 = arith.constant 0 : i32
    %c0_i32_0 = arith.constant 0 : i32
    %c0_i32_1 = arith.constant 0 : i32
    return %c0_i32, %c0_i32_0 : i32, i32
  }
  func.func @transform_6(%arg0: i32) -> (i32, i32) {
    %c0_i32 = arith.constant 0 : i32
    %c0_i32_0 = arith.constant 0 : i32
    %c0_i32_1 = arith.constant 0 : i32
    return %c0_i32, %c0_i32_0 : i32, i32
  }
  func.func @transform_7(%arg0: i32) -> (i32, i32) {
    %c0_i32 = arith.constant 0 : i32
    %c0_i32_0 = arith.constant 0 : i32
    %c0_i32_1 = arith.constant 0 : i32
    return %c0_i32, %c0_i32_0 : i32, i32
  }
  func.func @transform_8(%arg0: i32) -> (i32, i32) {
    %c0_i32 = arith.constant 0 : i32
    %c0_i32_0 = arith.constant 0 : i32
    %c0_i32_1 = arith.constant 0 : i32
    return %c0_i32, %c0_i32_0 : i32, i32
  }
  func.func @transform_9(%arg0: i32) -> (i32, i32) {
    %c0_i32 = arith.constant 0 : i32
    %c0_i32_0 = arith.constant 0 : i32
    %c0_i32_1 = arith.constant 0 : i32
    return %c0_i32, %c0_i32_0 : i32, i32
  }
  func.func @transform_10(%arg0: i32) -> (i32, i32) {
    %c0_i32 = arith.constant 0 : i32
    %c0_i32_0 = arith.constant 0 : i32
    %c0_i32_1 = arith.constant 0 : i32
    return %c0_i32, %c0_i32_0 : i32, i32
  }
  func.func @transform_11(%arg0: i32) -> (i32, i32) {
    %c0_i32 = arith.constant 0 : i32
    %c0_i32_0 = arith.constant 0 : i32
    return %arg0, %c0_i32 : i32, i32
  }
}

module attributes {stable_mosaic.version = 11 : i64} {
  func.func @_attn_layer_kernel(%arg0: i32, %arg1: memref<32x32xf32, #tpu.memory_space<vmem>>, %arg2: memref<32x128xbf16, #tpu.memory_space<vmem>>, %arg3: memref<32x128xbf16, #tpu.memory_space<vmem>>, %arg4: memref<32x5xf32, #tpu.memory_space<vmem>>, %arg5: memref<32x32xbf16, #tpu.memory_space<vmem>>, %arg6: memref<32x64xbf16, #tpu.memory_space<vmem>>, %arg7: memref<32x64xbf16, #tpu.memory_space<vmem>>, %arg8: memref<32x32xbf16, #tpu.memory_space<vmem>>, %arg9: memref<32x32xf32, #tpu.memory_space<vmem>>, %arg10: memref<1x32xf32, #tpu.memory_space<vmem>>, %arg11: memref<1x32xf32, #tpu.memory_space<vmem>>, %arg12: memref<32x32xf32, #tpu.memory_space<vmem>>) attributes {dimension_semantics = [#tpu.dimension_semantics<parallel>], iteration_bounds = array<i64: 1>, scalar_prefetch = 0 : i64, scratch_operands = 0 : i64, tpu.core_type = #tpu.core_type<tc>, window_params = [{transform_indices = @transform_0, window_bounds = array<i64: 32, 32>}, {transform_indices = @transform_1, window_bounds = array<i64: 32, 128>}, {transform_indices = @transform_2, window_bounds = array<i64: 32, 128>}, {transform_indices = @transform_3, window_bounds = array<i64: 32, 5>}, {pipeline_mode = #tpu.pipeline_mode<synchronous>, transform_indices = @transform_4, window_bounds = array<i64: 32, 32>}, {pipeline_mode = #tpu.pipeline_mode<synchronous>, transform_indices = @transform_5, window_bounds = array<i64: 32, 64>}, {pipeline_mode = #tpu.pipeline_mode<synchronous>, transform_indices = @transform_6, window_bounds = array<i64: 32, 64>}, {pipeline_mode = #tpu.pipeline_mode<synchronous>, transform_indices = @transform_7, window_bounds = array<i64: 32, 32>}, {pipeline_mode = #tpu.pipeline_mode<synchronous>, transform_indices = @transform_8, window_bounds = array<i64: 32, 32>}, {pipeline_mode = #tpu.pipeline_mode<synchronous>, transform_indices = @transform_9, window_bounds = array<i64: 1, 32>}, {pipeline_mode = #tpu.pipeline_mode<synchronous>, transform_indices = @transform_10, window_bounds = array<i64: 1, 32>}, {transform_indices = @transform_11, window_bounds = array<i64: 32, 32>}]} {
    %c0 = arith.constant 0 : index
    %c0_0 = arith.constant 0 : index
    %0 = vector.load %arg1[%c0, %c0_0] : memref<32x32xf32, #tpu.memory_space<vmem>>, vector<32x32xf32>
    %c0_1 = arith.constant 0 : index
    %c0_2 = arith.constant 0 : index
    %1 = vector.load %arg2[%c0_1, %c0_2] : memref<32x128xbf16, #tpu.memory_space<vmem>>, vector<32x128xbf16>
    %c0_3 = arith.constant 0 : index
    %c0_4 = arith.constant 0 : index
    %2 = vector.load %arg3[%c0_3, %c0_4] : memref<32x128xbf16, #tpu.memory_space<vmem>>, vector<32x128xbf16>
    %c0_5 = arith.constant 0 : index
    %c0_6 = arith.constant 0 : index
    %3 = vector.load %arg4[%c0_5, %c0_6] : memref<32x5xf32, #tpu.memory_space<vmem>>, vector<32x5xf32>
    %4 = vector.extract_strided_slice %3 {offsets = [0, 0], sizes = [32, 1], strides = [1, 1]} : vector<32x5xf32> to vector<32x1xf32>
    %5 = arith.truncf %0 : vector<32x32xf32> to vector<32x32xbf16>
    %c0_7 = arith.constant 0 : index
    %c0_8 = arith.constant 0 : index
    %6 = vector.load %arg5[%c0_7, %c0_8] : memref<32x32xbf16, #tpu.memory_space<vmem>>, vector<32x32xbf16>
    %cst = arith.constant dense<0.000000e+00> : vector<32x32xf32>
    %7 = tpu.matmul %5, %6, %cst {dimension_numbers = #tpu.dot_dimension_numbers<[1], [0], [0], [1], [0, 0, 1, 1], [], []>} : vector<32x32xbf16>, vector<32x32xbf16>, vector<32x32xf32> -> vector<32x32xf32>
    %8 = vector.extract_strided_slice %1 {offsets = [0, 0], sizes = [32, 32], strides = [1, 1]} : vector<32x128xbf16> to vector<32x32xbf16>
    %c0_9 = arith.constant 0 : index
    %c0_10 = arith.constant 0 : index
    %9 = vector.load %arg6[%c0_9, %c0_10] : memref<32x64xbf16, #tpu.memory_space<vmem>>, vector<32x64xbf16>
    %cst_11 = arith.constant dense<0.000000e+00> : vector<32x64xf32>
    %10 = tpu.matmul %8, %9, %cst_11 {dimension_numbers = #tpu.dot_dimension_numbers<[1], [0], [0], [1], [0, 0, 1, 1], [], []>} : vector<32x32xbf16>, vector<32x64xbf16>, vector<32x64xf32> -> vector<32x64xf32>
    %11 = vector.extract_strided_slice %2 {offsets = [0, 0], sizes = [32, 32], strides = [1, 1]} : vector<32x128xbf16> to vector<32x32xbf16>
    %c0_12 = arith.constant 0 : index
    %c0_13 = arith.constant 0 : index
    %12 = vector.load %arg7[%c0_12, %c0_13] : memref<32x64xbf16, #tpu.memory_space<vmem>>, vector<32x64xbf16>
    %cst_14 = arith.constant dense<0.000000e+00> : vector<32x64xf32>
    %13 = tpu.matmul %11, %12, %cst_14 {dimension_numbers = #tpu.dot_dimension_numbers<[1], [0], [0], [1], [0, 0, 1, 1], [], []>} : vector<32x32xbf16>, vector<32x64xbf16>, vector<32x64xf32> -> vector<32x64xf32>
    %14 = vector.extract_strided_slice %10 {offsets = [0, 0], sizes = [32, 32], strides = [1, 1]} : vector<32x64xf32> to vector<32x32xf32>
    %15 = arith.mulf %7, %14 : vector<32x32xf32>
    %16 = vector.extract_strided_slice %13 {offsets = [0, 0], sizes = [32, 32], strides = [1, 1]} : vector<32x64xf32> to vector<32x32xf32>
    %17 = arith.mulf %15, %16 : vector<32x32xf32>
    %c0_15 = arith.constant 0 : index
    %c0_16 = arith.constant 0 : index
    %18 = vector.load %arg9[%c0_15, %c0_16] : memref<32x32xf32, #tpu.memory_space<vmem>>, vector<32x32xf32>
    %cst_17 = arith.constant dense<0.000000e+00> : vector<32x32xf32>
    %19 = tpu.matmul %17, %18, %cst_17 {dimension_numbers = #tpu.dot_dimension_numbers<[1], [0], [0], [1], [0, 0, 1, 1], [], []>} : vector<32x32xf32>, vector<32x32xf32>, vector<32x32xf32> -> vector<32x32xf32>
    %20 = vector.extract_strided_slice %3 {offsets = [0, 1], sizes = [32, 1], strides = [1, 1]} : vector<32x5xf32> to vector<32x1xf32>
    %cst_18 = arith.constant 0.000000e+00 : f32
    %21 = vector.broadcast %cst_18 : f32 to vector<32x1xf32>
    %22 = arith.cmpf ogt, %20, %21 : vector<32x1xf32>
    %cst_19 = arith.constant -3.40282347E+38 : f32
    %23 = vector.shape_cast %22 : vector<32x1xi1> to vector<32x1xi1>
    %24 = vector.broadcast %23 : vector<32x1xi1> to vector<32x32xi1>
    %25 = vector.broadcast %cst_19 : f32 to vector<32x32xf32>
    %26 = arith.select %24, %19, %25 : vector<32x32xi1>, vector<32x32xf32>
    %27 = vector.extract_strided_slice %10 {offsets = [0, 32], sizes = [32, 32], strides = [1, 1]} : vector<32x64xf32> to vector<32x32xf32>
    %28 = vector.extract_strided_slice %13 {offsets = [0, 32], sizes = [32, 32], strides = [1, 1]} : vector<32x64xf32> to vector<32x32xf32>
    %29 = arith.addf %27, %28 : vector<32x32xf32>
    %30 = vector.extract_strided_slice %1 {offsets = [0, 32], sizes = [32, 32], strides = [1, 1]} : vector<32x128xbf16> to vector<32x32xbf16>
    %c0_20 = arith.constant 0 : index
    %c0_21 = arith.constant 0 : index
    %31 = vector.load %arg6[%c0_20, %c0_21] : memref<32x64xbf16, #tpu.memory_space<vmem>>, vector<32x64xbf16>
    %cst_22 = arith.constant dense<0.000000e+00> : vector<32x64xf32>
    %32 = tpu.matmul %30, %31, %cst_22 {dimension_numbers = #tpu.dot_dimension_numbers<[1], [0], [0], [1], [0, 0, 1, 1], [], []>} : vector<32x32xbf16>, vector<32x64xbf16>, vector<32x64xf32> -> vector<32x64xf32>
    %33 = vector.extract_strided_slice %2 {offsets = [0, 32], sizes = [32, 32], strides = [1, 1]} : vector<32x128xbf16> to vector<32x32xbf16>
    %c0_23 = arith.constant 0 : index
    %c0_24 = arith.constant 0 : index
    %34 = vector.load %arg7[%c0_23, %c0_24] : memref<32x64xbf16, #tpu.memory_space<vmem>>, vector<32x64xbf16>
    %cst_25 = arith.constant dense<0.000000e+00> : vector<32x64xf32>
    %35 = tpu.matmul %33, %34, %cst_25 {dimension_numbers = #tpu.dot_dimension_numbers<[1], [0], [0], [1], [0, 0, 1, 1], [], []>} : vector<32x32xbf16>, vector<32x64xbf16>, vector<32x64xf32> -> vector<32x64xf32>
    %36 = vector.extract_strided_slice %32 {offsets = [0, 0], sizes = [32, 32], strides = [1, 1]} : vector<32x64xf32> to vector<32x32xf32>
    %37 = arith.mulf %7, %36 : vector<32x32xf32>
    %38 = vector.extract_strided_slice %35 {offsets = [0, 0], sizes = [32, 32], strides = [1, 1]} : vector<32x64xf32> to vector<32x32xf32>
    %39 = arith.mulf %37, %38 : vector<32x32xf32>
    %c0_26 = arith.constant 0 : index
    %c0_27 = arith.constant 0 : index
    %40 = vector.load %arg9[%c0_26, %c0_27] : memref<32x32xf32, #tpu.memory_space<vmem>>, vector<32x32xf32>
    %cst_28 = arith.constant dense<0.000000e+00> : vector<32x32xf32>
    %41 = tpu.matmul %39, %40, %cst_28 {dimension_numbers = #tpu.dot_dimension_numbers<[1], [0], [0], [1], [0, 0, 1, 1], [], []>} : vector<32x32xf32>, vector<32x32xf32>, vector<32x32xf32> -> vector<32x32xf32>
    %42 = vector.extract_strided_slice %3 {offsets = [0, 2], sizes = [32, 1], strides = [1, 1]} : vector<32x5xf32> to vector<32x1xf32>
    %cst_29 = arith.constant 0.000000e+00 : f32
    %43 = vector.broadcast %cst_29 : f32 to vector<32x1xf32>
    %44 = arith.cmpf ogt, %42, %43 : vector<32x1xf32>
    %cst_30 = arith.constant -3.40282347E+38 : f32
    %45 = vector.shape_cast %44 : vector<32x1xi1> to vector<32x1xi1>
    %46 = vector.broadcast %45 : vector<32x1xi1> to vector<32x32xi1>
    %47 = vector.broadcast %cst_30 : f32 to vector<32x32xf32>
    %48 = arith.select %46, %41, %47 : vector<32x32xi1>, vector<32x32xf32>
    %49 = vector.extract_strided_slice %32 {offsets = [0, 32], sizes = [32, 32], strides = [1, 1]} : vector<32x64xf32> to vector<32x32xf32>
    %50 = vector.extract_strided_slice %35 {offsets = [0, 32], sizes = [32, 32], strides = [1, 1]} : vector<32x64xf32> to vector<32x32xf32>
    %51 = arith.addf %49, %50 : vector<32x32xf32>
    %52 = vector.extract_strided_slice %1 {offsets = [0, 64], sizes = [32, 32], strides = [1, 1]} : vector<32x128xbf16> to vector<32x32xbf16>
    %c0_31 = arith.constant 0 : index
    %c0_32 = arith.constant 0 : index
    %53 = vector.load %arg6[%c0_31, %c0_32] : memref<32x64xbf16, #tpu.memory_space<vmem>>, vector<32x64xbf16>
    %cst_33 = arith.constant dense<0.000000e+00> : vector<32x64xf32>
    %54 = tpu.matmul %52, %53, %cst_33 {dimension_numbers = #tpu.dot_dimension_numbers<[1], [0], [0], [1], [0, 0, 1, 1], [], []>} : vector<32x32xbf16>, vector<32x64xbf16>, vector<32x64xf32> -> vector<32x64xf32>
    %55 = vector.extract_strided_slice %2 {offsets = [0, 64], sizes = [32, 32], strides = [1, 1]} : vector<32x128xbf16> to vector<32x32xbf16>
    %c0_34 = arith.constant 0 : index
    %c0_35 = arith.constant 0 : index
    %56 = vector.load %arg7[%c0_34, %c0_35] : memref<32x64xbf16, #tpu.memory_space<vmem>>, vector<32x64xbf16>
    %cst_36 = arith.constant dense<0.000000e+00> : vector<32x64xf32>
    %57 = tpu.matmul %55, %56, %cst_36 {dimension_numbers = #tpu.dot_dimension_numbers<[1], [0], [0], [1], [0, 0, 1, 1], [], []>} : vector<32x32xbf16>, vector<32x64xbf16>, vector<32x64xf32> -> vector<32x64xf32>
    %58 = vector.extract_strided_slice %54 {offsets = [0, 0], sizes = [32, 32], strides = [1, 1]} : vector<32x64xf32> to vector<32x32xf32>
    %59 = arith.mulf %7, %58 : vector<32x32xf32>
    %60 = vector.extract_strided_slice %57 {offsets = [0, 0], sizes = [32, 32], strides = [1, 1]} : vector<32x64xf32> to vector<32x32xf32>
    %61 = arith.mulf %59, %60 : vector<32x32xf32>
    %c0_37 = arith.constant 0 : index
    %c0_38 = arith.constant 0 : index
    %62 = vector.load %arg9[%c0_37, %c0_38] : memref<32x32xf32, #tpu.memory_space<vmem>>, vector<32x32xf32>
    %cst_39 = arith.constant dense<0.000000e+00> : vector<32x32xf32>
    %63 = tpu.matmul %61, %62, %cst_39 {dimension_numbers = #tpu.dot_dimension_numbers<[1], [0], [0], [1], [0, 0, 1, 1], [], []>} : vector<32x32xf32>, vector<32x32xf32>, vector<32x32xf32> -> vector<32x32xf32>
    %64 = vector.extract_strided_slice %3 {offsets = [0, 3], sizes = [32, 1], strides = [1, 1]} : vector<32x5xf32> to vector<32x1xf32>
    %cst_40 = arith.constant 0.000000e+00 : f32
    %65 = vector.broadcast %cst_40 : f32 to vector<32x1xf32>
    %66 = arith.cmpf ogt, %64, %65 : vector<32x1xf32>
    %cst_41 = arith.constant -3.40282347E+38 : f32
    %67 = vector.shape_cast %66 : vector<32x1xi1> to vector<32x1xi1>
    %68 = vector.broadcast %67 : vector<32x1xi1> to vector<32x32xi1>
    %69 = vector.broadcast %cst_41 : f32 to vector<32x32xf32>
    %70 = arith.select %68, %63, %69 : vector<32x32xi1>, vector<32x32xf32>
    %71 = vector.extract_strided_slice %54 {offsets = [0, 32], sizes = [32, 32], strides = [1, 1]} : vector<32x64xf32> to vector<32x32xf32>
    %72 = vector.extract_strided_slice %57 {offsets = [0, 32], sizes = [32, 32], strides = [1, 1]} : vector<32x64xf32> to vector<32x32xf32>
    %73 = arith.addf %71, %72 : vector<32x32xf32>
    %74 = vector.extract_strided_slice %1 {offsets = [0, 96], sizes = [32, 32], strides = [1, 1]} : vector<32x128xbf16> to vector<32x32xbf16>
    %c0_42 = arith.constant 0 : index
    %c0_43 = arith.constant 0 : index
    %75 = vector.load %arg6[%c0_42, %c0_43] : memref<32x64xbf16, #tpu.memory_space<vmem>>, vector<32x64xbf16>
    %cst_44 = arith.constant dense<0.000000e+00> : vector<32x64xf32>
    %76 = tpu.matmul %74, %75, %cst_44 {dimension_numbers = #tpu.dot_dimension_numbers<[1], [0], [0], [1], [0, 0, 1, 1], [], []>} : vector<32x32xbf16>, vector<32x64xbf16>, vector<32x64xf32> -> vector<32x64xf32>
    %77 = vector.extract_strided_slice %2 {offsets = [0, 96], sizes = [32, 32], strides = [1, 1]} : vector<32x128xbf16> to vector<32x32xbf16>
    %c0_45 = arith.constant 0 : index
    %c0_46 = arith.constant 0 : index
    %78 = vector.load %arg7[%c0_45, %c0_46] : memref<32x64xbf16, #tpu.memory_space<vmem>>, vector<32x64xbf16>
    %cst_47 = arith.constant dense<0.000000e+00> : vector<32x64xf32>
    %79 = tpu.matmul %77, %78, %cst_47 {dimension_numbers = #tpu.dot_dimension_numbers<[1], [0], [0], [1], [0, 0, 1, 1], [], []>} : vector<32x32xbf16>, vector<32x64xbf16>, vector<32x64xf32> -> vector<32x64xf32>
    %80 = vector.extract_strided_slice %76 {offsets = [0, 0], sizes = [32, 32], strides = [1, 1]} : vector<32x64xf32> to vector<32x32xf32>
    %81 = arith.mulf %7, %80 : vector<32x32xf32>
    %82 = vector.extract_strided_slice %79 {offsets = [0, 0], sizes = [32, 32], strides = [1, 1]} : vector<32x64xf32> to vector<32x32xf32>
    %83 = arith.mulf %81, %82 : vector<32x32xf32>
    %c0_48 = arith.constant 0 : index
    %c0_49 = arith.constant 0 : index
    %84 = vector.load %arg9[%c0_48, %c0_49] : memref<32x32xf32, #tpu.memory_space<vmem>>, vector<32x32xf32>
    %cst_50 = arith.constant dense<0.000000e+00> : vector<32x32xf32>
    %85 = tpu.matmul %83, %84, %cst_50 {dimension_numbers = #tpu.dot_dimension_numbers<[1], [0], [0], [1], [0, 0, 1, 1], [], []>} : vector<32x32xf32>, vector<32x32xf32>, vector<32x32xf32> -> vector<32x32xf32>
    %86 = vector.extract_strided_slice %3 {offsets = [0, 4], sizes = [32, 1], strides = [1, 1]} : vector<32x5xf32> to vector<32x1xf32>
    %cst_51 = arith.constant 0.000000e+00 : f32
    %87 = vector.broadcast %cst_51 : f32 to vector<32x1xf32>
    %88 = arith.cmpf ogt, %86, %87 : vector<32x1xf32>
    %cst_52 = arith.constant -3.40282347E+38 : f32
    %89 = vector.shape_cast %88 : vector<32x1xi1> to vector<32x1xi1>
    %90 = vector.broadcast %89 : vector<32x1xi1> to vector<32x32xi1>
    %91 = vector.broadcast %cst_52 : f32 to vector<32x32xf32>
    %92 = arith.select %90, %85, %91 : vector<32x32xi1>, vector<32x32xf32>
    %93 = vector.extract_strided_slice %76 {offsets = [0, 32], sizes = [32, 32], strides = [1, 1]} : vector<32x64xf32> to vector<32x32xf32>
    %94 = vector.extract_strided_slice %79 {offsets = [0, 32], sizes = [32, 32], strides = [1, 1]} : vector<32x64xf32> to vector<32x32xf32>
    %95 = arith.addf %93, %94 : vector<32x32xf32>
    %96 = arith.maximumf %26, %48 : vector<32x32xf32>
    %97 = arith.maximumf %96, %70 : vector<32x32xf32>
    %98 = arith.maximumf %97, %92 : vector<32x32xf32>
    %99 = arith.subf %26, %98 : vector<32x32xf32>
    %100 = math.exp %99 : vector<32x32xf32>
    %101 = arith.subf %48, %98 : vector<32x32xf32>
    %102 = math.exp %101 : vector<32x32xf32>
    %103 = arith.subf %70, %98 : vector<32x32xf32>
    %104 = math.exp %103 : vector<32x32xf32>
    %105 = arith.subf %92, %98 : vector<32x32xf32>
    %106 = math.exp %105 : vector<32x32xf32>
    %107 = arith.addf %100, %102 : vector<32x32xf32>
    %108 = arith.addf %107, %104 : vector<32x32xf32>
    %109 = arith.addf %108, %106 : vector<32x32xf32>
    %110 = tpu.reciprocal %109 {approx = true} : vector<32x32xf32> -> vector<32x32xf32>
    %111 = vector.broadcast %20 : vector<32x1xf32> to vector<32x32xf32>
    %112 = arith.mulf %111, %100 : vector<32x32xf32>
    %113 = arith.mulf %112, %110 : vector<32x32xf32>
    %114 = arith.mulf %113, %29 : vector<32x32xf32>
    %115 = vector.broadcast %42 : vector<32x1xf32> to vector<32x32xf32>
    %116 = arith.mulf %115, %102 : vector<32x32xf32>
    %117 = arith.mulf %116, %110 : vector<32x32xf32>
    %118 = arith.mulf %117, %51 : vector<32x32xf32>
    %119 = arith.addf %114, %118 : vector<32x32xf32>
    %120 = vector.broadcast %64 : vector<32x1xf32> to vector<32x32xf32>
    %121 = arith.mulf %120, %104 : vector<32x32xf32>
    %122 = arith.mulf %121, %110 : vector<32x32xf32>
    %123 = arith.mulf %122, %73 : vector<32x32xf32>
    %124 = arith.addf %119, %123 : vector<32x32xf32>
    %125 = vector.broadcast %86 : vector<32x1xf32> to vector<32x32xf32>
    %126 = arith.mulf %125, %106 : vector<32x32xf32>
    %127 = arith.mulf %126, %110 : vector<32x32xf32>
    %128 = arith.mulf %127, %95 : vector<32x32xf32>
    %129 = arith.addf %124, %128 : vector<32x32xf32>
    %130 = arith.truncf %129 : vector<32x32xf32> to vector<32x32xbf16>
    %c0_53 = arith.constant 0 : index
    %c0_54 = arith.constant 0 : index
    %131 = vector.load %arg8[%c0_53, %c0_54] : memref<32x32xbf16, #tpu.memory_space<vmem>>, vector<32x32xbf16>
    %cst_55 = arith.constant dense<0.000000e+00> : vector<32x32xf32>
    %132 = tpu.matmul %130, %131, %cst_55 {dimension_numbers = #tpu.dot_dimension_numbers<[1], [0], [0], [1], [0, 0, 1, 1], [], []>} : vector<32x32xbf16>, vector<32x32xbf16>, vector<32x32xf32> -> vector<32x32xf32>
    %133 = arith.addf %0, %132 : vector<32x32xf32>
    %c0_56 = arith.constant 0 : index
    %c0_57 = arith.constant 0 : index
    %134 = vector.load %arg10[%c0_56, %c0_57] : memref<1x32xf32, #tpu.memory_space<vmem>>, vector<1x32xf32>
    %c0_58 = arith.constant 0 : index
    %c0_59 = arith.constant 0 : index
    %135 = vector.load %arg11[%c0_58, %c0_59] : memref<1x32xf32, #tpu.memory_space<vmem>>, vector<1x32xf32>
    %cst_60 = arith.constant dense<0.000000e+00> : vector<32xf32>
    %136 = vector.multi_reduction <add>, %133, %cst_60 [1] : vector<32x32xf32> to vector<32xf32>
    %137 = vector.shape_cast %136 : vector<32xf32> to vector<32x1xf32>
    %cst_61 = arith.constant 3.200000e+01 : f32
    %138 = vector.broadcast %cst_61 : f32 to vector<32x1xf32>
    %139 = arith.divf %137, %138 : vector<32x1xf32>
    %140 = vector.broadcast %139 : vector<32x1xf32> to vector<32x32xf32>
    %141 = arith.subf %133, %140 : vector<32x32xf32>
    %142 = arith.mulf %141, %141 : vector<32x32xf32>
    %cst_62 = arith.constant dense<0.000000e+00> : vector<32xf32>
    %143 = vector.multi_reduction <add>, %142, %cst_62 [1] : vector<32x32xf32> to vector<32xf32>
    %144 = vector.shape_cast %143 : vector<32xf32> to vector<32x1xf32>
    %cst_63 = arith.constant 0.0322580636 : f32
    %145 = vector.broadcast %cst_63 : f32 to vector<32x1xf32>
    %146 = arith.mulf %144, %145 : vector<32x1xf32>
    %cst_64 = arith.constant 9.99999997E-7 : f32
    %147 = vector.broadcast %cst_64 : f32 to vector<32x1xf32>
    %148 = arith.addf %146, %147 : vector<32x1xf32>
    %149 = math.sqrt %148 : vector<32x1xf32>
    %cst_65 = arith.constant 9.99999997E-7 : f32
    %150 = vector.broadcast %cst_65 : f32 to vector<32x1xf32>
    %151 = arith.addf %149, %150 : vector<32x1xf32>
    %152 = tpu.reciprocal %151 {approx = true} : vector<32x1xf32> -> vector<32x1xf32>
    %153 = vector.broadcast %139 : vector<32x1xf32> to vector<32x32xf32>
    %154 = arith.subf %133, %153 : vector<32x32xf32>
    %155 = vector.broadcast %134 : vector<1x32xf32> to vector<32x32xf32>
    %156 = arith.mulf %155, %154 : vector<32x32xf32>
    %157 = vector.broadcast %152 : vector<32x1xf32> to vector<32x32xf32>
    %158 = arith.mulf %156, %157 : vector<32x32xf32>
    %159 = vector.broadcast %135 : vector<1x32xf32> to vector<32x32xf32>
    %160 = arith.addf %158, %159 : vector<32x32xf32>
    %161 = vector.broadcast %4 : vector<32x1xf32> to vector<32x32xf32>
    %162 = arith.mulf %161, %160 : vector<32x32xf32>
    %c0_66 = arith.constant 0 : index
    %c0_67 = arith.constant 0 : index
    %163 = vector.load %arg12[%c0_66, %c0_67] : memref<32x32xf32, #tpu.memory_space<vmem>>, vector<32x32xf32>
    tpu.vector_store %arg12[%c0_66, %c0_67], %162 {strides = array<i32>} : memref<32x32xf32, #tpu.memory_space<vmem>>, vector<32x32xf32>,
    return
  }
  func.func @transform_0(%arg0: i32) -> (i32, i32) {
    %c0_i32 = arith.constant 0 : i32
    %c0_i32_0 = arith.constant 0 : i32
    return %arg0, %c0_i32 : i32, i32
  }
  func.func @transform_1(%arg0: i32) -> (i32, i32) {
    %c0_i32 = arith.constant 0 : i32
    %c0_i32_0 = arith.constant 0 : i32
    return %arg0, %c0_i32 : i32, i32
  }
  func.func @transform_2(%arg0: i32) -> (i32, i32) {
    %c0_i32 = arith.constant 0 : i32
    %c0_i32_0 = arith.constant 0 : i32
    return %arg0, %c0_i32 : i32, i32
  }
  func.func @transform_3(%arg0: i32) -> (i32, i32) {
    %c0_i32 = arith.constant 0 : i32
    %c0_i32_0 = arith.constant 0 : i32
    return %arg0, %c0_i32 : i32, i32
  }
  func.func @transform_4(%arg0: i32) -> (i32, i32) {
    %c0_i32 = arith.constant 0 : i32
    %c0_i32_0 = arith.constant 0 : i32
    %c0_i32_1 = arith.constant 0 : i32
    return %c0_i32, %c0_i32_0 : i32, i32
  }
  func.func @transform_5(%arg0: i32) -> (i32, i32) {
    %c0_i32 = arith.constant 0 : i32
    %c0_i32_0 = arith.constant 0 : i32
    %c0_i32_1 = arith.constant 0 : i32
    return %c0_i32, %c0_i32_0 : i32, i32
  }
  func.func @transform_6(%arg0: i32) -> (i32, i32) {
    %c0_i32 = arith.constant 0 : i32
    %c0_i32_0 = arith.constant 0 : i32
    %c0_i32_1 = arith.constant 0 : i32
    return %c0_i32, %c0_i32_0 : i32, i32
  }
  func.func @transform_7(%arg0: i32) -> (i32, i32) {
    %c0_i32 = arith.constant 0 : i32
    %c0_i32_0 = arith.constant 0 : i32
    %c0_i32_1 = arith.constant 0 : i32
    return %c0_i32, %c0_i32_0 : i32, i32
  }
  func.func @transform_8(%arg0: i32) -> (i32, i32) {
    %c0_i32 = arith.constant 0 : i32
    %c0_i32_0 = arith.constant 0 : i32
    %c0_i32_1 = arith.constant 0 : i32
    return %c0_i32, %c0_i32_0 : i32, i32
  }
  func.func @transform_9(%arg0: i32) -> (i32, i32) {
    %c0_i32 = arith.constant 0 : i32
    %c0_i32_0 = arith.constant 0 : i32
    %c0_i32_1 = arith.constant 0 : i32
    return %c0_i32, %c0_i32_0 : i32, i32
  }
  func.func @transform_10(%arg0: i32) -> (i32, i32) {
    %c0_i32 = arith.constant 0 : i32
    %c0_i32_0 = arith.constant 0 : i32
    %c0_i32_1 = arith.constant 0 : i32
    return %c0_i32, %c0_i32_0 : i32, i32
  }
  func.func @transform_11(%arg0: i32) -> (i32, i32) {
    %c0_i32 = arith.constant 0 : i32
    %c0_i32_0 = arith.constant 0 : i32
    return %arg0, %c0_i32 : i32, i32
  }
}

module attributes {stable_mosaic.version = 11 : i64} {
  func.func @_edge_kernel(%arg0: i32, %arg1: memref<32x128xbf16, #tpu.memory_space<vmem>>, %arg2: memref<32x128xbf16, #tpu.memory_space<vmem>>, %arg3: memref<32x32xf32, #tpu.memory_space<vmem>>, %arg4: memref<32x32xbf16, #tpu.memory_space<vmem>>, %arg5: memref<32x32xbf16, #tpu.memory_space<vmem>>, %arg6: memref<32x32xbf16, #tpu.memory_space<vmem>>, %arg7: memref<1x32xf32, #tpu.memory_space<vmem>>, %arg8: memref<1x32xf32, #tpu.memory_space<vmem>>, %arg9: memref<1x32xf32, #tpu.memory_space<vmem>>, %arg10: memref<32x128xbf16, #tpu.memory_space<vmem>>) attributes {dimension_semantics = [#tpu.dimension_semantics<parallel>], iteration_bounds = array<i64: 1>, scalar_prefetch = 0 : i64, scratch_operands = 0 : i64, tpu.core_type = #tpu.core_type<tc>, window_params = [{transform_indices = @transform_0, window_bounds = array<i64: 32, 128>}, {transform_indices = @transform_1, window_bounds = array<i64: 32, 128>}, {transform_indices = @transform_2, window_bounds = array<i64: 32, 32>}, {pipeline_mode = #tpu.pipeline_mode<synchronous>, transform_indices = @transform_3, window_bounds = array<i64: 32, 32>}, {pipeline_mode = #tpu.pipeline_mode<synchronous>, transform_indices = @transform_4, window_bounds = array<i64: 32, 32>}, {pipeline_mode = #tpu.pipeline_mode<synchronous>, transform_indices = @transform_5, window_bounds = array<i64: 32, 32>}, {pipeline_mode = #tpu.pipeline_mode<synchronous>, transform_indices = @transform_6, window_bounds = array<i64: 1, 32>}, {pipeline_mode = #tpu.pipeline_mode<synchronous>, transform_indices = @transform_7, window_bounds = array<i64: 1, 32>}, {pipeline_mode = #tpu.pipeline_mode<synchronous>, transform_indices = @transform_8, window_bounds = array<i64: 1, 32>}, {transform_indices = @transform_9, window_bounds = array<i64: 32, 128>}]} {
    %c0 = arith.constant 0 : index
    %c0_0 = arith.constant 0 : index
    %0 = vector.load %arg1[%c0, %c0_0] : memref<32x128xbf16, #tpu.memory_space<vmem>>, vector<32x128xbf16>
    %c0_1 = arith.constant 0 : index
    %c0_2 = arith.constant 0 : index
    %1 = vector.load %arg2[%c0_1, %c0_2] : memref<32x128xbf16, #tpu.memory_space<vmem>>, vector<32x128xbf16>
    %c0_3 = arith.constant 0 : index
    %c0_4 = arith.constant 0 : index
    %2 = vector.load %arg3[%c0_3, %c0_4] : memref<32x32xf32, #tpu.memory_space<vmem>>, vector<32x32xf32>
    %3 = arith.truncf %2 : vector<32x32xf32> to vector<32x32xbf16>
    %c0_5 = arith.constant 0 : index
    %c0_6 = arith.constant 0 : index
    %4 = vector.load %arg6[%c0_5, %c0_6] : memref<32x32xbf16, #tpu.memory_space<vmem>>, vector<32x32xbf16>
    %cst = arith.constant dense<0.000000e+00> : vector<32x32xf32>
    %5 = tpu.matmul %3, %4, %cst {dimension_numbers = #tpu.dot_dimension_numbers<[1], [0], [0], [1], [0, 0, 1, 1], [], []>} : vector<32x32xbf16>, vector<32x32xbf16>, vector<32x32xf32> -> vector<32x32xf32>
    %c0_7 = arith.constant 0 : index
    %c0_8 = arith.constant 0 : index
    %6 = vector.load %arg7[%c0_7, %c0_8] : memref<1x32xf32, #tpu.memory_space<vmem>>, vector<1x32xf32>
    %7 = vector.broadcast %6 : vector<1x32xf32> to vector<32x32xf32>
    %8 = arith.addf %5, %7 : vector<32x32xf32>
    %9 = vector.extract_strided_slice %0 {offsets = [0, 0], sizes = [32, 32], strides = [1, 1]} : vector<32x128xbf16> to vector<32x32xbf16>
    %c0_9 = arith.constant 0 : index
    %c0_10 = arith.constant 0 : index
    %10 = vector.load %arg4[%c0_9, %c0_10] : memref<32x32xbf16, #tpu.memory_space<vmem>>, vector<32x32xbf16>
    %cst_11 = arith.constant dense<0.000000e+00> : vector<32x32xf32>
    %11 = tpu.matmul %9, %10, %cst_11 {dimension_numbers = #tpu.dot_dimension_numbers<[1], [0], [0], [1], [0, 0, 1, 1], [], []>} : vector<32x32xbf16>, vector<32x32xbf16>, vector<32x32xf32> -> vector<32x32xf32>
    %12 = vector.extract_strided_slice %1 {offsets = [0, 0], sizes = [32, 32], strides = [1, 1]} : vector<32x128xbf16> to vector<32x32xbf16>
    %c0_12 = arith.constant 0 : index
    %c0_13 = arith.constant 0 : index
    %13 = vector.load %arg5[%c0_12, %c0_13] : memref<32x32xbf16, #tpu.memory_space<vmem>>, vector<32x32xbf16>
    %cst_14 = arith.constant dense<0.000000e+00> : vector<32x32xf32>
    %14 = tpu.matmul %12, %13, %cst_14 {dimension_numbers = #tpu.dot_dimension_numbers<[1], [0], [0], [1], [0, 0, 1, 1], [], []>} : vector<32x32xbf16>, vector<32x32xbf16>, vector<32x32xf32> -> vector<32x32xf32>
    %15 = arith.addf %11, %14 : vector<32x32xf32>
    %16 = arith.addf %15, %8 : vector<32x32xf32>
    %cst_15 = arith.constant 0.000000e+00 : f32
    %17 = vector.broadcast %cst_15 : f32 to vector<32x32xf32>
    %18 = arith.maximumf %16, %17 : vector<32x32xf32>
    %c0_16 = arith.constant 0 : index
    %c0_17 = arith.constant 0 : index
    %19 = vector.load %arg8[%c0_16, %c0_17] : memref<1x32xf32, #tpu.memory_space<vmem>>, vector<1x32xf32>
    %c0_18 = arith.constant 0 : index
    %c0_19 = arith.constant 0 : index
    %20 = vector.load %arg9[%c0_18, %c0_19] : memref<1x32xf32, #tpu.memory_space<vmem>>, vector<1x32xf32>
    %cst_20 = arith.constant dense<0.000000e+00> : vector<32xf32>
    %21 = vector.multi_reduction <add>, %18, %cst_20 [1] : vector<32x32xf32> to vector<32xf32>
    %22 = vector.shape_cast %21 : vector<32xf32> to vector<32x1xf32>
    %cst_21 = arith.constant 3.200000e+01 : f32
    %23 = vector.broadcast %cst_21 : f32 to vector<32x1xf32>
    %24 = arith.divf %22, %23 : vector<32x1xf32>
    %25 = vector.broadcast %24 : vector<32x1xf32> to vector<32x32xf32>
    %26 = arith.subf %18, %25 : vector<32x32xf32>
    %27 = arith.mulf %26, %26 : vector<32x32xf32>
    %cst_22 = arith.constant dense<0.000000e+00> : vector<32xf32>
    %28 = vector.multi_reduction <add>, %27, %cst_22 [1] : vector<32x32xf32> to vector<32xf32>
    %29 = vector.shape_cast %28 : vector<32xf32> to vector<32x1xf32>
    %cst_23 = arith.constant 0.0322580636 : f32
    %30 = vector.broadcast %cst_23 : f32 to vector<32x1xf32>
    %31 = arith.mulf %29, %30 : vector<32x1xf32>
    %cst_24 = arith.constant 9.99999997E-7 : f32
    %32 = vector.broadcast %cst_24 : f32 to vector<32x1xf32>
    %33 = arith.addf %31, %32 : vector<32x1xf32>
    %34 = math.sqrt %33 : vector<32x1xf32>
    %cst_25 = arith.constant 9.99999997E-7 : f32
    %35 = vector.broadcast %cst_25 : f32 to vector<32x1xf32>
    %36 = arith.addf %34, %35 : vector<32x1xf32>
    %37 = tpu.reciprocal %36 {approx = true} : vector<32x1xf32> -> vector<32x1xf32>
    %38 = vector.broadcast %24 : vector<32x1xf32> to vector<32x32xf32>
    %39 = arith.subf %18, %38 : vector<32x32xf32>
    %40 = vector.broadcast %19 : vector<1x32xf32> to vector<32x32xf32>
    %41 = arith.mulf %40, %39 : vector<32x32xf32>
    %42 = vector.broadcast %37 : vector<32x1xf32> to vector<32x32xf32>
    %43 = arith.mulf %41, %42 : vector<32x32xf32>
    %44 = vector.broadcast %20 : vector<1x32xf32> to vector<32x32xf32>
    %45 = arith.addf %43, %44 : vector<32x32xf32>
    %46 = vector.extract_strided_slice %0 {offsets = [0, 32], sizes = [32, 32], strides = [1, 1]} : vector<32x128xbf16> to vector<32x32xbf16>
    %c0_26 = arith.constant 0 : index
    %c0_27 = arith.constant 0 : index
    %47 = vector.load %arg4[%c0_26, %c0_27] : memref<32x32xbf16, #tpu.memory_space<vmem>>, vector<32x32xbf16>
    %cst_28 = arith.constant dense<0.000000e+00> : vector<32x32xf32>
    %48 = tpu.matmul %46, %47, %cst_28 {dimension_numbers = #tpu.dot_dimension_numbers<[1], [0], [0], [1], [0, 0, 1, 1], [], []>} : vector<32x32xbf16>, vector<32x32xbf16>, vector<32x32xf32> -> vector<32x32xf32>
    %49 = vector.extract_strided_slice %1 {offsets = [0, 32], sizes = [32, 32], strides = [1, 1]} : vector<32x128xbf16> to vector<32x32xbf16>
    %c0_29 = arith.constant 0 : index
    %c0_30 = arith.constant 0 : index
    %50 = vector.load %arg5[%c0_29, %c0_30] : memref<32x32xbf16, #tpu.memory_space<vmem>>, vector<32x32xbf16>
    %cst_31 = arith.constant dense<0.000000e+00> : vector<32x32xf32>
    %51 = tpu.matmul %49, %50, %cst_31 {dimension_numbers = #tpu.dot_dimension_numbers<[1], [0], [0], [1], [0, 0, 1, 1], [], []>} : vector<32x32xbf16>, vector<32x32xbf16>, vector<32x32xf32> -> vector<32x32xf32>
    %52 = arith.addf %48, %51 : vector<32x32xf32>
    %53 = arith.addf %52, %8 : vector<32x32xf32>
    %cst_32 = arith.constant 0.000000e+00 : f32
    %54 = vector.broadcast %cst_32 : f32 to vector<32x32xf32>
    %55 = arith.maximumf %53, %54 : vector<32x32xf32>
    %c0_33 = arith.constant 0 : index
    %c0_34 = arith.constant 0 : index
    %56 = vector.load %arg8[%c0_33, %c0_34] : memref<1x32xf32, #tpu.memory_space<vmem>>, vector<1x32xf32>
    %c0_35 = arith.constant 0 : index
    %c0_36 = arith.constant 0 : index
    %57 = vector.load %arg9[%c0_35, %c0_36] : memref<1x32xf32, #tpu.memory_space<vmem>>, vector<1x32xf32>
    %cst_37 = arith.constant dense<0.000000e+00> : vector<32xf32>
    %58 = vector.multi_reduction <add>, %55, %cst_37 [1] : vector<32x32xf32> to vector<32xf32>
    %59 = vector.shape_cast %58 : vector<32xf32> to vector<32x1xf32>
    %cst_38 = arith.constant 3.200000e+01 : f32
    %60 = vector.broadcast %cst_38 : f32 to vector<32x1xf32>
    %61 = arith.divf %59, %60 : vector<32x1xf32>
    %62 = vector.broadcast %61 : vector<32x1xf32> to vector<32x32xf32>
    %63 = arith.subf %55, %62 : vector<32x32xf32>
    %64 = arith.mulf %63, %63 : vector<32x32xf32>
    %cst_39 = arith.constant dense<0.000000e+00> : vector<32xf32>
    %65 = vector.multi_reduction <add>, %64, %cst_39 [1] : vector<32x32xf32> to vector<32xf32>
    %66 = vector.shape_cast %65 : vector<32xf32> to vector<32x1xf32>
    %cst_40 = arith.constant 0.0322580636 : f32
    %67 = vector.broadcast %cst_40 : f32 to vector<32x1xf32>
    %68 = arith.mulf %66, %67 : vector<32x1xf32>
    %cst_41 = arith.constant 9.99999997E-7 : f32
    %69 = vector.broadcast %cst_41 : f32 to vector<32x1xf32>
    %70 = arith.addf %68, %69 : vector<32x1xf32>
    %71 = math.sqrt %70 : vector<32x1xf32>
    %cst_42 = arith.constant 9.99999997E-7 : f32
    %72 = vector.broadcast %cst_42 : f32 to vector<32x1xf32>
    %73 = arith.addf %71, %72 : vector<32x1xf32>
    %74 = tpu.reciprocal %73 {approx = true} : vector<32x1xf32> -> vector<32x1xf32>
    %75 = vector.broadcast %61 : vector<32x1xf32> to vector<32x32xf32>
    %76 = arith.subf %55, %75 : vector<32x32xf32>
    %77 = vector.broadcast %56 : vector<1x32xf32> to vector<32x32xf32>
    %78 = arith.mulf %77, %76 : vector<32x32xf32>
    %79 = vector.broadcast %74 : vector<32x1xf32> to vector<32x32xf32>
    %80 = arith.mulf %78, %79 : vector<32x32xf32>
    %81 = vector.broadcast %57 : vector<1x32xf32> to vector<32x32xf32>
    %82 = arith.addf %80, %81 : vector<32x32xf32>
    %83 = vector.extract_strided_slice %0 {offsets = [0, 64], sizes = [32, 32], strides = [1, 1]} : vector<32x128xbf16> to vector<32x32xbf16>
    %c0_43 = arith.constant 0 : index
    %c0_44 = arith.constant 0 : index
    %84 = vector.load %arg4[%c0_43, %c0_44] : memref<32x32xbf16, #tpu.memory_space<vmem>>, vector<32x32xbf16>
    %cst_45 = arith.constant dense<0.000000e+00> : vector<32x32xf32>
    %85 = tpu.matmul %83, %84, %cst_45 {dimension_numbers = #tpu.dot_dimension_numbers<[1], [0], [0], [1], [0, 0, 1, 1], [], []>} : vector<32x32xbf16>, vector<32x32xbf16>, vector<32x32xf32> -> vector<32x32xf32>
    %86 = vector.extract_strided_slice %1 {offsets = [0, 64], sizes = [32, 32], strides = [1, 1]} : vector<32x128xbf16> to vector<32x32xbf16>
    %c0_46 = arith.constant 0 : index
    %c0_47 = arith.constant 0 : index
    %87 = vector.load %arg5[%c0_46, %c0_47] : memref<32x32xbf16, #tpu.memory_space<vmem>>, vector<32x32xbf16>
    %cst_48 = arith.constant dense<0.000000e+00> : vector<32x32xf32>
    %88 = tpu.matmul %86, %87, %cst_48 {dimension_numbers = #tpu.dot_dimension_numbers<[1], [0], [0], [1], [0, 0, 1, 1], [], []>} : vector<32x32xbf16>, vector<32x32xbf16>, vector<32x32xf32> -> vector<32x32xf32>
    %89 = arith.addf %85, %88 : vector<32x32xf32>
    %90 = arith.addf %89, %8 : vector<32x32xf32>
    %cst_49 = arith.constant 0.000000e+00 : f32
    %91 = vector.broadcast %cst_49 : f32 to vector<32x32xf32>
    %92 = arith.maximumf %90, %91 : vector<32x32xf32>
    %c0_50 = arith.constant 0 : index
    %c0_51 = arith.constant 0 : index
    %93 = vector.load %arg8[%c0_50, %c0_51] : memref<1x32xf32, #tpu.memory_space<vmem>>, vector<1x32xf32>
    %c0_52 = arith.constant 0 : index
    %c0_53 = arith.constant 0 : index
    %94 = vector.load %arg9[%c0_52, %c0_53] : memref<1x32xf32, #tpu.memory_space<vmem>>, vector<1x32xf32>
    %cst_54 = arith.constant dense<0.000000e+00> : vector<32xf32>
    %95 = vector.multi_reduction <add>, %92, %cst_54 [1] : vector<32x32xf32> to vector<32xf32>
    %96 = vector.shape_cast %95 : vector<32xf32> to vector<32x1xf32>
    %cst_55 = arith.constant 3.200000e+01 : f32
    %97 = vector.broadcast %cst_55 : f32 to vector<32x1xf32>
    %98 = arith.divf %96, %97 : vector<32x1xf32>
    %99 = vector.broadcast %98 : vector<32x1xf32> to vector<32x32xf32>
    %100 = arith.subf %92, %99 : vector<32x32xf32>
    %101 = arith.mulf %100, %100 : vector<32x32xf32>
    %cst_56 = arith.constant dense<0.000000e+00> : vector<32xf32>
    %102 = vector.multi_reduction <add>, %101, %cst_56 [1] : vector<32x32xf32> to vector<32xf32>
    %103 = vector.shape_cast %102 : vector<32xf32> to vector<32x1xf32>
    %cst_57 = arith.constant 0.0322580636 : f32
    %104 = vector.broadcast %cst_57 : f32 to vector<32x1xf32>
    %105 = arith.mulf %103, %104 : vector<32x1xf32>
    %cst_58 = arith.constant 9.99999997E-7 : f32
    %106 = vector.broadcast %cst_58 : f32 to vector<32x1xf32>
    %107 = arith.addf %105, %106 : vector<32x1xf32>
    %108 = math.sqrt %107 : vector<32x1xf32>
    %cst_59 = arith.constant 9.99999997E-7 : f32
    %109 = vector.broadcast %cst_59 : f32 to vector<32x1xf32>
    %110 = arith.addf %108, %109 : vector<32x1xf32>
    %111 = tpu.reciprocal %110 {approx = true} : vector<32x1xf32> -> vector<32x1xf32>
    %112 = vector.broadcast %98 : vector<32x1xf32> to vector<32x32xf32>
    %113 = arith.subf %92, %112 : vector<32x32xf32>
    %114 = vector.broadcast %93 : vector<1x32xf32> to vector<32x32xf32>
    %115 = arith.mulf %114, %113 : vector<32x32xf32>
    %116 = vector.broadcast %111 : vector<32x1xf32> to vector<32x32xf32>
    %117 = arith.mulf %115, %116 : vector<32x32xf32>
    %118 = vector.broadcast %94 : vector<1x32xf32> to vector<32x32xf32>
    %119 = arith.addf %117, %118 : vector<32x32xf32>
    %120 = vector.extract_strided_slice %0 {offsets = [0, 96], sizes = [32, 32], strides = [1, 1]} : vector<32x128xbf16> to vector<32x32xbf16>
    %c0_60 = arith.constant 0 : index
    %c0_61 = arith.constant 0 : index
    %121 = vector.load %arg4[%c0_60, %c0_61] : memref<32x32xbf16, #tpu.memory_space<vmem>>, vector<32x32xbf16>
    %cst_62 = arith.constant dense<0.000000e+00> : vector<32x32xf32>
    %122 = tpu.matmul %120, %121, %cst_62 {dimension_numbers = #tpu.dot_dimension_numbers<[1], [0], [0], [1], [0, 0, 1, 1], [], []>} : vector<32x32xbf16>, vector<32x32xbf16>, vector<32x32xf32> -> vector<32x32xf32>
    %123 = vector.extract_strided_slice %1 {offsets = [0, 96], sizes = [32, 32], strides = [1, 1]} : vector<32x128xbf16> to vector<32x32xbf16>
    %c0_63 = arith.constant 0 : index
    %c0_64 = arith.constant 0 : index
    %124 = vector.load %arg5[%c0_63, %c0_64] : memref<32x32xbf16, #tpu.memory_space<vmem>>, vector<32x32xbf16>
    %cst_65 = arith.constant dense<0.000000e+00> : vector<32x32xf32>
    %125 = tpu.matmul %123, %124, %cst_65 {dimension_numbers = #tpu.dot_dimension_numbers<[1], [0], [0], [1], [0, 0, 1, 1], [], []>} : vector<32x32xbf16>, vector<32x32xbf16>, vector<32x32xf32> -> vector<32x32xf32>
    %126 = arith.addf %122, %125 : vector<32x32xf32>
    %127 = arith.addf %126, %8 : vector<32x32xf32>
    %cst_66 = arith.constant 0.000000e+00 : f32
    %128 = vector.broadcast %cst_66 : f32 to vector<32x32xf32>
    %129 = arith.maximumf %127, %128 : vector<32x32xf32>
    %c0_67 = arith.constant 0 : index
    %c0_68 = arith.constant 0 : index
    %130 = vector.load %arg8[%c0_67, %c0_68] : memref<1x32xf32, #tpu.memory_space<vmem>>, vector<1x32xf32>
    %c0_69 = arith.constant 0 : index
    %c0_70 = arith.constant 0 : index
    %131 = vector.load %arg9[%c0_69, %c0_70] : memref<1x32xf32, #tpu.memory_space<vmem>>, vector<1x32xf32>
    %cst_71 = arith.constant dense<0.000000e+00> : vector<32xf32>
    %132 = vector.multi_reduction <add>, %129, %cst_71 [1] : vector<32x32xf32> to vector<32xf32>
    %133 = vector.shape_cast %132 : vector<32xf32> to vector<32x1xf32>
    %cst_72 = arith.constant 3.200000e+01 : f32
    %134 = vector.broadcast %cst_72 : f32 to vector<32x1xf32>
    %135 = arith.divf %133, %134 : vector<32x1xf32>
    %136 = vector.broadcast %135 : vector<32x1xf32> to vector<32x32xf32>
    %137 = arith.subf %129, %136 : vector<32x32xf32>
    %138 = arith.mulf %137, %137 : vector<32x32xf32>
    %cst_73 = arith.constant dense<0.000000e+00> : vector<32xf32>
    %139 = vector.multi_reduction <add>, %138, %cst_73 [1] : vector<32x32xf32> to vector<32xf32>
    %140 = vector.shape_cast %139 : vector<32xf32> to vector<32x1xf32>
    %cst_74 = arith.constant 0.0322580636 : f32
    %141 = vector.broadcast %cst_74 : f32 to vector<32x1xf32>
    %142 = arith.mulf %140, %141 : vector<32x1xf32>
    %cst_75 = arith.constant 9.99999997E-7 : f32
    %143 = vector.broadcast %cst_75 : f32 to vector<32x1xf32>
    %144 = arith.addf %142, %143 : vector<32x1xf32>
    %145 = math.sqrt %144 : vector<32x1xf32>
    %cst_76 = arith.constant 9.99999997E-7 : f32
    %146 = vector.broadcast %cst_76 : f32 to vector<32x1xf32>
    %147 = arith.addf %145, %146 : vector<32x1xf32>
    %148 = tpu.reciprocal %147 {approx = true} : vector<32x1xf32> -> vector<32x1xf32>
    %149 = vector.broadcast %135 : vector<32x1xf32> to vector<32x32xf32>
    %150 = arith.subf %129, %149 : vector<32x32xf32>
    %151 = vector.broadcast %130 : vector<1x32xf32> to vector<32x32xf32>
    %152 = arith.mulf %151, %150 : vector<32x32xf32>
    %153 = vector.broadcast %148 : vector<32x1xf32> to vector<32x32xf32>
    %154 = arith.mulf %152, %153 : vector<32x32xf32>
    %155 = vector.broadcast %131 : vector<1x32xf32> to vector<32x32xf32>
    %156 = arith.addf %154, %155 : vector<32x32xf32>
    %157 = tpu.concatenate %45, %82, %119, %156 in 1 : vector<32x32xf32>, vector<32x32xf32>, vector<32x32xf32>, vector<32x32xf32> -> vector<32x128xf32>
    %158 = arith.truncf %157 : vector<32x128xf32> to vector<32x128xbf16>
    %c0_77 = arith.constant 0 : index
    %c0_78 = arith.constant 0 : index
    %159 = vector.load %arg10[%c0_77, %c0_78] : memref<32x128xbf16, #tpu.memory_space<vmem>>, vector<32x128xbf16>
    tpu.vector_store %arg10[%c0_77, %c0_78], %158 {strides = array<i32>} : memref<32x128xbf16, #tpu.memory_space<vmem>>, vector<32x128xbf16>,
    return
  }
  func.func @transform_0(%arg0: i32) -> (i32, i32) {
    %c0_i32 = arith.constant 0 : i32
    %c0_i32_0 = arith.constant 0 : i32
    return %arg0, %c0_i32 : i32, i32
  }
  func.func @transform_1(%arg0: i32) -> (i32, i32) {
    %c0_i32 = arith.constant 0 : i32
    %c0_i32_0 = arith.constant 0 : i32
    return %arg0, %c0_i32 : i32, i32
  }
  func.func @transform_2(%arg0: i32) -> (i32, i32) {
    %c0_i32 = arith.constant 0 : i32
    %c0_i32_0 = arith.constant 0 : i32
    return %arg0, %c0_i32 : i32, i32
  }
  func.func @transform_3(%arg0: i32) -> (i32, i32) {
    %c0_i32 = arith.constant 0 : i32
    %c0_i32_0 = arith.constant 0 : i32
    %c0_i32_1 = arith.constant 0 : i32
    return %c0_i32, %c0_i32_0 : i32, i32
  }
  func.func @transform_4(%arg0: i32) -> (i32, i32) {
    %c0_i32 = arith.constant 0 : i32
    %c0_i32_0 = arith.constant 0 : i32
    %c0_i32_1 = arith.constant 0 : i32
    return %c0_i32, %c0_i32_0 : i32, i32
  }
  func.func @transform_5(%arg0: i32) -> (i32, i32) {
    %c0_i32 = arith.constant 0 : i32
    %c0_i32_0 = arith.constant 0 : i32
    %c0_i32_1 = arith.constant 0 : i32
    return %c0_i32, %c0_i32_0 : i32, i32
  }
  func.func @transform_6(%arg0: i32) -> (i32, i32) {
    %c0_i32 = arith.constant 0 : i32
    %c0_i32_0 = arith.constant 0 : i32
    %c0_i32_1 = arith.constant 0 : i32
    return %c0_i32, %c0_i32_0 : i32, i32
  }
  func.func @transform_7(%arg0: i32) -> (i32, i32) {
    %c0_i32 = arith.constant 0 : i32
    %c0_i32_0 = arith.constant 0 : i32
    %c0_i32_1 = arith.constant 0 : i32
    return %c0_i32, %c0_i32_0 : i32, i32
  }
  func.func @transform_8(%arg0: i32) -> (i32, i32) {
    %c0_i32 = arith.constant 0 : i32
    %c0_i32_0 = arith.constant 0 : i32
    %c0_i32_1 = arith.constant 0 : i32
    return %c0_i32, %c0_i32_0 : i32, i32
  }
  func.func @transform_9(%arg0: i32) -> (i32, i32) {
    %c0_i32 = arith.constant 0 : i32
    %c0_i32_0 = arith.constant 0 : i32
    return %arg0, %c0_i32 : i32, i32
  }
}

</mosaic_0001>

<bundles_post_ra>
// kernel: pema_forward.5
= control target key start
LH: loop header
LB: loop body
LE: loop exit
PB: predicated region body
PF: predicated region fallthrough
CT: control target
= control target key end

     0   :  { %vm44_vm0 = vcmask 1042432   ;;  %vm37_vm1 = vcmask 48128   ;;  %vm97_vm2 = vcmask 261120   ;;  %s167_s1 = inlined_call_operand.vmem [shape: bf16[6,32], index: 1, kind: input, shape index: {}]   ;;  %s168_s0 = inlined_call_operand.vmem [shape: bf16[32,6], index: 0, kind: input, shape index: {}]   ;;  %s169_s2 = inlined_call_operand.vmem [shape: f32[1,32], index: 2, kind: input, shape index: {}]   ;;  %s170_s3 = inlined_call_operand.vmem [shape: f32[32,32], index: 3, kind: output, shape index: {}]  }
   0x1   :  { %v19_v0 = vld [vmem:[%s167_s1] sm:$0x7]  ;;  %v122_v3 = vld [vmem:[%s168_s0 + $0x8] sm:$0xff]  }
   0x2   :  { %120 = vmatprep.subr.msk.bf16.mxu0 %vm44_vm0, %v19_v0  ;;  %v46_v1 = vsel %vm44_vm0, %v19_v0, 0  ;;  %v121_v2 = vld [vmem:[%s168_s0] sm:$0xff]  }
   0x3   :  { %115 = vmatpush3.bf16.msra.mxu0 %v46_v1  ;;  %116 = vmatprep.mubr.msk.bf16.mxu0 %vm37_vm1, %v121_v2  ;;  %v106_v4 = vld [vmem:[%s169_s2] ss:$0 sm:$0xff] }
   0x6   :  { %117 = vmatmul.mubr.msk.bf16.vlgmr.msra.gmra.mrb[0].mxu0 %vm37_vm1, %v122_v3 }
  0xd9   :  { %v118_v5 = vpop.f32.mrb[0].mxu0 }
  0xda   :  { %v91_v6 = vadd.f32 %v118_v5, %v106_v4  ;;  %v82_v7 = vpop.f32.mrb[1].mxu0 }
  0xdb   :  { %v83_v8 = vadd.f32 %v106_v4, %v82_v7  ;;  %v119_v9 = vpop.f32.mrb[2].mxu0 }
  0xdc   :  { %100 = vst.msk [vmem:[%s170_s3 + $0x10] sm:$0xff] %vm97_vm2, %v91_v6  ;;  %v94_v10 = vadd.f32 %v119_v9, %v106_v4  ;;  %v85_v11 = vpop.f32.mrb[3].mxu0 }
  0xdd   :  { %98 = vst.msk [vmem:[%s170_s3] sm:$0xff] %vm97_vm2, %v83_v8  ;;  %v86_v12 = vadd.f32 %v106_v4, %v85_v11 }
  0xde   :  { %101 = vst.msk [vmem:[%s170_s3 + $0x18] sm:$0xff] %vm97_vm2, %v94_v10 }
  0xdf   :  { %99 = vst.msk [vmem:[%s170_s3 + $0x8] sm:$0xff] %vm97_vm2, %v86_v12 }

// kernel: pema_forward.6
= control target key start
LH: loop header
LB: loop body
LE: loop exit
PB: predicated region body
PF: predicated region fallthrough
CT: control target
= control target key end

     0   :  { %vm104_vm0 = vcmask 1042432   ;;  %vm105_vm1 = vcmask 1043456   ;;  %vm79_vm2 = vcmask 56320   ;;  %v380_v1 = vmov 65535   ;;  %s503_s1 = inlined_call_operand.vmem [shape: bf16[7,32], index: 1, kind: input, shape index: {}]   ;;  %s504_s0 = inlined_call_operand.vmem [shape: bf16[128,7], index: 0, kind: input, shape index: {}]   ;;  %s505_s2 = inlined_call_operand.vmem [shape: f32[1,32], index: 2, kind: input, shape index: {}]   ;;  %s506_s3 = inlined_call_operand.vmem [shape: bf16[128,32], index: 3, kind: output, shape index: {}]  }
   0x1   :  { %v31_v0 = vld [vmem:[%s503_s1] sm:$0xf]  ;;  %v106_v2 = vsel %vm104_vm0, 4294967295, %v380_v1  ;;  %v374_v7 = vld [vmem:[%s504_s0 + $0x8] sm:$0xff]   ;;  %v376_v9 = vld [vmem:[%s504_s0 + $0x10] sm:$0xff]   ;;  %vm272_vm3 = vcmask 257024  }
   0x2   :  { %v372_v3 = vld [vmem:[%s504_s0] sm:$0xff]   ;;  %v107_v4 = vsel %vm105_vm1, %v106_v2, 0  ;;  %v375_v8 = vld [vmem:[%s504_s0 + $0x28] sm:$0xff]   ;;  %v377_v10 = vld [vmem:[%s504_s0 + $0x30] sm:$0xff]  }
   0x3   :  { %v373_v5 = vld [vmem:[%s504_s0 + $0x20] sm:$0xff]   ;;  %v109_v6 = vand.u32 %v107_v4, %v31_v0  ;;  %353 = vmatprep.mubr.msk.bf16.mxu0 %vm79_vm2, %v372_v3  ;;  %v378_v11 = vld [vmem:[%s504_s0 + $0x18] sm:$0xff]  }
   0x4   :  { %361 = vmatprep.mubr.msk.bf16.mxu1 %vm79_vm2, %v373_v5  ;;  %v379_v12 = vld [vmem:[%s504_s0 + $0x38] sm:$0xff]   ;;  %v293_v13 = vld [vmem:[%s505_s2] ss:$0 sm:$0xff] }
   0x5   :  { %351 = vmatprep.subr.bf16.mxu0 %v109_v6  ;;  %369 = vmatprep.subr.bf16.mxu1 %v109_v6 }
   0x6   :  { %352 = vmatpush3.bf16.msra.mxu0 %v109_v6  ;;  %370 = vmatpush3.bf16.msra.mxu1 %v109_v6 }
   0x9   :  { %354 = vmatmul.mubr.msk.bf16.vlgmr.msra.gmra.mrb[0].mxu0 %vm79_vm2, %v374_v7  ;;  %362 = vmatmul.mubr.msk.bf16.vlgmr.msra.gmra.mrb[0].mxu1 %vm79_vm2, %v375_v8 }
   0xa   :  { %357 = vmatprep.mubr.msk.bf16.mxu0 %vm79_vm2, %v376_v9  ;;  %365 = vmatprep.mubr.msk.bf16.mxu1 %vm79_vm2, %v377_v10 }
  0x11   :  { %358 = vmatmul.mubr.msk.bf16.gmra.mrb[4].mxu0 %vm79_vm2, %v378_v11  ;;  %366 = vmatmul.mubr.msk.bf16.gmra.mrb[4].mxu1 %vm79_vm2, %v379_v12 }
  0xdc   :  { %v355_v14 = vpop.f32.mrb[0].mxu0  ;;  %v363_v15 = vpop.f32.mrb[0].mxu1 }
  0xdd   :  { %v154_v16 = vadd.f32 %v355_v14, %v293_v13  ;;  %v186_v17 = vadd.f32 %v363_v15, %v293_v13  ;;  %v145_v18 = vpop.f32.mrb[1].mxu0  ;;  %v177_v19 = vpop.f32.mrb[1].mxu1 }
  0xde   :  { %v146_v20 = vadd.f32 %v293_v13, %v145_v18  ;;  %v178_v21 = vadd.f32 %v293_v13, %v177_v19  ;;  %v356_v22 = vpop.f32.mrb[2].mxu0  ;;  %v364_v23 = vpop.f32.mrb[2].mxu1 }
  0xdf   :  { %v328_v24 = vpack.c.bf16 %v154_v16, %v154_v16  ;;  %v336_v25 = vpack.c.bf16 %v186_v17, %v186_v17  ;;  %v157_v26 = vadd.f32 %v356_v22, %v293_v13  ;;  %v189_v27 = vadd.f32 %v364_v23, %v293_v13  ;;  %v148_v28 = vpop.f32.mrb[3].mxu0  ;;  %v180_v29 = vpop.f32.mrb[3].mxu1 }
  0xe0   :  { %v326_v30 = vpack.c.bf16 %v146_v20, %v146_v20  ;;  %v334_v31 = vpack.c.bf16 %v178_v21, %v178_v21  ;;  %v149_v32 = vadd.f32 %v293_v13, %v148_v28  ;;  %v181_v33 = vadd.f32 %v293_v13, %v180_v29 }
  0xe1   :  { %275 = vst.msk [vmem:[%s506_s3 + $0x8] sm:$0xf] %vm272_vm3, %v328_v24  ;;  %283 = vst.msk [vmem:[%s506_s3 + $0x28] sm:$0xf] %vm272_vm3, %v336_v25  ;;  %v329_v34 = vpack.c.bf16 %v157_v26, %v157_v26  ;;  %v337_v35 = vpack.c.bf16 %v189_v27, %v189_v27 }
  0xe2   :  { %273 = vst.msk [vmem:[%s506_s3] sm:$0xf] %vm272_vm3, %v326_v30  ;;  %281 = vst.msk [vmem:[%s506_s3 + $0x20] sm:$0xf] %vm272_vm3, %v334_v31  ;;  %v327_v36 = vpack.c.bf16 %v149_v32, %v149_v32  ;;  %v335_v37 = vpack.c.bf16 %v181_v33, %v181_v33 }
  0xe3   :  { %276 = vst.msk [vmem:[%s506_s3 + $0xc] sm:$0xf] %vm272_vm3, %v329_v34  ;;  %284 = vst.msk [vmem:[%s506_s3 + $0x2c] sm:$0xf] %vm272_vm3, %v337_v35 }
  0xe4   :  { %274 = vst.msk [vmem:[%s506_s3 + $0x4] sm:$0xf] %vm272_vm3, %v327_v36  ;;  %282 = vst.msk [vmem:[%s506_s3 + $0x24] sm:$0xf] %vm272_vm3, %v335_v37  ;;  %v359_v38 = vpop.f32.mrb[4].mxu0  ;;  %v367_v39 = vpop.f32.mrb[4].mxu1 }
  0xe5   :  { %v170_v40 = vadd.f32 %v359_v38, %v293_v13  ;;  %v202_v41 = vadd.f32 %v367_v39, %v293_v13  ;;  %v161_v42 = vpop.f32.mrb[5].mxu0  ;;  %v193_v43 = vpop.f32.mrb[5].mxu1 }
  0xe6   :  { %v162_v44 = vadd.f32 %v293_v13, %v161_v42  ;;  %v194_v45 = vadd.f32 %v293_v13, %v193_v43  ;;  %v360_v46 = vpop.f32.mrb[6].mxu0  ;;  %v368_v47 = vpop.f32.mrb[6].mxu1 }
  0xe7   :  { %v332_v48 = vpack.c.bf16 %v170_v40, %v170_v40  ;;  %v340_v49 = vpack.c.bf16 %v202_v41, %v202_v41  ;;  %v173_v50 = vadd.f32 %v360_v46, %v293_v13  ;;  %v205_v51 = vadd.f32 %v368_v47, %v293_v13  ;;  %v164_v52 = vpop.f32.mrb[7].mxu0  ;;  %v196_v53 = vpop.f32.mrb[7].mxu1 }
  0xe8   :  { %v330_v54 = vpack.c.bf16 %v162_v44, %v162_v44  ;;  %v338_v55 = vpack.c.bf16 %v194_v45, %v194_v45  ;;  %v165_v56 = vadd.f32 %v293_v13, %v164_v52  ;;  %v197_v57 = vadd.f32 %v293_v13, %v196_v53 }
  0xe9   :  { %279 = vst.msk [vmem:[%s506_s3 + $0x18] sm:$0xf] %vm272_vm3, %v332_v48  ;;  %287 = vst.msk [vmem:[%s506_s3 + $0x38] sm:$0xf] %vm272_vm3, %v340_v49  ;;  %v333_v58 = vpack.c.bf16 %v173_v50, %v173_v50  ;;  %v341_v59 = vpack.c.bf16 %v205_v51, %v205_v51 }
  0xea   :  { %277 = vst.msk [vmem:[%s506_s3 + $0x10] sm:$0xf] %vm272_vm3, %v330_v54  ;;  %285 = vst.msk [vmem:[%s506_s3 + $0x30] sm:$0xf] %vm272_vm3, %v338_v55  ;;  %v331_v60 = vpack.c.bf16 %v165_v56, %v165_v56  ;;  %v339_v61 = vpack.c.bf16 %v197_v57, %v197_v57 }
  0xeb   :  { %280 = vst.msk [vmem:[%s506_s3 + $0x1c] sm:$0xf] %vm272_vm3, %v333_v58  ;;  %288 = vst.msk [vmem:[%s506_s3 + $0x3c] sm:$0xf] %vm272_vm3, %v341_v59 }
  0xec   :  { %278 = vst.msk [vmem:[%s506_s3 + $0x14] sm:$0xf] %vm272_vm3, %v331_v60  ;;  %286 = vst.msk [vmem:[%s506_s3 + $0x34] sm:$0xf] %vm272_vm3, %v339_v61 }

// kernel: pema_forward.7
= control target key start
LH: loop header
LB: loop body
LE: loop exit
PB: predicated region body
PF: predicated region fallthrough
CT: control target
= control target key end

     0   :  { %v2046_v1 = vmov 1   ;;  %vm73_vm0 = vcmask 261120   ;;  %s2047_s25 = smov 96   ;;  %v2048_v10 = vmov 4   ;;  %s2050_s24 = smov 32   ;;  %v2051_v20 = vmov 0   ;;  %s2599_s4 = inlined_call_operand.vmem [shape: bf16[32,32], index: 4, kind: input, shape index: {}]   ;;  %s2600_s5 = inlined_call_operand.vmem [shape: bf16[32,64], index: 5, kind: input, shape index: {}]   ;;  %s2601_s1 = inlined_call_operand.vmem [shape: bf16[32,128], index: 1, kind: input, shape index: {}]   ;;  %s2602_s0 = inlined_call_operand.vmem [shape: f32[32,32], index: 0, kind: input, shape index: {}]   ;;  %s2603_s6 = inlined_call_operand.vmem [shape: bf16[32,64], index: 6, kind: input, shape index: {}]   ;;  %s2604_s2 = inlined_call_operand.vmem [shape: bf16[32,128], index: 2, kind: input, shape index: {}]   ;;  %s2605_s3 = inlined_call_operand.vmem [shape: f32[32,5], index: 3, kind: input, shape index: {}]   ;;  %s2606_s8 = inlined_call_operand.vmem [shape: f32[32,32], index: 8, kind: input, shape index: {}]   ;;  %s2607_s7 = inlined_call_operand.vmem [shape: bf16[32,32], index: 7, kind: input, shape index: {}]   ;;  %s2608_s9 = inlined_call_operand.vmem [shape: f32[1,32], index: 9, kind: input, shape index: {}]   ;;  %s2609_s10 = inlined_call_operand.vmem [shape: f32[1,32], index: 10, kind: input, shape index: {}]   ;;  %s2610_s11 = inlined_call_operand.vmem [shape: f32[32,32], index: 11, kind: output, shape index: {}]  }
   0x1   :  { %v1970_v0 = vld [vmem:[%s2599_s4] sm:$0xff]   ;;  %1951 = vset.pattern.permute.xlu1 %v2046_v1  ;;  %v1973_v4 = vld [vmem:[%s2599_s4 + $0x8] sm:$0xff]   ;;  %v41_v9 = vld [vmem:[%s2602_s0 + $0x10] sm:$0xff]  ;;  %1957 = vset.pattern.permute.xlu0 %v2048_v10  ;;  %v2052_v24 = vmov 2   ;;  %v2053_v28 = vmov 3  }
   0x2   :  { %v2121_v2 = vld [vmem:[%s2600_s5] sm:$0xff]   ;;  %1775 = vmatprep.subr.bf16.mxu0 %v1970_v0  ;;  %v2135_v5 = vld [vmem:[%s2600_s5 + $0x8] sm:$0xff]   ;;  %v42_v12 = vld [vmem:[%s2602_s0 + $0x18] sm:$0xff] }
   0x3   :  { %v1972_v3 = vld [vmem:[%s2601_s1] sm:$0xff]   ;;  %1783 = vmatprep.subr.bf16.mxu1 %v2121_v2  ;;  %1776 = vmatpush3.bf16.msra.mxu0 %v1970_v0  ;;  %v1975_v6 = vld [vmem:[%s2601_s1 + $0x8] sm:$0xff]   ;;  %v56_v13 = vpack.c.bf16 %v42_v12, %v41_v9  ;;  %v2206_v23 = vld [vmem:[%s2605_s3 + $0x10] sm:$0xff] }
   0x4   :  { %432 = vrot.lane.b32.xlu0 %v1972_v3, %s2047_s25  ;;  %1784 = vmatpush3.bf16.msra.mxu1 %v2121_v2  ;;  %v39_v7 = vld [vmem:[%s2602_s0] sm:$0xff]  ;;  %v40_v8 = vld [vmem:[%s2602_s0 + $0x8] sm:$0xff]  ;;  %vm402_vm3 = vcmp.gt.f32.partialorder %v2206_v23, 0.0  ;;  %v54_v25 = vld [vmem:[%s2605_s3 + $0x18] sm:$0xff] }
   0x5   :  { %1777 = vmatprep.subr.bf16.mxu0 %v1973_v4  ;;  %1787 = vmatprep.mubr.msk.bf16.mxu1 %vm73_vm0, %v1972_v3  ;;  %v55_v11 = vpack.c.bf16 %v40_v8, %v39_v7  ;;  %v2160_v14 = vld [vmem:[%s2603_s6] sm:$0xff]   ;;  %v2166_v15 = vld [vmem:[%s2603_s6 + $0x8] sm:$0xff]   ;;  %s2049_s6 = smov 64   ;;  %v406_v26 = vsel %vm402_vm3, 1, %v2051_v20  ;;  %vm403_vm4 = vcmp.gt.f32.partialorder %v54_v25, 0.0  ;;  %v301_v32 = vld [vmem:[%s2606_s8 + $0x10] sm:$0xff] }
   0x6   :  { %1785 = vmatprep.subr.bf16.mxu1 %v2135_v5  ;;  %v1978_v16 = vld [vmem:[%s2604_s2] sm:$0xff]   ;;  %v1979_v17 = vld [vmem:[%s2604_s2 + $0x8] sm:$0xff]   ;;  %v407_v27 = vsel %vm403_vm4, 1, %v2051_v20  ;;  %v302_v33 = vld [vmem:[%s2606_s8 + $0x18] sm:$0xff] }
   0x7   :  { %1778 = vmatpush3.bf16.msra.mxu0 %v1973_v4  ;;  %1779 = vmatprep.mubr.msk.bf16.mxu0 %vm73_vm0, %v55_v11  ;;  %v2190_v18 = vld [vmem:[%s2605_s3 + $0x8] sm:$0xff]  ;;  %v2197_v19 = vld [vmem:[%s2605_s3] sm:$0xff]  ;;  %v2244_v34 = vpack.c.bf16 %v302_v33, %v301_v32 }
   0x8   :  { %434 = vrot.lane.b32.xlu0 %v1975_v6, %s2047_s25  ;;  %1786 = vmatpush3.bf16.msra.mxu1 %v2135_v5  ;;  %vm401_vm1 = vcmp.gt.f32.partialorder %v2190_v18, 0.0  ;;  %vm400_vm2 = vcmp.gt.f32.partialorder %v2197_v19, 0.0  ;;  %v299_v29 = vld [vmem:[%s2606_s8] sm:$0xff]  ;;  %v300_v30 = vld [vmem:[%s2606_s8 + $0x8] sm:$0xff] }
   0x9   :  { %1791 = vmatprep.subr.bf16.mxu0 %v2160_v14  ;;  %491 = vrot.lane.b32.xlu1 %v1978_v16, %s2047_s25  ;;  %v405_v21 = vsel %vm401_vm1, 1, %v2051_v20  ;;  %v404_v22 = vsel %vm400_vm2, 1, %v2051_v20  ;;  %v2234_v31 = vpack.c.bf16 %v300_v30, %v299_v29 }
   0xa   :  { %1780 = vmatmul.mubr.msk.bf16.vlgmr.msra.gmra.mrb[0].mxu0 %vm73_vm0, %v56_v13 }
   0xb   :  { %1788 = vmatmul.mubr.msk.bf16.vlgmr.msra.gmra.mrb[0].mxu1 %vm73_vm0, %v1975_v6  ;;  %1792 = vmatpush3.bf16.msra.mxu0 %v2160_v14 }
   0xc   :  { %1793 = vmatprep.subr.bf16.mxu0 %v2166_v15  ;;  %1795 = vmatprep.mubr.msk.bf16.mxu0 %vm73_vm0, %v1978_v16 }
   0xd   :  { %679 = vrot.lane.b32.xlu0 %v1972_v3, %s2049_s6  ;;  %493 = vrot.lane.b32.xlu1 %v1979_v17, %s2047_s25 }
   0xe   :  { %1912 = vmatprep.subr.bf16.mxu1 %v2234_v31 }
   0xf   :  { %1794 = vmatpush3.bf16.msra.mxu0 %v2166_v15  ;;  %1914 = vmatpush3.bf16.msra.mxu1 %v2234_v31 }
  0x10   :  { %1813 = vmatprep.subr.bf16.mxu0 %v2121_v2  ;;  %1916 = vmatprep.subr.bf16.mxu1 %v2244_v34 }
  0x11   :  { %738 = vrot.lane.b32.xlu0 %v1978_v16, %s2049_s6  ;;  %681 = vrot.lane.b32.xlu1 %v1975_v6, %s2049_s6 }
  0x12   :  { %1796 = vmatmul.mubr.msk.bf16.vlgmr.msra.gmra.mrb[4].mxu0 %vm73_vm0, %v1979_v17 }
  0x13   :  { %1814 = vmatpush3.bf16.msra.mxu0 %v2121_v2  ;;  %1918 = vmatpush3.bf16.msra.mxu1 %v2244_v34 }
  0x14   :  { %1815 = vmatprep.subr.bf16.mxu0 %v2135_v5  ;;  %1821 = vmatprep.subr.bf16.mxu1 %v2160_v14 }
  0x15   :  { %926 = vrot.lane.b32.xlu0 %v1972_v3, %s2050_s24  ;;  %740 = vrot.lane.b32.xlu1 %v1979_v17, %s2049_s6 }
  0x17   :  { %1816 = vmatpush3.bf16.msra.mxu0 %v2135_v5 }
  0x18   :  { %1920 = vmatprep.subr.bf16.mxu0 %v2234_v31 }
  0x19   :  { %985 = vrot.lane.b32.xlu0 %v1978_v16, %s2050_s24  ;;  %928 = vrot.lane.b32.xlu1 %v1975_v6, %s2050_s24 }
  0x1d   :  { %1153 = vperm.xlu0 %1957, %v405_v21   ;;  %987 = vrot.lane.b32.xlu1 %v1979_v17, %s2050_s24 }
  0x21   :  { %1958 = vset.pattern.permute.xlu0 %v2046_v1  ;;  %412 = vperm.xlu1 %1951, %v405_v21  }
  0x22   :  { %409 = vperm.xlu0 %1958, %v404_v22  }
  0x25   :  { %1952 = vset.pattern.permute.xlu1 %v2052_v24 }
  0x26   :  { %1251 = vperm.xlu0 %1958, %v2197_v19   ;;  %656 = vperm.xlu1 %1952, %v404_v22  }
  0x2a   :  { %1959 = vset.pattern.permute.xlu0 %v2052_v24  ;;  %1953 = vset.pattern.permute.xlu1 %v2046_v1 }
  0x2b   :  { %659 = vperm.xlu0 %1959, %v405_v21   ;;  %415 = vperm.xlu1 %1953, %v406_v26  }
  0x2f   :  { %662 = vperm.xlu0 %1959, %v406_v26   ;;  %418 = vperm.xlu1 %1953, %v407_v27  }
  0x33   :  { %1302 = vperm.xlu0 %1959, %v2190_v18   ;;  %1954 = vset.pattern.permute.xlu1 %v2052_v24 }
  0x34   :  { %665 = vperm.xlu1 %1954, %v407_v27  }
  0x37   :  { %1306 = vperm.xlu0 %1959, %v2206_v23  }
  0x38   :  { %1955 = vset.pattern.permute.xlu1 %v2053_v28 }
  0x39   :  { %906 = vperm.xlu1 %1955, %v405_v21  }
  0x3b   :  { %1963 = vset.pattern.permute.xlu0 %v2053_v28 }
  0x3c   :  { %903 = vperm.xlu0 %1963, %v404_v22  }
  0x3d   :  { %909 = vperm.xlu1 %1955, %v406_v26  }
  0x40   :  { %912 = vperm.xlu0 %1963, %v407_v27  }
  0x41   :  { %1956 = vset.pattern.permute.xlu1 %v2048_v10 }
  0x42   :  { %1150 = vperm.xlu1 %1956, %v404_v22  }
  0x44   :  { %1346 = vperm.xlu0 %1963, %v2197_v19  }
  0x46   :  { %1156 = vperm.xlu1 %1956, %v406_v26  }
  0x48   :  { %1358 = vperm.xlu0 %1963, %v54_v25  }
  0x4a   :  { %1159 = vperm.xlu1 %1956, %v407_v27  }
  0x4c   :  { %1967 = vset.pattern.permute.xlu0 %v2048_v10 }
  0x4d   :  { %1398 = vperm.xlu0 %1967, %v2190_v18  }
  0x4e   :  { %1960 = vset.pattern.permute.xlu1 %v2046_v1 }
  0x4f   :  { %1256 = vperm.xlu1 %1960, %v2190_v18  }
  0x51   :  { %1969 = vset.pattern.permute.xlu0 %v2051_v20 }
  0x53   :  { %1961 = vset.pattern.permute.xlu1 %v2052_v24 }
  0x54   :  { %1298 = vperm.xlu1 %1961, %v2197_v19  }
  0x58   :  { %1962 = vset.pattern.permute.xlu1 %v2046_v1 }
  0x59   :  { %1261 = vperm.xlu1 %1962, %v2206_v23  }
  0x5d   :  { %1266 = vperm.xlu1 %1962, %v54_v25  }
  0x61   :  { %1964 = vset.pattern.permute.xlu1 %v2052_v24 }
  0x62   :  { %1310 = vperm.xlu1 %1964, %v54_v25  }
  0x66   :  { %1965 = vset.pattern.permute.xlu1 %v2053_v28 }
  0x67   :  { %1350 = vperm.xlu1 %1965, %v2190_v18  }
  0x6b   :  { %1354 = vperm.xlu1 %1965, %v2206_v23  }
  0x6f   :  { %1966 = vset.pattern.permute.xlu1 %v2048_v10 }
  0x70   :  { %1394 = vperm.xlu1 %1966, %v2197_v19  }
  0x74   :  { %1402 = vperm.xlu1 %1966, %v2206_v23  }
  0x76   :  { %v433_v35 = vpop.permute.xlu0 %432 }
  0x77   :  { %1817 = vmatprep.mubr.msk.bf16.mxu0 %vm73_vm0, %v433_v35 }
  0x78   :  { %1406 = vperm.xlu1 %1966, %v54_v25  }
  0x7a   :  { %v435_v36 = vpop.permute.xlu0 %434 }
  0x7b   :  { %1818 = vmatmul.mubr.msk.bf16.vlgmr.msra.gmra.mrb[8].mxu0 %vm73_vm0, %v435_v36  ;;  %v492_v61 = vpop.permute.xlu1 %491 }
  0x7c   :  { %1922 = vmatpush3.bf16.msra.mxu0 %v2234_v31  ;;  %1968 = vset.pattern.permute.xlu1 %v2051_v20 }
  0x7d   :  { %1924 = vmatprep.subr.bf16.mxu0 %v2244_v34 }
  0x7f   :  { %v494_v62 = vpop.permute.xlu1 %493  ;;  %v680_v63 = vpop.permute.xlu0 %679 }
  0x80   :  { %1926 = vmatpush3.bf16.msra.mxu0 %v2244_v34 }
  0x81   :  { %1851 = vmatprep.subr.bf16.mxu0 %v2160_v14 }
  0x83   :  { %v682_v0 = vpop.permute.xlu1 %681  ;;  %v739_v30 = vpop.permute.xlu0 %738 }
  0xdd   :  { %v2262_v37 = vpop.f32.mrb[0].mxu0 }
  0xde   :  { %v1789_v38 = vpop.f32.mrb[0].mxu1  ;;  %v2264_v39 = vpop.f32.mrb[1].mxu0 }
  0xdf   :  { %v293_v40 = vmul.f32 %v1789_v38, %v2262_v37  ;;  %v195_v41 = vpop.f32.mrb[1].mxu1  ;;  %v2267_v42 = vpop.f32.mrb[2].mxu0 }
  0xe0   :  { %v291_v43 = vmul.f32 %v195_v41, %v2264_v39  ;;  %v1790_v44 = vpop.f32.mrb[2].mxu1  ;;  %v2270_v45 = vpop.f32.mrb[3].mxu0 }
  0xe1   :  { %v294_v46 = vmul.f32 %v1790_v44, %v2267_v42  ;;  %v198_v47 = vpop.f32.mrb[3].mxu1 }
  0xe2   :  { %v292_v48 = vmul.f32 %v198_v47, %v2270_v45 }
  0xe5   :  { %v1797_v49 = vpop.f32.mrb[4].mxu0 }
  0xe6   :  { %v297_v50 = vmul.f32 %v1797_v49, %v293_v40  ;;  %v430_v51 = vadd.f32 %v1797_v49, %v1789_v38  ;;  %v276_v52 = vpop.f32.mrb[5].mxu0 }
  0xe7   :  { %v295_v53 = vmul.f32 %v291_v43, %v276_v52  ;;  %v428_v54 = vadd.f32 %v276_v52, %v195_v41  ;;  %v1798_v55 = vpop.f32.mrb[6].mxu0  ;;  %v741_v43 = vpop.permute.xlu1 %740 }
  0xe8   :  { %v298_v56 = vmul.f32 %v1798_v55, %v294_v46  ;;  %v431_v57 = vadd.f32 %v1798_v55, %v1790_v44  ;;  %1285 = vrot.lane.b32.xlu0 %v430_v51, %s2047_s25  ;;  %v279_v58 = vpop.f32.mrb[7].mxu0  ;;  %v927_v44 = vpop.permute.xlu0 %926 }
  0xe9   :  { %v296_v59 = vmul.f32 %v292_v48, %v279_v58  ;;  %v429_v60 = vadd.f32 %v279_v58, %v198_v47  ;;  %1807 = vmatprep.mubr.msk.f32.mxu1 %vm73_vm0, %v295_v53 }
  0xea   :  { %1287 = vrot.lane.b32.xlu1 %v431_v57, %s2047_s25 }
  0xeb   :  { %1808 = vmatmul.mubr.msk.f32.vlgmr.msra.gmra.mrb[4].mxu1 %vm73_vm0, %v296_v59  ;;  %v929_v46 = vpop.permute.xlu1 %928 }
  0xec   :  { %1281 = vrot.lane.b32.xlu0 %v428_v54, %s2047_s25  ;;  %1810 = vmatprep.mubr.msk.f32.mxu1 %vm73_vm0, %v297_v50 }
  0xed   :  { %1822 = vmatpush3.bf16.msra.mxu1 %v2160_v14 }
  0xee   :  { %1283 = vrot.lane.b32.xlu1 %v429_v60, %s2047_s25  ;;  %1823 = vmatprep.subr.bf16.mxu1 %v2166_v15 }
  0xef   :  { %1811 = vmatmul.mubr.msk.f32.gmra.mrb[6].mxu1 %vm73_vm0, %v298_v56  ;;  %v2353_v47 = vpop.permute.xlu1 %987 }
  0xf0   :  { %1825 = vmatprep.mubr.msk.bf16.mxu1 %vm73_vm0, %v492_v61 }
  0xf1   :  { %1824 = vmatpush3.bf16.msra.mxu1 %v2166_v15 }
  0xf2   :  { %1843 = vmatprep.subr.bf16.mxu1 %v2121_v2 }
  0xf3   :  { %v413_v48 = vpop.permute.xlu1 %412 }
  0xf4   :  { %1826 = vmatmul.mubr.msk.bf16.vlgmr.msra.gmra.mrb[8].mxu1 %vm73_vm0, %v494_v62  ;;  %vm421_vm5 = vcmp.eq.s32.totalorder %v413_v48, 1 }
  0xf5   :  { %1844 = vmatpush3.bf16.msra.mxu1 %v2121_v2  ;;  %1847 = vmatprep.mubr.msk.bf16.mxu1 %vm73_vm0, %v680_v63 }
  0xf6   :  { %1845 = vmatprep.subr.bf16.mxu1 %v2135_v5 }
  0xf7   :  { %v657_v50 = vpop.permute.xlu1 %656 }
  0xf8   :  { %vm667_vm7 = vcmp.eq.s32.totalorder %v657_v50, 1 }
  0xf9   :  { %1846 = vmatpush3.bf16.msra.mxu1 %v2135_v5 }
  0xfa   :  { %1928 = vmatprep.subr.bf16.mxu1 %v2234_v31 }
  0xfb   :  { %v416_v51 = vpop.permute.xlu1 %415 }
  0xfc   :  { %1848 = vmatmul.mubr.msk.bf16.vlgmr.msra.gmra.mrb[12].mxu1 %vm73_vm0, %v682_v0  ;;  %vm422_vm11 = vcmp.eq.s32.totalorder %v416_v51, 1 }
  0xfd   :  { %1930 = vmatpush3.bf16.msra.mxu1 %v2234_v31 }
  0xfe   :  { %1932 = vmatprep.subr.bf16.mxu1 %v2244_v34 }
  0xff   :  { %v419_v53 = vpop.permute.xlu1 %418 }
 0x100   :  { %vm423_vm9 = vcmp.eq.s32.totalorder %v419_v53, 1 }
 0x101   :  { %1934 = vmatpush3.bf16.msra.mxu1 %v2244_v34 }
 0x102   :  { %1881 = vmatprep.subr.bf16.mxu1 %v2160_v14 }
 0x14e   :  { %v1819_v1 = vpop.f32.mrb[8].mxu0 }
 0x14f   :  { %v552_v3 = vmul.f32 %v1819_v1, %v2262_v37  ;;  %v476_v4 = vpop.f32.mrb[9].mxu0 }
 0x150   :  { %v550_v6 = vmul.f32 %v476_v4, %v2264_v39  ;;  %v1820_v7 = vpop.f32.mrb[10].mxu0 }
 0x151   :  { %v553_v8 = vmul.f32 %v1820_v7, %v2267_v42  ;;  %v479_v9 = vpop.f32.mrb[11].mxu0 }
 0x152   :  { %v551_v10 = vmul.f32 %v479_v9, %v2270_v45 }
 0x1be   :  { %v2302_v11 = vpop.f32.mrb[4].mxu1 }
 0x1bf   :  { %v2304_v12 = vpop.f32.mrb[5].mxu1  ;;  %v2362_v55 = vsel %vm421_vm5, %v2302_v11, -3.4028235e+38 }
 0x1c2   :  { %v2306_v13 = vpop.f32.mrb[6].mxu1 }
 0x1c3   :  { %v2308_v16 = vpop.f32.mrb[7].mxu1  ;;  %v2376_v0 = vsel %vm423_vm9, %v2306_v13, -3.4028235e+38 }
 0x1c7   :  { %v1827_v17 = vpop.f32.mrb[8].mxu1 }
 0x1c8   :  { %v556_v18 = vmul.f32 %v1827_v17, %v552_v3  ;;  %v677_v19 = vadd.f32 %v1827_v17, %v1819_v1  ;;  %v535_v20 = vpop.f32.mrb[9].mxu1 }
 0x1c9   :  { %v554_v21 = vmul.f32 %v550_v6, %v535_v20  ;;  %v675_v22 = vadd.f32 %v535_v20, %v476_v4  ;;  %v1828_v23 = vpop.f32.mrb[10].mxu1  ;;  %v2381_v4 = vsel %vm422_vm11, %v2308_v16, -3.4028235e+38 }
 0x1ca   :  { %v557_v24 = vmul.f32 %v1828_v23, %v553_v8  ;;  %v678_v25 = vadd.f32 %v1828_v23, %v1820_v7  ;;  %1329 = vrot.lane.b32.xlu0 %v677_v19, %s2047_s25  ;;  %v538_v26 = vpop.f32.mrb[11].mxu1 }
 0x1cb   :  { %v555_v27 = vmul.f32 %v551_v10, %v538_v26  ;;  %v676_v28 = vadd.f32 %v538_v26, %v479_v9  ;;  %1837 = vmatprep.mubr.msk.f32.mxu0 %vm73_vm0, %v554_v21 }
 0x1cc   :  { %1331 = vrot.lane.b32.xlu1 %v678_v25, %s2047_s25 }
 0x1cd   :  { %1838 = vmatmul.mubr.msk.f32.vlgmr.msra.gmra.mrb[12].mxu0 %vm73_vm0, %v555_v27 }
 0x1ce   :  { %1325 = vrot.lane.b32.xlu0 %v675_v22, %s2047_s25  ;;  %1840 = vmatprep.mubr.msk.f32.mxu0 %vm73_vm0, %v556_v18 }
 0x1cf   :  { %1852 = vmatpush3.bf16.msra.mxu0 %v2160_v14  ;;  %v2317_v29 = vpop.f32.mrb[12].mxu1 }
 0x1d0   :  { %v2321_v32 = vmul.f32 %v2317_v29, %v2262_v37  ;;  %v2323_v33 = vpop.f32.mrb[13].mxu1  ;;  %1327 = vrot.lane.b32.xlu1 %v676_v28, %s2047_s25  ;;  %1853 = vmatprep.subr.bf16.mxu0 %v2166_v15 }
 0x1d1   :  { %v797_v35 = vmul.f32 %v2323_v33, %v2264_v39  ;;  %1841 = vmatmul.mubr.msk.f32.gmra.mrb[14].mxu0 %vm73_vm0, %v557_v24  ;;  %v2330_v36 = vpop.f32.mrb[14].mxu1 }
 0x1d2   :  { %v800_v38 = vmul.f32 %v2330_v36, %v2267_v42  ;;  %v2334_v40 = vpop.f32.mrb[15].mxu1  ;;  %1855 = vmatprep.mubr.msk.bf16.mxu0 %vm73_vm0, %v739_v30 }
 0x1d3   :  { %v2339_v41 = vmul.f32 %v2334_v40, %v2270_v45  ;;  %1854 = vmatpush3.bf16.msra.mxu0 %v2166_v15 }
 0x1d4   :  { %1873 = vmatprep.subr.bf16.mxu0 %v2121_v2 }
 0x1d6   :  { %1856 = vmatmul.mubr.msk.bf16.vlgmr.msra.gmra.mrb[16].mxu0 %vm73_vm0, %v741_v43 }
 0x1d7   :  { %1874 = vmatpush3.bf16.msra.mxu0 %v2121_v2  ;;  %1877 = vmatprep.mubr.msk.bf16.mxu0 %vm73_vm0, %v927_v44  ;;  %v2355_v2 = vpop.permute.xlu0 %985 }
 0x1d8   :  { %1875 = vmatprep.subr.bf16.mxu0 %v2135_v5 }
 0x1db   :  { %1876 = vmatpush3.bf16.msra.mxu0 %v2135_v5  ;;  %v2357_v49 = vpop.permute.xlu0 %1153 }
 0x1dc   :  { %1936 = vmatprep.subr.bf16.mxu0 %v2234_v31  ;;  %vm1162_vm2 = vcmp.eq.s32.totalorder %v2357_v49, 1 }
 0x1de   :  { %1878 = vmatmul.mubr.msk.bf16.vlgmr.msra.gmra.mrb[20].mxu0 %vm73_vm0, %v929_v46 }
 0x1df   :  { %1938 = vmatpush3.bf16.msra.mxu0 %v2234_v31  ;;  %v410_v5 = vpop.permute.xlu0 %409 }
 0x1e0   :  { %1940 = vmatprep.subr.bf16.mxu0 %v2244_v34  ;;  %vm420_vm8 = vcmp.eq.s32.totalorder %v410_v5, 1 }
 0x1e1   :  { %v2367_v59 = vsel %vm420_vm8, %v2304_v12, -3.4028235e+38 }
 0x1e3   :  { %1942 = vmatpush3.bf16.msra.mxu0 %v2244_v34  ;;  %v2359_v52 = vpop.permute.xlu0 %1251  ;;  %v666_v34 = vpop.permute.xlu1 %665 }
 0x1e4   :  { %vm670_vm10 = vcmp.eq.s32.totalorder %v666_v34, 1 }
 0x1e7   :  { %v660_v54 = vpop.permute.xlu0 %659 }
 0x1e8   :  { %vm668_vm6 = vcmp.eq.s32.totalorder %v660_v54, 1 }
 0x1eb   :  { %v663_v58 = vpop.permute.xlu0 %662 }
 0x1ec   :  { %vm669_vm12 = vcmp.eq.s32.totalorder %v663_v58, 1 }
 0x2a0   :  { %v1839_v31 = vpop.f32.mrb[12].mxu0 }
 0x2a1   :  { %v2364_v56 = vsel %vm668_vm6, %v1839_v31, -3.4028235e+38  ;;  %v636_v57 = vpop.f32.mrb[13].mxu0 }
 0x2a2   :  { %v1174_v60 = vmax.f32 %v2362_v55, %v2364_v56  ;;  %v2371_v61 = vsel %vm667_vm7, %v636_v57, -3.4028235e+38 }
 0x2a3   :  { %v1173_v62 = vmax.f32 %v2367_v59, %v2371_v61 }
 0x2a4   :  { %v1842_v63 = vpop.f32.mrb[14].mxu0 }
 0x2a5   :  { %v2378_v1 = vsel %vm670_vm10, %v1842_v63, -3.4028235e+38  ;;  %v646_v3 = vpop.f32.mrb[15].mxu0  ;;  %v1980_v63 = vld [vmem:[%s2607_s7] sm:$0xff]  }
 0x2a6   :  { %v1176_v6 = vmax.f32 %v2376_v0, %v2378_v1  ;;  %v2385_v7 = vsel %vm669_vm12, %v646_v3, -3.4028235e+38  ;;  %v1981_v3 = vld [vmem:[%s2607_s7 + $0x8] sm:$0xff]  }
 0x2a7   :  { %v1175_v8 = vmax.f32 %v2381_v4, %v2385_v7 }
 0x2a9   :  { %v1857_v9 = vpop.f32.mrb[16].mxu0 }
 0x2aa   :  { %v803_v10 = vmul.f32 %v1857_v9, %v2321_v32  ;;  %v924_v11 = vadd.f32 %v1857_v9, %v2317_v29  ;;  %v782_v12 = vpop.f32.mrb[17].mxu0  ;;  %v907_v32 = vpop.permute.xlu1 %906 }
 0x2ab   :  { %v801_v13 = vmul.f32 %v797_v35, %v782_v12  ;;  %v922_v17 = vadd.f32 %v782_v12, %v2323_v33  ;;  %v1858_v18 = vpop.f32.mrb[18].mxu0  ;;  %vm915_vm13 = vcmp.eq.s32.totalorder %v907_v32, 1 }
 0x2ac   :  { %v804_v16 = vmul.f32 %v1858_v18, %v800_v38  ;;  %v925_v19 = vadd.f32 %v1858_v18, %v2330_v36  ;;  %1377 = vrot.lane.b32.xlu0 %v924_v11, %s2047_s25  ;;  %v785_v20 = vpop.f32.mrb[19].mxu0 }
 0x2ad   :  { %v802_v21 = vmul.f32 %v2339_v41, %v785_v20  ;;  %v923_v22 = vadd.f32 %v785_v20, %v2334_v40  ;;  %1867 = vmatprep.mubr.msk.f32.mxu1 %vm73_vm0, %v801_v13 }
 0x2ae   :  { %1379 = vrot.lane.b32.xlu1 %v925_v19, %s2047_s25  ;;  %v910_v38 = vpop.permute.xlu1 %909 }
 0x2af   :  { %1868 = vmatmul.mubr.msk.f32.vlgmr.msra.gmra.mrb[16].mxu1 %vm73_vm0, %v802_v21  ;;  %vm916_vm1 = vcmp.eq.s32.totalorder %v910_v38, 1 }
 0x2b0   :  { %1373 = vrot.lane.b32.xlu0 %v922_v17, %s2047_s25  ;;  %1870 = vmatprep.mubr.msk.f32.mxu1 %vm73_vm0, %v803_v10 }
 0x2b1   :  { %1882 = vmatpush3.bf16.msra.mxu1 %v2160_v14  ;;  %v1879_v23 = vpop.f32.mrb[20].mxu0 }
 0x2b2   :  { %v1046_v24 = vmul.f32 %v1879_v23, %v2262_v37  ;;  %v970_v25 = vpop.f32.mrb[21].mxu0  ;;  %1375 = vrot.lane.b32.xlu1 %v923_v22, %s2047_s25  ;;  %1883 = vmatprep.subr.bf16.mxu1 %v2166_v15  ;;  %v2414_v37 = vpop.permute.xlu0 %1302 }
 0x2b3   :  { %v1044_v26 = vmul.f32 %v970_v25, %v2264_v39  ;;  %1871 = vmatmul.mubr.msk.f32.gmra.mrb[18].mxu1 %vm73_vm0, %v804_v16  ;;  %v1880_v27 = vpop.f32.mrb[22].mxu0 }
 0x2b4   :  { %v1047_v28 = vmul.f32 %v1880_v27, %v2267_v42  ;;  %v973_v29 = vpop.f32.mrb[23].mxu0  ;;  %1885 = vmatprep.mubr.msk.bf16.mxu1 %vm73_vm0, %v2355_v2 }
 0x2b5   :  { %v1045_v14 = vmul.f32 %v973_v29, %v2270_v45  ;;  %1884 = vmatpush3.bf16.msra.mxu1 %v2166_v15 }
 0x2b6   :  { %v2416_v30 = vpop.permute.xlu0 %1306  ;;  %1903 = vmatprep.subr.bf16.mxu1 %v1980_v63 }
 0x2b8   :  { %1886 = vmatmul.mubr.msk.bf16.vlgmr.msra.gmra.mrb[20].mxu1 %vm73_vm0, %v2353_v47 }
 0x2b9   :  { %1904 = vmatpush3.bf16.msra.mxu1 %v1980_v63 }
 0x2ba   :  { %v904_v39 = vpop.permute.xlu0 %903  ;;  %1905 = vmatprep.subr.bf16.mxu1 %v1981_v3 }
 0x2bb   :  { %vm914_vm14 = vcmp.eq.s32.totalorder %v904_v39, 1 }
 0x2bd   :  { %1906 = vmatpush3.bf16.msra.mxu1 %v1981_v3 }
 0x2be   :  { %v913_v33 = vpop.permute.xlu0 %912 }
 0x2bf   :  { %vm917_vm15 = vcmp.eq.s32.totalorder %v913_v33, 1 }
 0x2c2   :  { %v2464_v20 = vpop.permute.xlu0 %1346 }
 0x382   :  { %v1869_v42 = vpop.f32.mrb[16].mxu1 }
 0x383   :  { %v2418_v35 = vsel %vm915_vm13, %v1869_v42, -3.4028235e+38  ;;  %v883_v36 = vpop.f32.mrb[17].mxu1 }
 0x384   :  { %v1178_v15 = vmax.f32 %v1174_v60, %v2418_v35  ;;  %v2421_v45 = vsel %vm914_vm14, %v883_v36, -3.4028235e+38 }
 0x385   :  { %v1177_v40 = vmax.f32 %v1173_v62, %v2421_v45 }
 0x386   :  { %v1872_v41 = vpop.f32.mrb[18].mxu1 }
 0x387   :  { %v2424_v43 = vsel %vm917_vm15, %v1872_v41, -3.4028235e+38  ;;  %v893_v44 = vpop.f32.mrb[19].mxu1 }
 0x388   :  { %v2427_v46 = vmax.f32 %v1176_v6, %v2424_v43  ;;  %v2429_v47 = vsel %vm916_vm1, %v893_v44, -3.4028235e+38  ;;  %v1151_v6 = vpop.permute.xlu1 %1150 }
 0x389   :  { %v2432_v2 = vmax.f32 %v1175_v8, %v2429_v47  ;;  %vm1161_vm3 = vcmp.eq.s32.totalorder %v1151_v6, 1 }
 0x38b   :  { %v1887_v48 = vpop.f32.mrb[20].mxu1 }
 0x38c   :  { %v1050_v50 = vmul.f32 %v1887_v48, %v1046_v24  ;;  %v1171_v5 = vadd.f32 %v1887_v48, %v1879_v23  ;;  %v1029_v51 = vpop.f32.mrb[21].mxu1  ;;  %v1157_v8 = vpop.permute.xlu1 %1156 }
 0x38d   :  { %v1048_v53 = vmul.f32 %v1044_v26, %v1029_v51  ;;  %v1169_v54 = vadd.f32 %v1029_v51, %v970_v25  ;;  %v1888_v31 = vpop.f32.mrb[22].mxu1  ;;  %vm1163_vm5 = vcmp.eq.s32.totalorder %v1157_v8, 1 }
 0x38e   :  { %v1051_v34 = vmul.f32 %v1888_v31, %v1047_v28  ;;  %v1172_v57 = vadd.f32 %v1888_v31, %v1880_v27  ;;  %v1032_v58 = vpop.f32.mrb[23].mxu1  ;;  %v2469_v28 = vpop.permute.xlu0 %1358 }
 0x38f   :  { %v1049_v60 = vmul.f32 %v1045_v14, %v1032_v58  ;;  %v1170_v62 = vadd.f32 %v1032_v58, %v973_v29  ;;  %1421 = vrot.lane.b32.xlu0 %v1169_v54, %s2047_s25  ;;  %1897 = vmatprep.mubr.msk.f32.mxu0 %vm73_vm0, %v1048_v53 }
 0x390   :  { %v1160_v9 = vpop.permute.xlu1 %1159 }
 0x391   :  { %1423 = vrot.lane.b32.xlu1 %v1170_v62, %s2047_s25  ;;  %1898 = vmatmul.mubr.msk.f32.vlgmr.msra.gmra.mrb[24].mxu0 %vm73_vm0, %v1049_v60  ;;  %vm1164_vm4 = vcmp.eq.s32.totalorder %v1160_v9, 1 }
 0x392   :  { %1900 = vmatprep.mubr.msk.f32.mxu0 %vm73_vm0, %v1050_v50 }
 0x393   :  { %1425 = vrot.lane.b32.xlu0 %v1171_v5, %s2047_s25  ;;  %v2480_v5 = vpop.permute.xlu0 %1398 }
 0x394   :  { %v2448_v10 = vpop.permute.xlu1 %1256 }
 0x395   :  { %1427 = vrot.lane.b32.xlu1 %v1172_v57, %s2047_s25  ;;  %1901 = vmatmul.mubr.msk.f32.gmra.mrb[26].mxu0 %vm73_vm0, %v1051_v34 }
 0x397   :  { %v2491_v6 = vpop.permute.xlu0 %1285 }
 0x398   :  { %v2450_v11 = vpop.permute.xlu1 %1298 }
 0x39c   :  { %v2452_v12 = vpop.permute.xlu1 %1261 }
 0x3a0   :  { %v2454_v13 = vpop.permute.xlu1 %1266 }
 0x3a4   :  { %v2456_v17 = vpop.permute.xlu1 %1310 }
 0x3a8   :  { %v2458_v18 = vpop.permute.xlu1 %1350 }
 0x3ac   :  { %v2460_v16 = vpop.permute.xlu1 %1354 }
 0x3b0   :  { %v2462_v19 = vpop.permute.xlu1 %1394 }
 0x3b4   :  { %v2467_v21 = vpop.permute.xlu1 %1402 }
 0x3b8   :  { %v2477_v41 = vpop.permute.xlu1 %1406 }
 0x3bc   :  { %v2486_v57 = vpop.permute.xlu1 %1287 }
 0x464   :  { %v1899_v22 = vpop.f32.mrb[24].mxu0 }
 0x465   :  { %v1166_v23 = vsel %vm1162_vm2, %v1899_v22, -3.4028235e+38  ;;  %v1130_v24 = vpop.f32.mrb[25].mxu0 }
 0x466   :  { %v1182_v25 = vmax.f32 %v1178_v15, %v1166_v23  ;;  %v1165_v26 = vsel %vm1161_vm3, %v1130_v24, -3.4028235e+38 }
 0x467   :  { %v1181_v27 = vmax.f32 %v1177_v40, %v1165_v26 }
 0x468   :  { %v1186_v29 = vsub.f32 %v2362_v55, %v1182_v25  ;;  %v1198_v14 = vsub.f32 %v2364_v56, %v1182_v25  ;;  %v1210_v39 = vsub.f32 %v2418_v35, %v1182_v25  ;;  %v1222_v32 = vsub.f32 %v1166_v23, %v1182_v25  ;;  %v1902_v42 = vpop.f32.mrb[26].mxu0 }
 0x469   :  { %v1185_v49 = vsub.f32 %v2367_v59, %v1181_v27  ;;  %v1197_v33 = vsub.f32 %v2371_v61, %v1181_v27  ;;  %v1209_v36 = vsub.f32 %v2421_v45, %v1181_v27  ;;  %v1221_v38 = vsub.f32 %v1165_v26, %v1181_v27  ;;  %v1140_v15 = vpop.f32.mrb[27].mxu0  ;;  %v1282_v27 = vpop.permute.xlu0 %1281 }
 0x46a   :  { %v1191_v40 = vmul.f32 1.442695, %v1186_v29  ;;  %v1203_v44 = vmul.f32 1.442695, %v1198_v14  ;;  %v1215_v48 = vmul.f32 1.442695, %v1210_v39 }
 0x46b   :  { %v1227_v55 = vmul.f32 1.442695, %v1222_v32  ;;  %v1189_v56 = vmul.f32 1.442695, %v1185_v49  ;;  %v1168_v35 = vsel %vm1164_vm4, %v1902_v42, -3.4028235e+38 }
 0x46c   :  { %1982 = vpow2.f32 %v1191_v40  ;;  %v1201_v50 = vmul.f32 1.442695, %v1197_v33  ;;  %v1184_v59 = vmax.f32 %v2427_v46, %v1168_v35  ;;  %v1167_v61 = vsel %vm1163_vm5, %v1140_v15, -3.4028235e+38 }
 0x46d   :  { %1984 = vpow2.f32 %v1203_v44  ;;  %v1213_v45 = vmul.f32 1.442695, %v1209_v36  ;;  %v1225_v51 = vmul.f32 1.442695, %v1221_v38  ;;  %v1183_v53 = vmax.f32 %v2432_v2, %v1167_v61  ;;  %v2495_v38 = vpop.permute.xlu0 %1329 }
 0x46e   :  { %1986 = vpow2.f32 %v1215_v48  ;;  %v1188_v54 = vsub.f32 %v2376_v0, %v1184_v59  ;;  %v1200_v31 = vsub.f32 %v2378_v1, %v1184_v59  ;;  %v1212_v34 = vsub.f32 %v2424_v43, %v1184_v59 }
 0x46f   :  { %1988 = vpow2.f32 %v1227_v55  ;;  %v1224_v58 = vsub.f32 %v1168_v35, %v1184_v59  ;;  %v1187_v46 = vsub.f32 %v2381_v4, %v1183_v53  ;;  %v1199_v60 = vsub.f32 %v2385_v7, %v1183_v53  ;;  %v1284_v4 = vpop.permute.xlu1 %1283 }
 0x470   :  { %1990 = vpow2.f32 %v1189_v56  ;;  %v1195_v62 = vmul.f32 1.442695, %v1188_v54  ;;  %v1207_v63 = vmul.f32 1.442695, %v1200_v31  ;;  %v1219_v2 = vmul.f32 1.442695, %v1212_v34 }
 0x471   :  { %1992 = vpow2.f32 %v1201_v50  ;;  %v1231_v3 = vmul.f32 1.442695, %v1224_v58  ;;  %v1211_v0 = vsub.f32 %v2429_v47, %v1183_v53  ;;  %v1223_v1 = vsub.f32 %v1167_v61, %v1183_v53 }
 0x472   :  { %1994 = vpow2.f32 %v1213_v45  ;;  %v1193_v43 = vmul.f32 1.442695, %v1187_v46  ;;  %v1205_v8 = vmul.f32 1.442695, %v1199_v60  ;;  %v1326_v45 = vpop.permute.xlu0 %1325 }
 0x473   :  { %1996 = vpow2.f32 %v1225_v51  ;;  %v1217_v22 = vmul.f32 1.442695, %v1211_v0  ;;  %v1229_v26 = vmul.f32 1.442695, %v1223_v1  ;;  %v2493_v29 = vpop.permute.xlu1 %1331 }
 0x474   :  { %1998 = vpow2.f32 %v1195_v62 }
 0x475   :  { %2000 = vpow2.f32 %v1207_v63 }
 0x476   :  { %v1983_v9 = vpop.eup %1982  ;;  %2002 = vpow2.f32 %v1219_v2 }
 0x477   :  { %v1985_v7 = vpop.eup %1984  ;;  %2004 = vpow2.f32 %v1231_v3  ;;  %v1328_v48 = vpop.permute.xlu1 %1327  ;;  %v1270_v60 = vmul.f32 %v1983_v9, %v2448_v10 }
 0x478   :  { %v1987_v23 = vpop.eup %1986  ;;  %v1234_v24 = vadd.f32 %v1985_v7, %v1983_v9  ;;  %2006 = vpow2.f32 %v1193_v43  ;;  %v1314_v62 = vmul.f32 %v1985_v7, %v2414_v37  ;;  %v2503_v3 = vpop.permute.xlu0 %1377 }
 0x479   :  { %v1989_v25 = vpop.eup %1988  ;;  %2008 = vpow2.f32 %v1205_v8  ;;  %v1362_v63 = vmul.f32 %v1987_v23, %v2458_v18 }
 0x47a   :  { %v1991_v47 = vpop.eup %1990  ;;  %v1238_v14 = vadd.f32 %v1987_v23, %v1234_v24  ;;  %2010 = vpow2.f32 %v1217_v22  ;;  %v1410_v46 = vmul.f32 %v1989_v25, %v2480_v5 }
 0x47b   :  { %v1993_v39 = vpop.eup %1992  ;;  %2012 = vpow2.f32 %v1229_v26  ;;  %v2497_v51 = vpop.permute.xlu1 %1379  ;;  %v1269_v26 = vmul.f32 %v1991_v47, %v2359_v52 }
 0x47c   :  { %v1995_v32 = vpop.eup %1994  ;;  %v1242_v42 = vadd.f32 %v1989_v25, %v1238_v14  ;;  %v1233_v49 = vadd.f32 %v1993_v39, %v1991_v47  ;;  %v1313_v5 = vmul.f32 %v1993_v39, %v2450_v11 }
 0x47d   :  { %v1997_v33 = vpop.eup %1996  ;;  %v1361_v37 = vmul.f32 %v1995_v32, %v2464_v20 }
 0x47e   :  { %v1999_v36 = vpop.eup %1998  ;;  %2014 = vrcp.f32 %v1242_v42  ;;  %v1237_v15 = vadd.f32 %v1995_v32, %v1233_v49  ;;  %v1409_v18 = vmul.f32 %v1997_v33, %v2462_v19 }
 0x47f   :  { %v2001_v40 = vpop.eup %2000  ;;  %v1376_v24 = vpop.permute.xlu1 %1375 }
 0x480   :  { %v2003_v44 = vpop.eup %2002  ;;  %v1241_v55 = vadd.f32 %v1997_v33, %v1237_v15  ;;  %v1236_v56 = vadd.f32 %v2001_v40, %v1999_v36  ;;  %v1374_v15 = vpop.permute.xlu0 %1373  ;;  %v1316_v32 = vmul.f32 %v2001_v40, %v2456_v17 }
 0x481   :  { %v2005_v35 = vpop.eup %2004  ;;  %v1364_v19 = vmul.f32 %v2003_v44, %v2469_v28 }
 0x482   :  { %v2007_v50 = vpop.eup %2006  ;;  %2016 = vrcp.f32 %v1241_v55  ;;  %v1240_v59 = vadd.f32 %v2003_v44, %v1236_v56  ;;  %v1272_v56 = vmul.f32 %v1999_v36, %v2454_v13  ;;  %v1412_v52 = vmul.f32 %v2005_v35, %v2477_v41 }
 0x483   :  { %v2009_v61 = vpop.eup %2008  ;;  %v1424_v55 = vpop.permute.xlu1 %1423  ;;  %v1271_v13 = vmul.f32 %v2007_v50, %v2452_v12 }
 0x484   :  { %v1244_v53 = vadd.f32 %v2005_v35, %v1240_v59  ;;  %v1235_v54 = vadd.f32 %v2009_v61, %v2007_v50  ;;  %v2011_v31 = vpop.eup %2010  ;;  %v1315_v41 = vmul.f32 %v2009_v61, %v2416_v30 }
 0x485   :  { %v2013_v58 = vpop.eup %2012  ;;  %v1363_v28 = vmul.f32 %v2011_v31, %v2460_v16 }
 0x486   :  { %2018 = vrcp.f32 %v1244_v53  ;;  %v1239_v34 = vadd.f32 %v2011_v31, %v1235_v54  ;;  %v1411_v35 = vmul.f32 %v2013_v58, %v2467_v21 }
 0x487   :  { %v1428_v61 = vpop.permute.xlu1 %1427 }
 0x488   :  { %v2015_v2 = vpop.eup %2014  ;;  %v1243_v0 = vadd.f32 %v2013_v58, %v1239_v34 }
 0x489   :  { %v1274_v1 = vmul.f32 %v2015_v2, %v1270_v60  ;;  %v1318_v43 = vmul.f32 %v2015_v2, %v1314_v62  ;;  %v1366_v8 = vmul.f32 %v2015_v2, %v1362_v63  ;;  %v1414_v22 = vmul.f32 %v2015_v2, %v1410_v46  ;;  %v1422_v46 = vpop.permute.xlu0 %1421 }
 0x48a   :  { %2020 = vrcp.f32 %v1243_v0 }
 0x48b   :  { %v1294_v14 = vmul.f32 %v1284_v4, %v1274_v1  ;;  %v1338_v10 = vmul.f32 %v1328_v48, %v1318_v43  ;;  %v1386_v7 = vmul.f32 %v1376_v24, %v1366_v8  ;;  %v1434_v48 = vmul.f32 %v1424_v55, %v1414_v22 }
 0x48c   :  { %v2017_v9 = vpop.eup %2016 }
 0x48d   :  { %v1273_v23 = vmul.f32 %v2017_v9, %v1269_v26  ;;  %v1317_v25 = vmul.f32 %v2017_v9, %v1313_v5  ;;  %v1342_v42 = vadd.f32 %v1338_v10, %v1294_v14  ;;  %v1365_v49 = vmul.f32 %v2017_v9, %v1361_v37  ;;  %v1426_v31 = vpop.permute.xlu0 %1425 }
 0x48e   :  { %v1413_v4 = vmul.f32 %v2017_v9, %v1409_v18  ;;  %v2040_v18 = vld [vmem:[%s2602_s0 + $0x8] sm:$0xff] }
 0x48f   :  { %v1293_v47 = vmul.f32 %v1282_v27, %v1273_v23  ;;  %v1337_v11 = vmul.f32 %v1326_v45, %v1317_v25  ;;  %v1390_v39 = vadd.f32 %v1386_v7, %v1342_v42  ;;  %v1385_v33 = vmul.f32 %v1374_v15, %v1365_v49  ;;  %v2041_v42 = vld [vmem:[%s2602_s0 + $0x18] sm:$0xff] }
 0x490   :  { %v2019_v20 = vpop.eup %2018  ;;  %v1433_v60 = vmul.f32 %v1422_v46, %v1413_v4 }
 0x491   :  { %v1416_v59 = vmul.f32 %v2019_v20, %v1412_v52  ;;  %v1341_v53 = vadd.f32 %v1337_v11, %v1293_v47  ;;  %v1438_v54 = vadd.f32 %v1434_v48, %v1390_v39  ;;  %v1276_v34 = vmul.f32 %v2019_v20, %v1272_v56 }
 0x492   :  { %v1320_v36 = vmul.f32 %v2019_v20, %v1316_v32  ;;  %v1368_v27 = vmul.f32 %v2019_v20, %v1364_v19 }
 0x493   :  { %v1389_v45 = vadd.f32 %v1385_v33, %v1341_v53  ;;  %v1296_v17 = vmul.f32 %v2486_v57, %v1276_v34  ;;  %v1436_v43 = vmul.f32 %v1428_v61, %v1416_v59 }
 0x494   :  { %v2021_v40 = vpop.eup %2020  ;;  %v1340_v44 = vmul.f32 %v2493_v29, %v1320_v36  ;;  %v1388_v30 = vmul.f32 %v2497_v51, %v1368_v27 }
 0x495   :  { %v1415_v62 = vmul.f32 %v2021_v40, %v1411_v35  ;;  %v1437_v63 = vadd.f32 %v1433_v60, %v1389_v45  ;;  %v1275_v2 = vmul.f32 %v2021_v40, %v1271_v13  ;;  %v1319_v0 = vmul.f32 %v2021_v40, %v1315_v41  ;;  %v2042_v35 = vld [vmem:[%s2605_s3] sm:$0xff]  ;;  %v2043_v45 = vld [vmem:[%s2605_s3 + $0x10] sm:$0xff]  ;;  %v2044_v60 = vld [vmem:[%s2605_s3 + $0x8] sm:$0xff] }
 0x496   :  { %v1344_v12 = vadd.f32 %v1340_v44, %v1296_v17  ;;  %v1367_v50 = vmul.f32 %v2021_v40, %v1363_v28  ;;  %v2045_v17 = vld [vmem:[%s2605_s3 + $0x18] sm:$0xff] }
 0x497   :  { %v1441_v1 = vpack.c.bf16 %v1438_v54, %v1437_v63  ;;  %v1295_v21 = vmul.f32 %v2491_v6, %v1275_v2  ;;  %v1339_v58 = vmul.f32 %v2495_v38, %v1319_v0  ;;  %v1435_v24 = vmul.f32 %v1426_v31, %v1415_v62  ;;  %v2038_v6 = vld [vmem:[%s2602_s0] sm:$0xff] }
 0x498   :  { %v1392_v57 = vadd.f32 %v1388_v30, %v1344_v12  ;;  %v1387_v29 = vmul.f32 %v2503_v3, %v1367_v50  ;;  %v2039_v3 = vld [vmem:[%s2602_s0 + $0x10] sm:$0xff] }
 0x499   :  { %1907 = vmatprep.mubr.msk.bf16.mxu1 %vm73_vm0, %v1441_v1  ;;  %v1343_v16 = vadd.f32 %v1339_v58, %v1295_v21 }
 0x49a   :  { %v1440_v8 = vadd.f32 %v1436_v43, %v1392_v57 }
 0x49b   :  { %v1391_v22 = vadd.f32 %v1387_v29, %v1343_v16 }
 0x49d   :  { %v1439_v26 = vadd.f32 %v1435_v24, %v1391_v22 }
 0x49f   :  { %v1442_v14 = vpack.c.bf16 %v1440_v8, %v1439_v26 }
 0x4a1   :  { %1908 = vmatmul.mubr.msk.bf16.vlgmr.msra.gmra.mrb[24].mxu1 %vm73_vm0, %v1442_v14 }
 0x574   :  { %v1909_v51 = vpop.f32.mrb[24].mxu1 }
 0x575   :  { %v1499_v5 = vpop.f32.mrb[25].mxu1  ;;  %v1516_v9 = vadd.f32 %v2039_v3, %v1909_v51 }
 0x576   :  { %v1514_v38 = vadd.f32 %v2038_v6, %v1499_v5  ;;  %v1910_v10 = vpop.f32.mrb[26].mxu1 }
 0x577   :  { %v1502_v37 = vpop.f32.mrb[27].mxu1  ;;  %v1517_v49 = vadd.f32 %v2041_v42, %v1910_v10  ;;  %v1526_v15 = vsel %vm73_vm0, %v1516_v9, 0.0  ;;  %v1701_v42 = vld [vmem:[%s2608_s9] ss:$0 sm:$0xff] }
 0x578   :  { %v1515_v7 = vadd.f32 %v2040_v18, %v1502_v37  ;;  %v1520_v23 = vsel %vm73_vm0, %v1514_v38, 0.0 }
 0x579   :  { %1521 = vadd.xlane.f32.xlu0 %v1520_v23  ;;  %v1529_v55 = vsel %vm73_vm0, %v1517_v49, 0.0 }
 0x57a   :  { %v1523_v25 = vsel %vm73_vm0, %v1515_v7, 0.0 }
 0x57b   :  { %1524 = vadd.xlane.f32.xlu1 %v1523_v25 }
 0x57d   :  { %1527 = vadd.xlane.f32.xlu0 %v1526_v15 }
 0x581   :  { %1530 = vadd.xlane.f32.xlu0 %v1529_v55 }
 0x606   :  { %v1522_v56 = vpop.xlane.xlu0 %1521 }
 0x607   :  { %v1533_v4 = vmul.f32 0.03125, %v1522_v56  ;;  %v1702_v56 = vld [vmem:[%s2609_s10] ss:$0 sm:$0xff] }
 0x608   :  { %v1525_v52 = vpop.xlane.xlu1 %1524 }
 0x609   :  { %v1534_v47 = vmul.f32 0.03125, %v1525_v52  ;;  %v2543_v20 = vsub.f32 %v1514_v38, %v1533_v4 }
 0x60a   :  { %v1528_v11 = vpop.xlane.xlu0 %1527 }
 0x60b   :  { %v2541_v39 = vsub.f32 %v1515_v7, %v1534_v47  ;;  %v1535_v48 = vmul.f32 0.03125, %v1528_v11  ;;  %v1541_v13 = vmul.f32 %v2543_v20, %v2543_v20 }
 0x60d   :  { %v2545_v32 = vsub.f32 %v1516_v9, %v1535_v48  ;;  %v1542_v19 = vmul.f32 %v2541_v39, %v2541_v39  ;;  %v1545_v36 = vsel %vm73_vm0, %v1541_v13, 0.0  ;;  %v1608_v15 = vmul.f32 %v1701_v42, %v2541_v39 }
 0x60e   :  { %v1531_v33 = vpop.xlane.xlu0 %1530  ;;  %v1607_v39 = vmul.f32 %v1701_v42, %v2543_v20 }
 0x60f   :  { %v1536_v59 = vmul.f32 0.03125, %v1531_v33  ;;  %v1548_v53 = vsel %vm73_vm0, %v1542_v19, 0.0  ;;  %v1543_v54 = vmul.f32 %v2545_v32, %v2545_v32  ;;  %v1609_v52 = vmul.f32 %v1701_v42, %v2545_v32 }
 0x610   :  { %1549 = vadd.xlane.f32.xlu0 %v1548_v53 }
 0x611   :  { %v2552_v34 = vsub.f32 %v1517_v49, %v1536_v59  ;;  %v1551_v46 = vsel %vm73_vm0, %v1543_v54, 0.0 }
 0x612   :  { %1552 = vadd.xlane.f32.xlu1 %v1551_v46 }
 0x613   :  { %v1544_v41 = vmul.f32 %v2552_v34, %v2552_v34  ;;  %v1610_v59 = vmul.f32 %v1701_v42, %v2552_v34 }
 0x615   :  { %v1554_v27 = vsel %vm73_vm0, %v1544_v41, 0.0 }
 0x616   :  { %1546 = vadd.xlane.f32.xlu1 %v1545_v36  ;;  %1555 = vadd.xlane.f32.xlu0 %v1554_v27 }
 0x627   :  { %1626 = vperm.xlu1 %1968, %v2042_v35  }
 0x62b   :  { %1634 = vperm.xlu1 %1968, %v2043_v45  }
 0x62c   :  { %1630 = vperm.xlu0 %1969, %v2044_v60  }
 0x62f   :  { %1638 = vperm.xlu1 %1968, %v2045_v17  }
 0x69d   :  { %v1550_v40 = vpop.xlane.xlu0 %1549 }
 0x69e   :  { %v1558_v28 = vmul.f32 0.032258064, %v1550_v40 }
 0x69f   :  { %v1553_v44 = vpop.xlane.xlu1 %1552 }
 0x6a0   :  { %v1562_v62 = vadd.f32 1e-06, %v1558_v28  ;;  %v1559_v63 = vmul.f32 0.032258064, %v1553_v44 }
 0x6a2   :  { %2022 = vrsqrt.f32 %v1562_v62  ;;  %v1563_v2 = vadd.f32 1e-06, %v1559_v63  ;;  %vm1574_vm6 = vcmp.eq.f32.partialorder %v1562_v62, inf  ;;  %v1577_v43 = vand.u32 2147483648, %v1562_v62 }
 0x6a3   :  { %v1556_v0 = vpop.xlane.xlu0 %1555  ;;  %v1547_v12 = vpop.xlane.xlu1 %1546  ;;  %vm1576_vm7 = vcmp.eq.f32.partialorder %v1562_v62, 0.0 }
 0x6a4   :  { %2024 = vrsqrt.f32 %v1563_v2  ;;  %v1560_v50 = vmul.f32 0.032258064, %v1556_v0  ;;  %v1557_v30 = vmul.f32 0.032258064, %v1547_v12  ;;  %vm1581_vm8 = vcmp.eq.f32.partialorder %v1563_v2, inf }
 0x6a5   :  { %v1584_v31 = vand.u32 2147483648, %v1563_v2  ;;  %vm1583_vm9 = vcmp.eq.f32.partialorder %v1563_v2, 0.0 }
 0x6a6   :  { %v1564_v61 = vadd.f32 1e-06, %v1560_v50  ;;  %v1561_v1 = vadd.f32 1e-06, %v1557_v30 }
 0x6a7   :  { %v1627_v49 = vpop.permute.xlu1 %1626 }
 0x6a8   :  { %2026 = vrsqrt.f32 %v1564_v61  ;;  %vm1588_vm10 = vcmp.eq.f32.partialorder %v1564_v61, inf  ;;  %v1591_v38 = vand.u32 2147483648, %v1564_v61  ;;  %vm1590_vm11 = vcmp.eq.f32.partialorder %v1564_v61, 0.0 }
 0x6a9   :  { %2028 = vrsqrt.f32 %v1561_v1  ;;  %vm1567_vm12 = vcmp.eq.f32.partialorder %v1561_v1, inf  ;;  %v1570_v37 = vand.u32 2147483648, %v1561_v1  ;;  %vm1569_vm13 = vcmp.eq.f32.partialorder %v1561_v1, 0.0 }
 0x6ab   :  { %v1631_v11 = vpop.permute.xlu0 %1630  ;;  %v1635_v33 = vpop.permute.xlu1 %1634 }
 0x6ac   :  { %v2023_v21 = vpop.eup %2022 }
 0x6ad   :  { %v1573_v58 = vmul.f32 %v2023_v21, %v1562_v62 }
 0x6ae   :  { %v2025_v57 = vpop.eup %2024 }
 0x6af   :  { %v1580_v16 = vmul.f32 %v2025_v57, %v1563_v2  ;;  %v1575_v29 = vsel %vm1574_vm6, %v1562_v62, %v1573_v58  ;;  %v1639_v35 = vpop.permute.xlu1 %1638 }
 0x6b0   :  { %v1578_v8 = vsel %vm1576_vm7, %v1577_v43, %v1575_v29 }
 0x6b1   :  { %v1582_v22 = vsel %vm1581_vm8, %v1563_v2, %v1580_v16  ;;  %v1594_v24 = vadd.f32 1e-06, %v1578_v8 }
 0x6b2   :  { %v2027_v26 = vpop.eup %2026  ;;  %v1585_v14 = vsel %vm1583_vm9, %v1584_v31, %v1582_v22 }
 0x6b3   :  { %v2029_v51 = vpop.eup %2028  ;;  %v1587_v5 = vmul.f32 %v2027_v26, %v1564_v61  ;;  %v1595_v6 = vadd.f32 1e-06, %v1585_v14  ;;  %2030 = vrcp.f32 %v1594_v24 }
 0x6b4   :  { %v1566_v10 = vmul.f32 %v2029_v51, %v1561_v1 }
 0x6b5   :  { %2032 = vrcp.f32 %v1595_v6  ;;  %v1589_v3 = vsel %vm1588_vm10, %v1564_v61, %v1587_v5 }
 0x6b6   :  { %v1568_v9 = vsel %vm1567_vm12, %v1561_v1, %v1566_v10  ;;  %v1592_v18 = vsel %vm1590_vm11, %v1591_v38, %v1589_v3 }
 0x6b7   :  { %v1571_v7 = vsel %vm1569_vm13, %v1570_v37, %v1568_v9  ;;  %v1596_v23 = vadd.f32 1e-06, %v1592_v18 }
 0x6b8   :  { %v1593_v25 = vadd.f32 1e-06, %v1571_v7 }
 0x6b9   :  { %2034 = vrcp.f32 %v1596_v23 }
 0x6ba   :  { %2036 = vrcp.f32 %v1593_v25 }
 0x6bd   :  { %v2031_v55 = vpop.eup %2030 }
 0x6be   :  { %v1612_v4 = vmul.f32 %v2031_v55, %v1608_v15 }
 0x6bf   :  { %v2033_v47 = vpop.eup %2032 }
 0x6c0   :  { %v1613_v48 = vmul.f32 %v2033_v47, %v1609_v52  ;;  %v1622_v19 = vadd.f32 %v1702_v56, %v1612_v4 }
 0x6c2   :  { %v1623_v53 = vadd.f32 %v1702_v56, %v1613_v48  ;;  %v1642_v54 = vmul.f32 %v1631_v11, %v1622_v19 }
 0x6c3   :  { %v2035_v46 = vpop.eup %2034 }
 0x6c4   :  { %v2037_v13 = vpop.eup %2036  ;;  %v1643_v41 = vmul.f32 %v1635_v33, %v1623_v53  ;;  %v1614_v36 = vmul.f32 %v2035_v46, %v1610_v59  ;;  %1646 = vst.msk [vmem:[%s2610_s11 + $0x8] sm:$0xff] %vm73_vm0, %v1642_v54 }
 0x6c5   :  { %v1611_v32 = vmul.f32 %v2037_v13, %v1607_v39 }
 0x6c6   :  { %1647 = vst.msk [vmem:[%s2610_s11 + $0x10] sm:$0xff] %vm73_vm0, %v1643_v41  ;;  %v1624_v34 = vadd.f32 %v1702_v56, %v1614_v36 }
 0x6c7   :  { %v1621_v27 = vadd.f32 %v1702_v56, %v1611_v32 }
 0x6c8   :  { %v1644_v45 = vmul.f32 %v1639_v35, %v1624_v34 }
 0x6c9   :  { %v1641_v60 = vmul.f32 %v1627_v49, %v1621_v27 }
 0x6ca   :  { %1648 = vst.msk [vmem:[%s2610_s11 + $0x18] sm:$0xff] %vm73_vm0, %v1644_v45 }
 0x6cb   :  { %1645 = vst.msk [vmem:[%s2610_s11] sm:$0xff] %vm73_vm0, %v1641_v60 }

// kernel: pema_forward.8
= control target key start
LH: loop header
LB: loop body
LE: loop exit
PB: predicated region body
PF: predicated region fallthrough
CT: control target
= control target key end

     0   :  { %vm70_vm0 = vcmask 261120   ;;  %s1424_s13 = smov 96   ;;  %s1425_s25 = smov 64   ;;  %s2049_s1 = inlined_call_operand.vmem [shape: bf16[32,128], index: 1, kind: input, shape index: {}]   ;;  %s2050_s0 = inlined_call_operand.vmem [shape: bf16[32,128], index: 0, kind: input, shape index: {}]   ;;  %s2051_s4 = inlined_call_operand.vmem [shape: bf16[32,32], index: 4, kind: input, shape index: {}]   ;;  %s2052_s5 = inlined_call_operand.vmem [shape: bf16[32,32], index: 5, kind: input, shape index: {}]   ;;  %s2053_s3 = inlined_call_operand.vmem [shape: bf16[32,32], index: 3, kind: input, shape index: {}]   ;;  %s2054_s2 = inlined_call_operand.vmem [shape: f32[32,32], index: 2, kind: input, shape index: {}]   ;;  %s2055_s6 = inlined_call_operand.vmem [shape: f32[1,32], index: 6, kind: input, shape index: {}]   ;;  %s2056_s7 = inlined_call_operand.vmem [shape: f32[1,32], index: 7, kind: input, shape index: {}]   ;;  %s2057_s8 = inlined_call_operand.vmem [shape: f32[1,32], index: 8, kind: input, shape index: {}]   ;;  %s2058_s9 = inlined_call_operand.vmem [shape: bf16[32,128], index: 9, kind: output, shape index: {}]  }
   0x1   :  { %v1350_v0 = vld [vmem:[%s2049_s1] sm:$0xff]   ;;  %v1352_v2 = vld [vmem:[%s2049_s1 + $0x8] sm:$0xff]   ;;  %v43_v11 = vld [vmem:[%s2054_s2 + $0x10] sm:$0xff]  ;;  %s1426_s15 = smov 32  }
   0x2   :  { %v1351_v1 = vld [vmem:[%s2050_s0] sm:$0xff]   ;;  %403 = vrot.lane.b32.xlu0 %v1350_v0, %s1424_s13  ;;  %1241 = vmatprep.mubr.msk.bf16.mxu1 %vm70_vm0, %v1350_v0  ;;  %v1353_v3 = vld [vmem:[%s2050_s0 + $0x8] sm:$0xff]   ;;  %v44_v13 = vld [vmem:[%s2054_s2 + $0x18] sm:$0xff] }
   0x3   :  { %462 = vrot.lane.b32.xlu1 %v1351_v1, %s1424_s13  ;;  %v1495_v4 = vld [vmem:[%s2051_s4] sm:$0xff]   ;;  %v1500_v5 = vld [vmem:[%s2051_s4 + $0x8] sm:$0xff]   ;;  %v46_v15 = vpack.c.bf16 %v44_v13, %v43_v11 }
   0x4   :  { %1237 = vmatprep.subr.bf16.mxu1 %v1495_v4  ;;  %v1356_v6 = vld [vmem:[%s2052_s5] sm:$0xff]   ;;  %v1358_v8 = vld [vmem:[%s2052_s5 + $0x8] sm:$0xff]  }
   0x5   :  { %1238 = vmatpush3.bf16.msra.mxu1 %v1495_v4  ;;  %v1512_v7 = vld [vmem:[%s2053_s3] sm:$0xff]   ;;  %1229 = vmatprep.subr.bf16.mxu0 %v1356_v6  ;;  %v42_v10 = vld [vmem:[%s2054_s2 + $0x8] sm:$0xff] }
   0x6   :  { %405 = vrot.lane.b32.xlu0 %v1352_v2, %s1424_s13  ;;  %1239 = vmatprep.subr.bf16.mxu1 %v1500_v5  ;;  %v41_v9 = vld [vmem:[%s2054_s2] sm:$0xff]  ;;  %v1359_v14 = vld [vmem:[%s2053_s3 + $0x8] sm:$0xff]  }
   0x7   :  { %464 = vrot.lane.b32.xlu1 %v1353_v3, %s1424_s13  ;;  %1230 = vmatpush3.bf16.msra.mxu0 %v1356_v6  ;;  %v45_v12 = vpack.c.bf16 %v42_v10, %v41_v9  ;;  %v1143_v32 = vld [vmem:[%s2055_s6] ss:$0 sm:$0xff] }
   0x8   :  { %1231 = vmatprep.subr.bf16.mxu0 %v1358_v8 }
   0x9   :  { %1240 = vmatpush3.bf16.msra.mxu1 %v1500_v5  ;;  %1233 = vmatprep.mubr.msk.bf16.mxu0 %vm70_vm0, %v45_v12 }
   0xa   :  { %621 = vrot.lane.b32.xlu0 %v1350_v0, %s1425_s25  ;;  %1245 = vmatprep.subr.bf16.mxu1 %v1512_v7 }
   0xb   :  { %623 = vrot.lane.b32.xlu1 %v1352_v2, %s1425_s25  ;;  %1232 = vmatpush3.bf16.msra.mxu0 %v1358_v8 }
   0xc   :  { %1242 = vmatmul.mubr.msk.bf16.vlgmr.msra.gmra.mrb[0].mxu1 %vm70_vm0, %v1352_v2  ;;  %1253 = vmatprep.subr.bf16.mxu0 %v1495_v4 }
   0xd   :  { %1246 = vmatpush3.bf16.msra.mxu1 %v1512_v7  ;;  %1249 = vmatprep.mubr.msk.bf16.mxu1 %vm70_vm0, %v1351_v1 }
   0xe   :  { %839 = vrot.lane.b32.xlu0 %v1350_v0, %s1426_s15  ;;  %1247 = vmatprep.subr.bf16.mxu1 %v1359_v14 }
   0xf   :  { %841 = vrot.lane.b32.xlu1 %v1352_v2, %s1426_s15  ;;  %1234 = vmatmul.mubr.msk.bf16.vlgmr.msra.gmra.mrb[0].mxu0 %vm70_vm0, %v46_v15 }
  0x10   :  { %1254 = vmatpush3.bf16.msra.mxu0 %v1495_v4 }
  0x11   :  { %1248 = vmatpush3.bf16.msra.mxu1 %v1359_v14  ;;  %1255 = vmatprep.subr.bf16.mxu0 %v1500_v5 }
  0x12   :  { %680 = vrot.lane.b32.xlu0 %v1351_v1, %s1425_s25  ;;  %1269 = vmatprep.subr.bf16.mxu1 %v1495_v4 }
  0x13   :  { %682 = vrot.lane.b32.xlu1 %v1353_v3, %s1425_s25 }
  0x14   :  { %1256 = vmatpush3.bf16.msra.mxu0 %v1500_v5 }
  0x15   :  { %1261 = vmatprep.subr.bf16.mxu0 %v1512_v7 }
  0x16   :  { %898 = vrot.lane.b32.xlu0 %v1351_v1, %s1426_s15 }
  0x17   :  { %900 = vrot.lane.b32.xlu1 %v1353_v3, %s1426_s15 }
  0x18   :  { %1250 = vmatmul.mubr.msk.bf16.vlgmr.msra.gmra.mrb[0].mxu1 %vm70_vm0, %v1353_v3 }
  0x19   :  { %1270 = vmatpush3.bf16.msra.mxu1 %v1495_v4 }
  0x1a   :  { %1271 = vmatprep.subr.bf16.mxu1 %v1500_v5 }
  0x1d   :  { %1272 = vmatpush3.bf16.msra.mxu1 %v1500_v5 }
  0x1e   :  { %1277 = vmatprep.subr.bf16.mxu1 %v1512_v7 }
  0x74   :  { %v404_v16 = vpop.permute.xlu0 %403 }
  0x75   :  { %1257 = vmatprep.mubr.msk.bf16.mxu0 %vm70_vm0, %v404_v16  ;;  %v463_v17 = vpop.permute.xlu1 %462 }
  0x78   :  { %v406_v18 = vpop.permute.xlu0 %405 }
  0x79   :  { %1258 = vmatmul.mubr.msk.bf16.vlgmr.msra.gmra.mrb[4].mxu0 %vm70_vm0, %v406_v18  ;;  %v465_v19 = vpop.permute.xlu1 %464 }
  0x7a   :  { %1262 = vmatpush3.bf16.msra.mxu0 %v1512_v7  ;;  %1265 = vmatprep.mubr.msk.bf16.mxu0 %vm70_vm0, %v463_v17 }
  0x7b   :  { %1263 = vmatprep.subr.bf16.mxu0 %v1359_v14 }
  0x7c   :  { %v622_v20 = vpop.permute.xlu0 %621 }
  0x7d   :  { %v624_v21 = vpop.permute.xlu1 %623  ;;  %1273 = vmatprep.mubr.msk.bf16.mxu1 %vm70_vm0, %v622_v20 }
  0x7e   :  { %1274 = vmatmul.mubr.msk.bf16.vlgmr.msra.gmra.mrb[4].mxu1 %vm70_vm0, %v624_v21  ;;  %1264 = vmatpush3.bf16.msra.mxu0 %v1359_v14 }
  0x7f   :  { %1278 = vmatpush3.bf16.msra.mxu1 %v1512_v7  ;;  %1285 = vmatprep.subr.bf16.mxu0 %v1495_v4 }
  0x80   :  { %v840_v22 = vpop.permute.xlu0 %839  ;;  %1279 = vmatprep.subr.bf16.mxu1 %v1359_v14 }
  0x81   :  { %v842_v23 = vpop.permute.xlu1 %841 }
  0x83   :  { %1280 = vmatpush3.bf16.msra.mxu1 %v1359_v14 }
  0x84   :  { %v681_v24 = vpop.permute.xlu0 %680 }
  0x85   :  { %1266 = vmatmul.mubr.msk.bf16.vlgmr.msra.gmra.mrb[4].mxu0 %vm70_vm0, %v465_v19  ;;  %1281 = vmatprep.mubr.msk.bf16.mxu1 %vm70_vm0, %v681_v24  ;;  %v683_v25 = vpop.permute.xlu1 %682 }
  0x86   :  { %1286 = vmatpush3.bf16.msra.mxu0 %v1495_v4  ;;  %1289 = vmatprep.mubr.msk.bf16.mxu0 %vm70_vm0, %v840_v22 }
  0x87   :  { %1287 = vmatprep.subr.bf16.mxu0 %v1500_v5 }
  0x88   :  { %v899_v26 = vpop.permute.xlu0 %898 }
  0x89   :  { %v901_v27 = vpop.permute.xlu1 %900 }
  0x8a   :  { %1282 = vmatmul.mubr.msk.bf16.vlgmr.msra.gmra.mrb[4].mxu1 %vm70_vm0, %v683_v25  ;;  %1288 = vmatpush3.bf16.msra.mxu0 %v1500_v5 }
  0x8b   :  { %1293 = vmatprep.subr.bf16.mxu0 %v1512_v7 }
  0x8d   :  { %1290 = vmatmul.mubr.msk.bf16.vlgmr.msra.gmra.mrb[8].mxu0 %vm70_vm0, %v842_v23 }
  0x8e   :  { %1294 = vmatpush3.bf16.msra.mxu0 %v1512_v7  ;;  %1297 = vmatprep.mubr.msk.bf16.mxu0 %vm70_vm0, %v899_v26 }
  0x8f   :  { %1295 = vmatprep.subr.bf16.mxu0 %v1359_v14 }
  0x92   :  { %1296 = vmatpush3.bf16.msra.mxu0 %v1359_v14 }
  0x99   :  { %1298 = vmatmul.mubr.msk.bf16.vlgmr.msra.gmra.mrb[8].mxu0 %vm70_vm0, %v901_v27 }
  0xe2   :  { %v1235_v28 = vpop.f32.mrb[0].mxu0 }
  0xe3   :  { %v111_v29 = vpop.f32.mrb[1].mxu0  ;;  %v120_v33 = vadd.f32 %v1235_v28, %v1143_v32 }
  0xe4   :  { %v1236_v30 = vpop.f32.mrb[2].mxu0  ;;  %v112_v34 = vadd.f32 %v1143_v32, %v111_v29 }
  0xe5   :  { %v114_v31 = vpop.f32.mrb[3].mxu0  ;;  %v123_v35 = vadd.f32 %v1236_v30, %v1143_v32 }
  0xe6   :  { %v115_v37 = vadd.f32 %v1143_v32, %v114_v31 }
  0xeb   :  { %v1251_v36 = vpop.f32.mrb[0].mxu1 }
  0xec   :  { %v1582_v38 = vadd.f32 %v1251_v36, %v120_v33  ;;  %v273_v39 = vpop.f32.mrb[1].mxu1 }
  0xed   :  { %v1584_v40 = vadd.f32 %v273_v39, %v112_v34  ;;  %v1252_v41 = vpop.f32.mrb[2].mxu1 }
  0xee   :  { %v1586_v42 = vadd.f32 %v1252_v41, %v123_v35  ;;  %v276_v43 = vpop.f32.mrb[3].mxu1  ;;  %v294_v31 = vmax.f32 %v1582_v38, 0.0 }
  0xef   :  { %v1588_v44 = vadd.f32 %v276_v43, %v115_v37  ;;  %v292_v27 = vmax.f32 %v1584_v40, 0.0 }
  0xf1   :  { %v293_v29 = vmax.f32 %v1588_v44, 0.0  ;;  %v298_v32 = vsel %vm70_vm0, %v292_v27, 0.0 }
 0x158   :  { %v1267_v45 = vpop.f32.mrb[4].mxu0 }
 0x159   :  { %v1590_v46 = vadd.f32 %v1267_v45, %v120_v33  ;;  %v506_v47 = vpop.f32.mrb[5].mxu0 }
 0x15a   :  { %v1592_v48 = vadd.f32 %v506_v47, %v112_v34  ;;  %v1268_v49 = vpop.f32.mrb[6].mxu0 }
 0x15b   :  { %v527_v50 = vmax.f32 %v1590_v46, 0.0  ;;  %v1595_v51 = vadd.f32 %v1268_v49, %v123_v35  ;;  %v509_v52 = vpop.f32.mrb[7].mxu0 }
 0x15c   :  { %v1597_v53 = vadd.f32 %v509_v52, %v115_v37  ;;  %v525_v54 = vmax.f32 %v1592_v48, 0.0 }
 0x15d   :  { %v1283_v55 = vpop.f32.mrb[4].mxu1  ;;  %v535_v56 = vsel %vm70_vm0, %v527_v50, 0.0  ;;  %v528_v0 = vmax.f32 %v1595_v51, 0.0 }
 0x15e   :  { %v1603_v57 = vadd.f32 %v1283_v55, %v120_v33  ;;  %536 = vadd.xlane.f32.xlu0 %v535_v56  ;;  %v724_v58 = vpop.f32.mrb[5].mxu1  ;;  %v529_v2 = vsel %vm70_vm0, %v525_v54, 0.0  ;;  %v526_v7 = vmax.f32 %v1597_v53, 0.0 }
 0x15f   :  { %v1605_v59 = vadd.f32 %v724_v58, %v112_v34  ;;  %v1284_v60 = vpop.f32.mrb[6].mxu1  ;;  %v538_v6 = vsel %vm70_vm0, %v528_v0, 0.0 }
 0x160   :  { %v745_v61 = vmax.f32 %v1603_v57, 0.0  ;;  %v1608_v62 = vadd.f32 %v1284_v60, %v123_v35  ;;  %v727_v63 = vpop.f32.mrb[7].mxu1  ;;  %v532_v11 = vsel %vm70_vm0, %v526_v7, 0.0 }
 0x161   :  { %v1611_v1 = vadd.f32 %v727_v63, %v115_v37  ;;  %v743_v3 = vmax.f32 %v1605_v59, 0.0 }
 0x162   :  { %530 = vadd.xlane.f32.xlu0 %v529_v2  ;;  %v753_v4 = vsel %vm70_vm0, %v745_v61, 0.0  ;;  %v746_v5 = vmax.f32 %v1608_v62, 0.0 }
 0x163   :  { %754 = vadd.xlane.f32.xlu1 %v753_v4  ;;  %v747_v8 = vsel %vm70_vm0, %v743_v3, 0.0  ;;  %v744_v9 = vmax.f32 %v1611_v1, 0.0 }
 0x164   :  { %v756_v10 = vsel %vm70_vm0, %v746_v5, 0.0 }
 0x165   :  { %v750_v15 = vsel %vm70_vm0, %v744_v9, 0.0 }
 0x166   :  { %539 = vadd.xlane.f32.xlu0 %v538_v6 }
 0x167   :  { %748 = vadd.xlane.f32.xlu1 %v747_v8 }
 0x16a   :  { %757 = vadd.xlane.f32.xlu0 %v756_v10 }
 0x16b   :  { %533 = vadd.xlane.f32.xlu1 %v532_v11 }
 0x16c   :  { %v1299_v12 = vpop.f32.mrb[8].mxu0 }
 0x16d   :  { %v1635_v13 = vadd.f32 %v1299_v12, %v120_v33  ;;  %v942_v14 = vpop.f32.mrb[9].mxu0  ;;  %v295_v33 = vmax.f32 %v1586_v42, 0.0 }
 0x16e   :  { %v1640_v16 = vadd.f32 %v942_v14, %v112_v34  ;;  %v1300_v17 = vpop.f32.mrb[10].mxu0  ;;  %751 = vadd.xlane.f32.xlu0 %v750_v15  ;;  %v301_v34 = vsel %vm70_vm0, %v293_v29, 0.0 }
 0x16f   :  { %v1642_v18 = vadd.f32 %v1300_v17, %v123_v35  ;;  %v945_v19 = vpop.f32.mrb[11].mxu0  ;;  %v963_v22 = vmax.f32 %v1635_v13, 0.0  ;;  %v304_v35 = vsel %vm70_vm0, %v294_v31, 0.0  ;;  %v307_v36 = vsel %vm70_vm0, %v295_v33, 0.0 }
 0x170   :  { %v961_v20 = vmax.f32 %v1640_v16, 0.0  ;;  %v1645_v21 = vadd.f32 %v945_v19, %v115_v37 }
 0x171   :  { %v964_v25 = vmax.f32 %v1642_v18, 0.0  ;;  %v971_v28 = vsel %vm70_vm0, %v963_v22, 0.0  ;;  %v1764_v18 = vld [vmem:[%s2056_s7] ss:$0 sm:$0xff] }
 0x172   :  { %v962_v23 = vmax.f32 %v1645_v21, 0.0  ;;  %v965_v24 = vsel %vm70_vm0, %v961_v20, 0.0 }
 0x173   :  { %966 = vadd.xlane.f32.xlu1 %v965_v24  ;;  %v974_v30 = vsel %vm70_vm0, %v964_v25, 0.0 }
 0x174   :  { %v968_v26 = vsel %vm70_vm0, %v962_v23, 0.0 }
 0x175   :  { %969 = vadd.xlane.f32.xlu0 %v968_v26 }
 0x177   :  { %972 = vadd.xlane.f32.xlu1 %v971_v28 }
 0x179   :  { %975 = vadd.xlane.f32.xlu0 %v974_v30 }
 0x17b   :  { %299 = vadd.xlane.f32.xlu1 %v298_v32 }
 0x17d   :  { %302 = vadd.xlane.f32.xlu0 %v301_v34 }
 0x17f   :  { %305 = vadd.xlane.f32.xlu1 %v304_v35 }
 0x181   :  { %308 = vadd.xlane.f32.xlu0 %v307_v36 }
 0x1eb   :  { %v537_v37 = vpop.xlane.xlu0 %536 }
 0x1ec   :  { %v543_v39 = vmul.f32 0.03125, %v537_v37 }
 0x1ee   :  { %v1680_v41 = vsub.f32 %v527_v50, %v543_v39 }
 0x1ef   :  { %v531_v43 = vpop.xlane.xlu0 %530 }
 0x1f0   :  { %v541_v45 = vmul.f32 0.03125, %v531_v43  ;;  %v755_v47 = vpop.xlane.xlu1 %754  ;;  %v551_v49 = vmul.f32 %v1680_v41, %v1680_v41 }
 0x1f1   :  { %v761_v52 = vmul.f32 0.03125, %v755_v47 }
 0x1f2   :  { %v559_v55 = vsel %vm70_vm0, %v551_v49, 0.0  ;;  %v1687_v56 = vsub.f32 %v525_v54, %v541_v45 }
 0x1f3   :  { %v1691_v58 = vsub.f32 %v745_v61, %v761_v52  ;;  %v540_v46 = vpop.xlane.xlu0 %539  ;;  %560 = vadd.xlane.f32.xlu1 %v559_v55 }
 0x1f4   :  { %v544_v50 = vmul.f32 0.03125, %v540_v46  ;;  %v749_v60 = vpop.xlane.xlu1 %748  ;;  %v549_v61 = vmul.f32 %v1687_v56, %v1687_v56 }
 0x1f5   :  { %v759_v63 = vmul.f32 0.03125, %v749_v60  ;;  %v769_v2 = vmul.f32 %v1691_v58, %v1691_v58 }
 0x1f6   :  { %v1697_v4 = vsub.f32 %v528_v0, %v544_v50  ;;  %v553_v12 = vsel %vm70_vm0, %v549_v61, 0.0 }
 0x1f7   :  { %v1701_v48 = vsub.f32 %v743_v3, %v759_v63  ;;  %v758_v54 = vpop.xlane.xlu0 %757  ;;  %v777_v57 = vsel %vm70_vm0, %v769_v2, 0.0 }
 0x1f8   :  { %v762_v6 = vmul.f32 0.03125, %v758_v54  ;;  %778 = vadd.xlane.f32.xlu1 %v777_v57  ;;  %v534_v8 = vpop.xlane.xlu1 %533  ;;  %v552_v10 = vmul.f32 %v1697_v4, %v1697_v4 }
 0x1f9   :  { %v542_v11 = vmul.f32 0.03125, %v534_v8  ;;  %v767_v14 = vmul.f32 %v1701_v48, %v1701_v48 }
 0x1fa   :  { %v1710_v51 = vsub.f32 %v746_v5, %v762_v6  ;;  %v562_v59 = vsel %vm70_vm0, %v552_v10, 0.0 }
 0x1fb   :  { %v1715_v0 = vsub.f32 %v526_v7, %v542_v11  ;;  %v752_v3 = vpop.xlane.xlu0 %751  ;;  %563 = vadd.xlane.f32.xlu0 %v562_v59  ;;  %v771_v17 = vsel %vm70_vm0, %v767_v14, 0.0 }
 0x1fc   :  { %v760_v15 = vmul.f32 0.03125, %v752_v3  ;;  %554 = vadd.xlane.f32.xlu1 %v553_v12  ;;  %v770_v62 = vmul.f32 %v1710_v51, %v1710_v51 }
 0x1fd   :  { %v550_v7 = vmul.f32 %v1715_v0, %v1715_v0 }
 0x1fe   :  { %v1724_v5 = vsub.f32 %v744_v9, %v760_v15  ;;  %v780_v53 = vsel %vm70_vm0, %v770_v62, 0.0 }
 0x1ff   :  { %781 = vadd.xlane.f32.xlu0 %v780_v53  ;;  %v556_v28 = vsel %vm70_vm0, %v550_v7, 0.0 }
 0x200   :  { %772 = vadd.xlane.f32.xlu1 %v771_v17  ;;  %v967_v19 = vpop.xlane.xlu1 %966  ;;  %v768_v30 = vmul.f32 %v1724_v5, %v1724_v5 }
 0x201   :  { %v977_v24 = vmul.f32 0.03125, %v967_v19 }
 0x202   :  { %v970_v26 = vpop.xlane.xlu0 %969  ;;  %v774_v39 = vsel %vm70_vm0, %v768_v30, 0.0 }
 0x203   :  { %v1735_v1 = vsub.f32 %v961_v20, %v977_v24  ;;  %v978_v9 = vmul.f32 0.03125, %v970_v26  ;;  %557 = vadd.xlane.f32.xlu0 %v556_v28 }
 0x204   :  { %v973_v32 = vpop.xlane.xlu1 %972 }
 0x205   :  { %v1739_v34 = vsub.f32 %v962_v23, %v978_v9  ;;  %v979_v35 = vmul.f32 0.03125, %v973_v32  ;;  %v985_v36 = vmul.f32 %v1735_v1, %v1735_v1 }
 0x206   :  { %v976_v37 = vpop.xlane.xlu0 %975 }
 0x207   :  { %v1746_v43 = vsub.f32 %v963_v22, %v979_v35  ;;  %v980_v16 = vmul.f32 0.03125, %v976_v37  ;;  %775 = vadd.xlane.f32.xlu0 %v774_v39  ;;  %v989_v20 = vsel %vm70_vm0, %v985_v36, 0.0  ;;  %v986_v21 = vmul.f32 %v1739_v34, %v1739_v34 }
 0x208   :  { %990 = vadd.xlane.f32.xlu1 %v989_v20  ;;  %v300_v45 = vpop.xlane.xlu1 %299 }
 0x209   :  { %v1753_v23 = vsub.f32 %v964_v25, %v980_v16  ;;  %v311_v47 = vmul.f32 0.03125, %v300_v45  ;;  %v987_v49 = vmul.f32 %v1746_v43, %v1746_v43  ;;  %v992_v22 = vsel %vm70_vm0, %v986_v21, 0.0 }
 0x20a   :  { %v303_v13 = vpop.xlane.xlu0 %302 }
 0x20b   :  { %v315_v52 = vsub.f32 %v292_v27, %v311_v47  ;;  %v312_v55 = vmul.f32 0.03125, %v303_v13  ;;  %993 = vadd.xlane.f32.xlu0 %v992_v22  ;;  %v995_v46 = vsel %vm70_vm0, %v987_v49, 0.0  ;;  %v988_v50 = vmul.f32 %v1753_v23, %v1753_v23 }
 0x20c   :  { %996 = vadd.xlane.f32.xlu1 %v995_v46  ;;  %v306_v25 = vpop.xlane.xlu1 %305 }
 0x20d   :  { %v1769_v60 = vmul.f32 %v1764_v18, %v315_v52  ;;  %v316_v40 = vsub.f32 %v293_v29, %v312_v55  ;;  %v313_v27 = vmul.f32 0.03125, %v306_v25  ;;  %v319_v63 = vmul.f32 %v315_v52, %v315_v52 }
 0x20e   :  { %v309_v2 = vpop.xlane.xlu0 %308  ;;  %v998_v54 = vsel %vm70_vm0, %v988_v50, 0.0  ;;  %v1807_v50 = vmul.f32 %v1764_v18, %v1680_v41 }
 0x20f   :  { %v1775_v57 = vmul.f32 %v1764_v18, %v316_v40  ;;  %v317_v61 = vsub.f32 %v294_v31, %v313_v27  ;;  %v314_v6 = vmul.f32 0.03125, %v309_v2  ;;  %999 = vadd.xlane.f32.xlu0 %v998_v54  ;;  %v323_v8 = vsel %vm70_vm0, %v319_v63, 0.0 }
 0x210   :  { %324 = vadd.xlane.f32.xlu1 %v323_v8  ;;  %v320_v10 = vmul.f32 %v316_v40, %v316_v40  ;;  %v1811_v2 = vmul.f32 %v1764_v18, %v1687_v56  ;;  %v1815_v54 = vmul.f32 %v1764_v18, %v1691_v58  ;;  %v1826_v58 = vmul.f32 %v1764_v18, %v1697_v4 }
 0x211   :  { %v1781_v44 = vmul.f32 %v1764_v18, %v317_v61  ;;  %v318_v29 = vsub.f32 %v295_v33, %v314_v6  ;;  %v321_v11 = vmul.f32 %v317_v61, %v317_v61 }
 0x212   :  { %v326_v59 = vsel %vm70_vm0, %v320_v10, 0.0 }
 0x213   :  { %v1787_v3 = vmul.f32 %v1764_v18, %v318_v29  ;;  %327 = vadd.xlane.f32.xlu0 %v326_v59  ;;  %v329_v38 = vsel %vm70_vm0, %v321_v11, 0.0  ;;  %v322_v31 = vmul.f32 %v318_v29, %v318_v29 }
 0x214   :  { %330 = vadd.xlane.f32.xlu1 %v329_v38 }
 0x215   :  { %v332_v12 = vsel %vm70_vm0, %v322_v31, 0.0  ;;  %v1832_v31 = vmul.f32 %v1764_v18, %v1710_v51 }
 0x217   :  { %333 = vadd.xlane.f32.xlu0 %v332_v12 }
 0x280   :  { %v561_v14 = vpop.xlane.xlu1 %560 }
 0x281   :  { %v567_v15 = vmul.f32 0.032258064, %v561_v14 }
 0x283   :  { %v571_v62 = vadd.f32 1e-06, %v567_v15 }
 0x285   :  { %1360 = vrsqrt.f32 %v571_v62  ;;  %v779_v42 = vpop.xlane.xlu1 %778  ;;  %vm589_vm1 = vcmp.eq.f32.partialorder %v571_v62, inf  ;;  %v592_v47 = vand.u32 2147483648, %v571_v62  ;;  %vm591_vm2 = vcmp.eq.f32.partialorder %v571_v62, 0.0 }
 0x286   :  { %v785_v33 = vmul.f32 0.032258064, %v779_v42 }
 0x288   :  { %v789_v53 = vadd.f32 1e-06, %v785_v33  ;;  %v564_v7 = vpop.xlane.xlu0 %563 }
 0x289   :  { %v568_v17 = vmul.f32 0.032258064, %v564_v7  ;;  %v555_v19 = vpop.xlane.xlu1 %554 }
 0x28a   :  { %1362 = vrsqrt.f32 %v789_v53  ;;  %v565_v26 = vmul.f32 0.032258064, %v555_v19  ;;  %vm807_vm3 = vcmp.eq.f32.partialorder %v789_v53, inf  ;;  %v810_v6 = vand.u32 2147483648, %v789_v53 }
 0x28b   :  { %v1791_v24 = vadd.f32 1e-06, %v568_v17  ;;  %vm809_vm4 = vcmp.eq.f32.partialorder %v789_v53, 0.0 }
 0x28c   :  { %v782_v28 = vpop.xlane.xlu0 %781  ;;  %v1794_v9 = vadd.f32 1e-06, %v565_v26 }
 0x28d   :  { %1364 = vrsqrt.f32 %v1791_v24  ;;  %v773_v30 = vpop.xlane.xlu1 %772  ;;  %v786_v32 = vmul.f32 0.032258064, %v782_v28  ;;  %vm596_vm5 = vcmp.eq.f32.partialorder %v1791_v24, inf  ;;  %vm598_vm6 = vcmp.eq.f32.partialorder %v1791_v24, 0.0 }
 0x28e   :  { %v783_v35 = vmul.f32 0.032258064, %v773_v30  ;;  %1366 = vrsqrt.f32 %v1794_v9  ;;  %v599_v12 = vand.u32 2147483648, %v1791_v24  ;;  %vm575_vm7 = vcmp.eq.f32.partialorder %v1794_v9, inf }
 0x28f   :  { %v1361_v36 = vpop.eup %1360  ;;  %v1796_v16 = vadd.f32 1e-06, %v786_v32  ;;  %v578_v4 = vand.u32 2147483648, %v1794_v9  ;;  %vm577_vm12 = vcmp.eq.f32.partialorder %v1794_v9, 0.0 }
 0x290   :  { %v588_v37 = vmul.f32 %v1361_v36, %v571_v62  ;;  %v558_v39 = vpop.xlane.xlu0 %557  ;;  %v1798_v20 = vadd.f32 1e-06, %v783_v35 }
 0x291   :  { %v566_v21 = vmul.f32 0.032258064, %v558_v39  ;;  %1368 = vrsqrt.f32 %v1796_v16  ;;  %vm814_vm8 = vcmp.eq.f32.partialorder %v1796_v16, inf  ;;  %vm816_vm9 = vcmp.eq.f32.partialorder %v1796_v16, 0.0 }
 0x292   :  { %v590_v45 = vsel %vm589_vm1, %v571_v62, %v588_v37  ;;  %1370 = vrsqrt.f32 %v1798_v20  ;;  %vm793_vm10 = vcmp.eq.f32.partialorder %v1798_v20, inf  ;;  %v796_v28 = vand.u32 2147483648, %v1798_v20 }
 0x293   :  { %v1803_v52 = vadd.f32 1e-06, %v566_v21  ;;  %v593_v25 = vsel %vm591_vm2, %v592_v47, %v590_v45  ;;  %vm795_vm1 = vcmp.eq.f32.partialorder %v1798_v20, 0.0 }
 0x294   :  { %v1363_v49 = vpop.eup %1362  ;;  %v776_v13 = vpop.xlane.xlu0 %775  ;;  %v603_v27 = vadd.f32 1e-06, %v593_v25 }
 0x295   :  { %v806_v22 = vmul.f32 %v1363_v49, %v789_v53  ;;  %v784_v55 = vmul.f32 0.032258064, %v776_v13  ;;  %v991_v46 = vpop.xlane.xlu1 %990  ;;  %1372 = vrsqrt.f32 %v1803_v52  ;;  %vm582_vm11 = vcmp.eq.f32.partialorder %v1803_v52, inf }
 0x296   :  { %v1001_v40 = vmul.f32 0.032258064, %v991_v46  ;;  %1374 = vrcp.f32 %v603_v27  ;;  %v585_v47 = vand.u32 2147483648, %v1803_v52  ;;  %vm584_vm13 = vcmp.eq.f32.partialorder %v1803_v52, 0.0 }
 0x297   :  { %v1365_v63 = vpop.eup %1364  ;;  %v808_v61 = vsel %vm807_vm3, %v789_v53, %v806_v22  ;;  %v1819_v41 = vadd.f32 1e-06, %v784_v55 }
 0x298   :  { %v595_v8 = vmul.f32 %v1365_v63, %v1791_v24  ;;  %v1821_v10 = vadd.f32 1e-06, %v1001_v40  ;;  %v994_v29 = vpop.xlane.xlu0 %993  ;;  %v811_v38 = vsel %vm809_vm4, %v810_v6, %v808_v61  ;;  %v1367_v14 = vpop.eup %1366 }
 0x299   :  { %v1002_v56 = vmul.f32 0.032258064, %v994_v29  ;;  %v997_v11 = vpop.xlane.xlu1 %996  ;;  %1376 = vrsqrt.f32 %v1819_v41  ;;  %v821_v17 = vadd.f32 1e-06, %v811_v38  ;;  %v574_v26 = vmul.f32 %v1367_v14, %v1794_v9 }
 0x29a   :  { %v597_v59 = vsel %vm596_vm5, %v1791_v24, %v595_v8  ;;  %1378 = vrsqrt.f32 %v1821_v10  ;;  %v1003_v62 = vmul.f32 0.032258064, %v997_v11  ;;  %v817_v24 = vand.u32 2147483648, %v1796_v16 }
 0x29b   :  { %v1839_v15 = vadd.f32 1e-06, %v1002_v56  ;;  %v1369_v33 = vpop.eup %1368  ;;  %v600_v7 = vsel %vm598_vm6, %v599_v12, %v597_v59  ;;  %vm800_vm14 = vcmp.eq.f32.partialorder %v1819_v41, inf  ;;  %v803_v13 = vand.u32 2147483648, %v1819_v41 }
 0x29c   :  { %v1000_v42 = vpop.xlane.xlu0 %999  ;;  %v1371_v19 = vpop.eup %1370  ;;  %v1848_v30 = vadd.f32 1e-06, %v1003_v62  ;;  %v813_v35 = vmul.f32 %v1369_v33, %v1796_v16  ;;  %v604_v39 = vadd.f32 1e-06, %v600_v7  ;;  %vm1011_vm15 = vcmp.eq.f32.partialorder %v1821_v10, inf }
 0x29d   :  { %v1004_v51 = vmul.f32 0.032258064, %v1000_v42  ;;  %v325_v53 = vpop.xlane.xlu1 %324  ;;  %1380 = vrsqrt.f32 %v1839_v15  ;;  %v792_v21 = vmul.f32 %v1371_v19, %v1798_v20  ;;  %v576_v55 = vsel %vm575_vm7, %v1794_v9, %v574_v26 }
 0x29e   :  { %v335_v36 = vmul.f32 0.032258064, %v325_v53  ;;  %1382 = vrcp.f32 %v821_v17  ;;  %v1014_v46 = vand.u32 2147483648, %v1821_v10  ;;  %v815_v63 = vsel %vm814_vm8, %v1796_v16, %v813_v35 }
 0x29f   :  { %v1850_v32 = vadd.f32 1e-06, %v1004_v51  ;;  %v1373_v45 = vpop.eup %1372  ;;  %1384 = vrsqrt.f32 %v1848_v30  ;;  %v794_v56 = vsel %vm793_vm10, %v1798_v20, %v792_v21  ;;  %vm1018_vm2 = vcmp.eq.f32.partialorder %v1839_v15, inf }
 0x2a0   :  { %v328_v37 = vpop.xlane.xlu0 %327  ;;  %v1375_v22 = vpop.eup %1374  ;;  %v1867_v25 = vadd.f32 1e-06, %v335_v36  ;;  %v581_v61 = vmul.f32 %v1373_v45, %v1803_v52  ;;  %v1021_v11 = vand.u32 2147483648, %v1839_v15  ;;  %vm802_vm3 = vcmp.eq.f32.partialorder %v1819_v41, 0.0 }
 0x2a1   :  { %v331_v49 = vpop.xlane.xlu1 %330  ;;  %1386 = vrsqrt.f32 %v1850_v32  ;;  %v336_v40 = vmul.f32 0.032258064, %v328_v37  ;;  %vm1025_vm4 = vcmp.eq.f32.partialorder %v1848_v30, inf  ;;  %vm1013_vm5 = vcmp.eq.f32.partialorder %v1821_v10, 0.0 }
 0x2a2   :  { %v337_v6 = vmul.f32 0.032258064, %v331_v49  ;;  %1388 = vrcp.f32 %v604_v39  ;;  %v615_v42 = vmul.f32 %v1375_v22, %v1807_v50  ;;  %v818_v33 = vsel %vm816_vm9, %v817_v24, %v815_v63  ;;  %v1902_v50 = vld [vmem:[%s2057_s8] ss:$0 sm:$0xff] }
 0x2a3   :  { %v1377_v27 = vpop.eup %1376  ;;  %1390 = vrsqrt.f32 %v1867_v25  ;;  %v1883_v38 = vadd.f32 1e-06, %v336_v40  ;;  %v583_v53 = vsel %vm582_vm11, %v1803_v52, %v581_v61  ;;  %vm1020_vm6 = vcmp.eq.f32.partialorder %v1839_v15, 0.0 }
 0x2a4   :  { %v334_v8 = vpop.xlane.xlu0 %333  ;;  %v1379_v29 = vpop.eup %1378  ;;  %v799_v59 = vmul.f32 %v1377_v27, %v1819_v41  ;;  %v1885_v12 = vadd.f32 1e-06, %v337_v6  ;;  %v1028_v7 = vand.u32 2147483648, %v1848_v30  ;;  %vm1032_vm7 = vcmp.eq.f32.partialorder %v1850_v32, inf }
 0x2a5   :  { %v1010_v14 = vmul.f32 %v1379_v29, %v1821_v10  ;;  %v338_v62 = vmul.f32 0.032258064, %v334_v8  ;;  %1392 = vrsqrt.f32 %v1883_v38  ;;  %vm1027_vm8 = vcmp.eq.f32.partialorder %v1848_v30, 0.0 }
 0x2a6   :  { %v1035_v17 = vand.u32 2147483648, %v1850_v32  ;;  %vm345_vm9 = vcmp.eq.f32.partialorder %v1867_v25, inf  ;;  %1394 = vrsqrt.f32 %v1885_v12  ;;  %v801_v24 = vsel %vm800_vm14, %v1819_v41, %v799_v59 }
 0x2a7   :  { %v1381_v51 = vpop.eup %1380  ;;  %vm347_vm10 = vcmp.eq.f32.partialorder %v1867_v25, 0.0  ;;  %v348_v26 = vand.u32 2147483648, %v1867_v25  ;;  %v1914_v35 = vadd.f32 1e-06, %v338_v62  ;;  %v822_v36 = vadd.f32 1e-06, %v818_v33 }
 0x2a8   :  { %v1017_v16 = vmul.f32 %v1381_v51, %v1839_v15  ;;  %v1383_v19 = vpop.eup %1382  ;;  %v1012_v39 = vsel %vm1011_vm15, %v1821_v10, %v1010_v14  ;;  %vm1034_vm11 = vcmp.eq.f32.partialorder %v1850_v32, 0.0  ;;  %v619_v45 = vadd.f32 %v1902_v50, %v615_v42 }
 0x2a9   :  { %v1385_v37 = vpop.eup %1384  ;;  %v579_v21 = vsel %vm577_vm12, %v578_v4, %v576_v55  ;;  %v586_v49 = vsel %vm584_vm13, %v585_v47, %v583_v53  ;;  %vm352_vm14 = vcmp.eq.f32.partialorder %v1883_v38, inf  ;;  %v355_v27 = vand.u32 2147483648, %v1883_v38 }
 0x2aa   :  { %v1024_v40 = vmul.f32 %v1385_v37, %v1848_v30  ;;  %v362_v63 = vand.u32 2147483648, %v1885_v12  ;;  %1396 = vrsqrt.f32 %v1914_v35  ;;  %v1019_v61 = vsel %vm1018_vm2, %v1839_v15, %v1017_v16 }
 0x2ab   :  { %v1387_v22 = vpop.eup %1386  ;;  %vm354_vm12 = vcmp.eq.f32.partialorder %v1883_v38, 0.0  ;;  %vm359_vm13 = vcmp.eq.f32.partialorder %v1885_v12, inf  ;;  %1398 = vrcp.f32 %v822_v36  ;;  %v833_v52 = vmul.f32 %v1383_v19, %v1815_v54 }
 0x2ac   :  { %v1031_v9 = vmul.f32 %v1387_v22, %v1850_v32  ;;  %v1389_v4 = vpop.eup %1388  ;;  %v1026_v47 = vsel %vm1025_vm4, %v1848_v30, %v1024_v40  ;;  %vm361_vm15 = vcmp.eq.f32.partialorder %v1885_v12, 0.0  ;;  %v601_v55 = vadd.f32 1e-06, %v579_v21 }
 0x2ad   :  { %v602_v6 = vadd.f32 1e-06, %v586_v49  ;;  %v797_v8 = vsel %vm795_vm1, %v796_v28, %v794_v56  ;;  %v1391_v29 = vpop.eup %1390  ;;  %v616_v54 = vmul.f32 %v1389_v4, %v1826_v58  ;;  %v804_v14 = vsel %vm802_vm3, %v803_v13, %v801_v24 }
 0x2ae   :  { %v1033_v59 = vsel %vm1032_vm7, %v1850_v32, %v1031_v9  ;;  %v819_v62 = vadd.f32 1e-06, %v797_v8  ;;  %v344_v42 = vmul.f32 %v1391_v29, %v1867_v25  ;;  %1400 = vrcp.f32 %v601_v55 }
 0x2af   :  { %v820_v33 = vadd.f32 1e-06, %v804_v14  ;;  %v1015_v20 = vsel %vm1013_vm5, %v1014_v46, %v1012_v39  ;;  %v620_v28 = vadd.f32 %v1902_v50, %v616_v54  ;;  %1402 = vrcp.f32 %v602_v6  ;;  %v1393_v13 = vpop.eup %1392 }
 0x2b0   :  { %v1022_v58 = vsel %vm1020_vm6, %v1021_v11, %v1019_v61  ;;  %v1037_v41 = vadd.f32 1e-06, %v1015_v20  ;;  %v346_v56 = vsel %vm345_vm9, %v1867_v25, %v344_v42  ;;  %1404 = vrcp.f32 %v819_v62  ;;  %v1395_v46 = vpop.eup %1394 }
 0x2b1   :  { %v1038_v51 = vadd.f32 1e-06, %v1022_v58  ;;  %v1029_v10 = vsel %vm1027_vm8, %v1028_v7, %v1026_v47  ;;  %v349_v53 = vsel %vm347_vm10, %v348_v26, %v346_v56  ;;  %v351_v16 = vmul.f32 %v1393_v13, %v1883_v38 }
 0x2b2   :  { %v1320_v19 = vpack.i.bf16 %v620_v28, %v619_v45  ;;  %1406 = vrcp.f32 %v820_v33  ;;  %v371_v15 = vadd.f32 1e-06, %v349_v53  ;;  %v358_v11 = vmul.f32 %v1395_v46, %v1885_v12 }
 0x2b3   :  { %1408 = vrcp.f32 %v1037_v41  ;;  %v1036_v24 = vsel %vm1034_vm11, %v1035_v17, %v1033_v59  ;;  %v353_v30 = vsel %vm352_vm14, %v1883_v38, %v351_v16  ;;  %v1039_v25 = vadd.f32 1e-06, %v1029_v10 }
 0x2b4   :  { %1321 = vrot.lane.b32.xlu0 %v1320_v19, %s1426_s15  ;;  %1410 = vrcp.f32 %v1038_v51  ;;  %v1040_v7 = vadd.f32 1e-06, %v1036_v24  ;;  %v1397_v26 = vpop.eup %1396  ;;  %v356_v36 = vsel %vm354_vm12, %v355_v27, %v353_v30  ;;  %v360_v37 = vsel %vm359_vm13, %v1885_v12, %v358_v11 }
 0x2b5   :  { %1412 = vrcp.f32 %v371_v15  ;;  %vm366_vm1 = vcmp.eq.f32.partialorder %v1914_v35, inf  ;;  %v1399_v32 = vpop.eup %1398  ;;  %v372_v17 = vadd.f32 1e-06, %v356_v36  ;;  %v363_v39 = vsel %vm361_vm15, %v362_v63, %v360_v37 }
 0x2b6   :  { %v365_v45 = vmul.f32 %v1397_v26, %v1914_v35  ;;  %1414 = vrcp.f32 %v1039_v25  ;;  %v373_v21 = vadd.f32 1e-06, %v363_v39  ;;  %v369_v49 = vand.u32 2147483648, %v1914_v35 }
 0x2b7   :  { %v834_v38 = vmul.f32 %v1399_v32, %v1832_v31  ;;  %1416 = vrcp.f32 %v1040_v7  ;;  %v610_v22 = vmul.f32 %v1764_v18, %v1715_v0  ;;  %vm368_vm2 = vcmp.eq.f32.partialorder %v1914_v35, 0.0 }
 0x2b8   :  { %1418 = vrcp.f32 %v372_v17  ;;  %v367_v40 = vsel %vm366_vm1, %v1914_v35, %v365_v45  ;;  %v1401_v27 = vpop.eup %1400  ;;  %v837_v63 = vadd.f32 %v1902_v50, %v833_v52  ;;  %v827_v31 = vmul.f32 %v1764_v18, %v1701_v48 }
 0x2b9   :  { %1420 = vrcp.f32 %v373_v21  ;;  %v370_v12 = vsel %vm368_vm2, %v369_v49, %v367_v40  ;;  %v838_v61 = vadd.f32 %v1902_v50, %v834_v38  ;;  %v1403_v9 = vpop.eup %1402  ;;  %v613_v47 = vmul.f32 %v1401_v27, %v1811_v2 }
 0x2ba   :  { %v374_v4 = vadd.f32 1e-06, %v370_v12  ;;  %v1405_v0 = vpop.eup %1404  ;;  %v828_v55 = vmul.f32 %v1764_v18, %v1724_v5  ;;  %v614_v35 = vmul.f32 %v1403_v9, %v610_v22  ;;  %v1045_v29 = vmul.f32 %v1764_v18, %v1735_v1 }
 0x2bb   :  { %v1325_v6 = vpack.i.bf16 %v838_v61, %v837_v63  ;;  %v831_v52 = vmul.f32 %v1405_v0, %v827_v31  ;;  %v1046_v54 = vmul.f32 %v1764_v18, %v1739_v34  ;;  %v617_v48 = vadd.f32 %v1902_v50, %v613_v47 }
 0x2bc   :  { %v1407_v8 = vpop.eup %1406  ;;  %1422 = vrcp.f32 %v374_v4  ;;  %v618_v2 = vadd.f32 %v1902_v50, %v614_v35  ;;  %v1047_v62 = vmul.f32 %v1764_v18, %v1746_v43  ;;  %v1048_v41 = vmul.f32 %v1764_v18, %v1753_v23 }
 0x2bd   :  { %v1409_v59 = vpop.eup %1408  ;;  %1326 = vrot.lane.b32.xlu1 %v1325_v6, %s1425_s25  ;;  %v832_v14 = vmul.f32 %v1407_v8, %v828_v55  ;;  %v835_v20 = vadd.f32 %v1902_v50, %v831_v52  ;;  %vm1109_vm3 = vcmask 523264   ;;  %vm1114_vm4 = vcmask 785408  }
 0x2be   :  { %v1411_v5 = vpop.eup %1410  ;;  %v1049_v42 = vmul.f32 %v1409_v59, %v1045_v29  ;;  %v1330_v1 = vpack.i.bf16 %v618_v2, %v617_v48 }
 0x2bf   :  { %v1413_v33 = vpop.eup %1412  ;;  %v836_v28 = vadd.f32 %v1902_v50, %v832_v14  ;;  %v1050_v58 = vmul.f32 %v1411_v5, %v1046_v54 }
 0x2c0   :  { %v1415_v34 = vpop.eup %1414  ;;  %v389_v13 = vmul.f32 %v1413_v33, %v1769_v60  ;;  %v1053_v43 = vadd.f32 %v1902_v50, %v1049_v42 }
 0x2c1   :  { %v1417_v56 = vpop.eup %1416  ;;  %1331 = vrot.lane.b32.xlu1 %v1330_v1, %s1426_s15  ;;  %v1335_v51 = vpack.i.bf16 %v836_v28, %v835_v20  ;;  %v1054_v10 = vadd.f32 %v1902_v50, %v1050_v58  ;;  %v1051_v46 = vmul.f32 %v1415_v34, %v1047_v62 }
 0x2c2   :  { %v1419_v53 = vpop.eup %1418  ;;  %v1052_v16 = vmul.f32 %v1417_v56, %v1048_v41  ;;  %v399_v19 = vadd.f32 %v1902_v50, %v389_v13 }
 0x2c3   :  { %v1421_v15 = vpop.eup %1420  ;;  %v1340_v11 = vpack.i.bf16 %v1054_v10, %v1053_v43  ;;  %v390_v24 = vmul.f32 %v1419_v53, %v1775_v57  ;;  %v1055_v23 = vadd.f32 %v1902_v50, %v1051_v46 }
 0x2c4   :  { %v1056_v18 = vadd.f32 %v1902_v50, %v1052_v16  ;;  %v391_v60 = vmul.f32 %v1421_v15, %v1781_v44 }
 0x2c5   :  { %1336 = vrot.lane.b32.xlu1 %v1335_v51, %s1425_s25  ;;  %1341 = vrot.lane.b32.xlu0 %v1340_v11, %s1424_s13  ;;  %v400_v30 = vadd.f32 %v1902_v50, %v390_v24 }
 0x2c6   :  { %v1423_v25 = vpop.eup %1422  ;;  %v1345_v7 = vpack.i.bf16 %v1056_v18, %v1055_v23  ;;  %v401_v26 = vadd.f32 %v1902_v50, %v391_v60 }
 0x2c7   :  { %v392_v36 = vmul.f32 %v1423_v25, %v1787_v3 }
 0x2c9   :  { %1346 = vrot.lane.b32.xlu1 %v1345_v7, %s1424_s13  ;;  %v402_v57 = vadd.f32 %v1902_v50, %v392_v36 }
 0x326   :  { %v1322_v32 = vpop.permute.xlu0 %1321 }
 0x327   :  { %v1324_v45 = vunpack.i.h.bf16 %v1322_v32  ;;  %v1323_v21 = vunpack.i.l.bf16 %v1322_v32 }
 0x329   :  { %v1108_v4 = vsel %vm70_vm0, %v402_v57, %v1324_v45  ;;  %v1107_v6 = vsel %vm70_vm0, %v401_v26, %v1323_v21 }
 0x32f   :  { %v1327_v37 = vpop.permute.xlu1 %1326 }
 0x330   :  { %v1329_v3 = vunpack.i.h.bf16 %v1327_v37  ;;  %v1328_v63 = vunpack.i.l.bf16 %v1327_v37 }
 0x332   :  { %v1112_v52 = vsel %vm1109_vm3, %v1107_v6, %v1328_v63  ;;  %v1113_v59 = vsel %vm1109_vm3, %v1108_v4, %v1329_v3 }
 0x333   :  { %v1332_v17 = vpop.permute.xlu1 %1331 }
 0x334   :  { %v1334_v44 = vunpack.i.h.bf16 %v1332_v17  ;;  %v1333_v39 = vunpack.i.l.bf16 %v1332_v17 }
 0x336   :  { %v1105_v61 = vsel %vm70_vm0, %v399_v19, %v1333_v39  ;;  %v1106_v50 = vsel %vm70_vm0, %v400_v30, %v1334_v44 }
 0x337   :  { %v1337_v49 = vpop.permute.xlu1 %1336  ;;  %v1342_v38 = vpop.permute.xlu0 %1341 }
 0x338   :  { %v1339_v22 = vunpack.i.h.bf16 %v1337_v49  ;;  %v1338_v40 = vunpack.i.l.bf16 %v1337_v49  ;;  %v1344_v27 = vunpack.i.h.bf16 %v1342_v38  ;;  %v1343_v12 = vunpack.i.l.bf16 %v1342_v38 }
 0x33a   :  { %v1110_v9 = vsel %vm1109_vm3, %v1105_v61, %v1338_v40  ;;  %v1111_v31 = vsel %vm1109_vm3, %v1106_v50, %v1339_v22 }
 0x33b   :  { %v1116_v47 = vsel %vm1114_vm4, %v1111_v31, %v1344_v27  ;;  %v1115_v0 = vsel %vm1114_vm4, %v1110_v9, %v1343_v12  ;;  %v1347_v55 = vpop.permute.xlu1 %1346 }
 0x33c   :  { %v1185_v35 = vpack.c.bf16 %v1116_v47, %v1115_v0  ;;  %v1349_v8 = vunpack.i.h.bf16 %v1347_v55  ;;  %v1348_v29 = vunpack.i.l.bf16 %v1347_v55 }
 0x33e   :  { %1186 = vst [vmem:[%s2058_s9] sm:$0xff] %v1185_v35   ;;  %v1117_v54 = vsel %vm1114_vm4, %v1112_v52, %v1348_v29  ;;  %v1118_v48 = vsel %vm1114_vm4, %v1113_v59, %v1349_v8 }
 0x33f   :  { %v1190_v2 = vpack.c.bf16 %v1118_v48, %v1117_v54 }
 0x341   :  { %1192 = vst [vmem:[%s2058_s9 + $0x8] sm:$0xff] %v1190_v2  }

// kernel: pema_forward.9
= control target key start
LH: loop header
LB: loop body
LE: loop exit
PB: predicated region body
PF: predicated region fallthrough
CT: control target
= control target key end

     0   :  { %vm74_vm0 = vcmask 261120   ;;  %s2086_s25 = smov 96   ;;  %v2087_v9 = vmov 1   ;;  %v2088_v12 = vmov 4   ;;  %s2642_s0 = inlined_call_operand.vmem [shape: f32[32,32], index: 0, kind: input, shape index: {}]   ;;  %s2643_s1 = inlined_call_operand.vmem [shape: bf16[32,128], index: 1, kind: input, shape index: {}]   ;;  %s2644_s2 = inlined_call_operand.vmem [shape: bf16[32,128], index: 2, kind: input, shape index: {}]   ;;  %s2645_s3 = inlined_call_operand.vmem [shape: f32[32,5], index: 3, kind: input, shape index: {}]   ;;  %s2646_s4 = inlined_call_operand.vmem [shape: bf16[32,32], index: 4, kind: input, shape index: {}]   ;;  %s2647_s5 = inlined_call_operand.vmem [shape: bf16[32,64], index: 5, kind: input, shape index: {}]   ;;  %s2648_s6 = inlined_call_operand.vmem [shape: bf16[32,64], index: 6, kind: input, shape index: {}]   ;;  %s2649_s7 = inlined_call_operand.vmem [shape: bf16[32,32], index: 7, kind: input, shape index: {}]   ;;  %s2650_s8 = inlined_call_operand.vmem [shape: f32[32,32], index: 8, kind: input, shape index: {}]   ;;  %s2651_s9 = inlined_call_operand.vmem [shape: f32[1,32], index: 9, kind: input, shape index: {}]   ;;  %s2652_s10 = inlined_call_operand.vmem [shape: f32[1,32], index: 10, kind: input, shape index: {}]   ;;  %s2653_s11 = inlined_call_operand.hbm [shape: f32[32,32], index: 11, kind: output, shape index: {}]  }
   0x1   :  { %v1986_v0 = vld [vmem:[%s2646_s4] sm:$0xff]   ;;  %v1989_v3 = vld [vmem:[%s2646_s4 + $0x8] sm:$0xff]   ;;  %v42_v8 = vld [vmem:[%s2642_s0 + $0x10] sm:$0xff]  ;;  %1967 = vset.pattern.permute.xlu1 %v2087_v9  ;;  %1973 = vset.pattern.permute.xlu0 %v2088_v12 }
   0x2   :  { %v2163_v1 = vld [vmem:[%s2647_s5] sm:$0xff]   ;;  %1788 = vmatprep.subr.bf16.mxu0 %v1986_v0  ;;  %v2177_v4 = vld [vmem:[%s2647_s5 + $0x8] sm:$0xff]   ;;  %v43_v11 = vld [vmem:[%s2642_s0 + $0x18] sm:$0xff] }
   0x3   :  { %v1988_v2 = vld [vmem:[%s2643_s1] sm:$0xff]   ;;  %1796 = vmatprep.subr.bf16.mxu1 %v2163_v1  ;;  %1789 = vmatpush3.bf16.msra.mxu0 %v1986_v0  ;;  %v1991_v5 = vld [vmem:[%s2643_s1 + $0x8] sm:$0xff]   ;;  %v57_v13 = vpack.c.bf16 %v43_v11, %v42_v8 }
   0x4   :  { %433 = vrot.lane.b32.xlu0 %v1988_v2, %s2086_s25  ;;  %1797 = vmatpush3.bf16.msra.mxu1 %v2163_v1  ;;  %v40_v6 = vld [vmem:[%s2642_s0] sm:$0xff]  ;;  %v41_v7 = vld [vmem:[%s2642_s0 + $0x8] sm:$0xff] }
   0x5   :  { %1790 = vmatprep.subr.bf16.mxu0 %v1989_v3  ;;  %1800 = vmatprep.mubr.msk.bf16.mxu1 %vm74_vm0, %v1988_v2  ;;  %v56_v10 = vpack.c.bf16 %v41_v7, %v40_v6  ;;  %v2203_v14 = vld [vmem:[%s2648_s6] sm:$0xff]   ;;  %v2209_v15 = vld [vmem:[%s2648_s6 + $0x8] sm:$0xff]   ;;  %s2089_s6 = smov 64  }
   0x6   :  { %1798 = vmatprep.subr.bf16.mxu1 %v2177_v4  ;;  %v1994_v16 = vld [vmem:[%s2644_s2] sm:$0xff]   ;;  %v1995_v17 = vld [vmem:[%s2644_s2 + $0x8] sm:$0xff]  }
   0x7   :  { %1791 = vmatpush3.bf16.msra.mxu0 %v1989_v3  ;;  %1792 = vmatprep.mubr.msk.bf16.mxu0 %vm74_vm0, %v56_v10 }
   0x8   :  { %435 = vrot.lane.b32.xlu0 %v1991_v5, %s2086_s25  ;;  %1799 = vmatpush3.bf16.msra.mxu1 %v2177_v4 }
   0x9   :  { %1804 = vmatprep.subr.bf16.mxu0 %v2203_v14  ;;  %492 = vrot.lane.b32.xlu1 %v1994_v16, %s2086_s25 }
   0xa   :  { %1793 = vmatmul.mubr.msk.bf16.vlgmr.msra.gmra.mrb[0].mxu0 %vm74_vm0, %v57_v13 }
   0xb   :  { %1801 = vmatmul.mubr.msk.bf16.vlgmr.msra.gmra.mrb[0].mxu1 %vm74_vm0, %v1991_v5  ;;  %1805 = vmatpush3.bf16.msra.mxu0 %v2203_v14 }
   0xc   :  { %1806 = vmatprep.subr.bf16.mxu0 %v2209_v15  ;;  %1808 = vmatprep.mubr.msk.bf16.mxu0 %vm74_vm0, %v1994_v16 }
   0xd   :  { %680 = vrot.lane.b32.xlu0 %v1988_v2, %s2089_s6 }
   0xf   :  { %1807 = vmatpush3.bf16.msra.mxu0 %v2209_v15 }
  0x10   :  { %16 = vsyncpa [#allocation3], 0  ;;  %1826 = vmatprep.subr.bf16.mxu0 %v2163_v1  ;;  %494 = vrot.lane.b32.xlu1 %v1995_v17, %s2086_s25  ;;  %s2090_s24 = smov 32   ;;  %v2233_v18 = vld [vmem:[%s2645_s3 + $0x8] sm:$0xff]  ;;  %v2240_v19 = vld [vmem:[%s2645_s3] sm:$0xff]  ;;  %v2091_v20 = vmov 0  }
  0x11   :  { %739 = vrot.lane.b32.xlu0 %v1994_v16, %s2089_s6  ;;  %vm402_vm1 = vcmp.gt.f32.partialorder %v2233_v18, 0.0  ;;  %vm401_vm2 = vcmp.gt.f32.partialorder %v2240_v19, 0.0  ;;  %v2249_v23 = vld [vmem:[%s2645_s3 + $0x10] sm:$0xff]  ;;  %v2092_v24 = vmov 2   ;;  %v55_v25 = vld [vmem:[%s2645_s3 + $0x18] sm:$0xff]  ;;  %v2093_v28 = vmov 3  }
  0x12   :  { %1809 = vmatmul.mubr.msk.bf16.vlgmr.msra.gmra.mrb[4].mxu0 %vm74_vm0, %v1995_v17  ;;  %v406_v21 = vsel %vm402_vm1, 1, %v2091_v20  ;;  %v405_v22 = vsel %vm401_vm2, 1, %v2091_v20  ;;  %vm403_vm3 = vcmp.gt.f32.partialorder %v2249_v23, 0.0  ;;  %vm404_vm4 = vcmp.gt.f32.partialorder %v55_v25, 0.0  ;;  %v300_v29 = vld [vmem:[%s2650_s8] sm:$0xff]  ;;  %v301_v30 = vld [vmem:[%s2650_s8 + $0x8] sm:$0xff] }
  0x13   :  { %1827 = vmatpush3.bf16.msra.mxu0 %v2163_v1  ;;  %v407_v26 = vsel %vm403_vm3, 1, %v2091_v20  ;;  %v408_v27 = vsel %vm404_vm4, 1, %v2091_v20  ;;  %v2277_v31 = vpack.c.bf16 %v301_v30, %v300_v29  ;;  %v302_v32 = vld [vmem:[%s2650_s8 + $0x10] sm:$0xff]  ;;  %v303_v33 = vld [vmem:[%s2650_s8 + $0x18] sm:$0xff] }
  0x14   :  { %1828 = vmatprep.subr.bf16.mxu0 %v2177_v4  ;;  %682 = vrot.lane.b32.xlu1 %v1991_v5, %s2089_s6  ;;  %v2287_v34 = vpack.c.bf16 %v303_v33, %v302_v32 }
  0x15   :  { %927 = vrot.lane.b32.xlu0 %v1988_v2, %s2090_s24  ;;  %1925 = vmatprep.subr.bf16.mxu1 %v2277_v31 }
  0x16   :  { %1927 = vmatpush3.bf16.msra.mxu1 %v2277_v31 }
  0x17   :  { %1829 = vmatpush3.bf16.msra.mxu0 %v2177_v4  ;;  %1929 = vmatprep.subr.bf16.mxu1 %v2287_v34 }
  0x18   :  { %741 = vrot.lane.b32.xlu1 %v1995_v17, %s2089_s6  ;;  %1933 = vmatprep.subr.bf16.mxu0 %v2277_v31 }
  0x19   :  { %986 = vrot.lane.b32.xlu0 %v1994_v16, %s2090_s24 }
  0x1a   :  { %1931 = vmatpush3.bf16.msra.mxu1 %v2287_v34 }
  0x1b   :  { %1834 = vmatprep.subr.bf16.mxu1 %v2203_v14 }
  0x1c   :  { %929 = vrot.lane.b32.xlu1 %v1991_v5, %s2090_s24 }
  0x1d   :  { %1154 = vperm.xlu0 %1973, %v406_v21  }
  0x20   :  { %988 = vrot.lane.b32.xlu1 %v1995_v17, %s2090_s24 }
  0x21   :  { %1974 = vset.pattern.permute.xlu0 %v2087_v9 }
  0x22   :  { %410 = vperm.xlu0 %1974, %v405_v22  }
  0x24   :  { %413 = vperm.xlu1 %1967, %v406_v21  }
  0x26   :  { %1252 = vperm.xlu0 %1974, %v2240_v19  }
  0x28   :  { %1968 = vset.pattern.permute.xlu1 %v2092_v24 }
  0x29   :  { %657 = vperm.xlu1 %1968, %v405_v22  }
  0x2a   :  { %1975 = vset.pattern.permute.xlu0 %v2092_v24 }
  0x2b   :  { %660 = vperm.xlu0 %1975, %v406_v21  }
  0x2d   :  { %1969 = vset.pattern.permute.xlu1 %v2087_v9 }
  0x2e   :  { %416 = vperm.xlu1 %1969, %v407_v26  }
  0x2f   :  { %663 = vperm.xlu0 %1975, %v407_v26  }
  0x32   :  { %419 = vperm.xlu1 %1969, %v408_v27  }
  0x33   :  { %1303 = vperm.xlu0 %1975, %v2233_v18  }
  0x36   :  { %1970 = vset.pattern.permute.xlu1 %v2092_v24 }
  0x37   :  { %1307 = vperm.xlu0 %1975, %v2249_v23   ;;  %666 = vperm.xlu1 %1970, %v408_v27  }
  0x3b   :  { %1979 = vset.pattern.permute.xlu0 %v2093_v28  ;;  %1971 = vset.pattern.permute.xlu1 %v2093_v28 }
  0x3c   :  { %904 = vperm.xlu0 %1979, %v405_v22   ;;  %907 = vperm.xlu1 %1971, %v406_v21  }
  0x40   :  { %913 = vperm.xlu0 %1979, %v408_v27   ;;  %910 = vperm.xlu1 %1971, %v407_v26  }
  0x44   :  { %1347 = vperm.xlu0 %1979, %v2240_v19   ;;  %1972 = vset.pattern.permute.xlu1 %v2088_v12 }
  0x45   :  { %1151 = vperm.xlu1 %1972, %v405_v22  }
  0x48   :  { %1359 = vperm.xlu0 %1979, %v55_v25  }
  0x49   :  { %1157 = vperm.xlu1 %1972, %v407_v26  }
  0x4c   :  { %1983 = vset.pattern.permute.xlu0 %v2088_v12 }
  0x4d   :  { %1399 = vperm.xlu0 %1983, %v2233_v18   ;;  %1160 = vperm.xlu1 %1972, %v408_v27  }
  0x51   :  { %1985 = vset.pattern.permute.xlu0 %v2091_v20  ;;  %1976 = vset.pattern.permute.xlu1 %v2087_v9 }
  0x52   :  { %1257 = vperm.xlu1 %1976, %v2233_v18  }
  0x56   :  { %1977 = vset.pattern.permute.xlu1 %v2092_v24 }
  0x57   :  { %1299 = vperm.xlu1 %1977, %v2240_v19  }
  0x5b   :  { %1978 = vset.pattern.permute.xlu1 %v2087_v9 }
  0x5c   :  { %1262 = vperm.xlu1 %1978, %v2249_v23  }
  0x60   :  { %1267 = vperm.xlu1 %1978, %v55_v25  }
  0x64   :  { %1980 = vset.pattern.permute.xlu1 %v2092_v24 }
  0x65   :  { %1311 = vperm.xlu1 %1980, %v55_v25  }
  0x69   :  { %1981 = vset.pattern.permute.xlu1 %v2093_v28 }
  0x6a   :  { %1351 = vperm.xlu1 %1981, %v2233_v18  }
  0x6e   :  { %1355 = vperm.xlu1 %1981, %v2249_v23  }
  0x72   :  { %1982 = vset.pattern.permute.xlu1 %v2088_v12 }
  0x73   :  { %1395 = vperm.xlu1 %1982, %v2240_v19  }
  0x76   :  { %v434_v35 = vpop.permute.xlu0 %433 }
  0x77   :  { %1830 = vmatprep.mubr.msk.bf16.mxu0 %vm74_vm0, %v434_v35  ;;  %1403 = vperm.xlu1 %1982, %v2249_v23  }
  0x7a   :  { %v436_v36 = vpop.permute.xlu0 %435 }
  0x7b   :  { %1831 = vmatmul.mubr.msk.bf16.vlgmr.msra.gmra.mrb[8].mxu0 %vm74_vm0, %v436_v36  ;;  %1407 = vperm.xlu1 %1982, %v55_v25   ;;  %v493_v61 = vpop.permute.xlu1 %492 }
  0x7c   :  { %1935 = vmatpush3.bf16.msra.mxu0 %v2277_v31 }
  0x7d   :  { %1937 = vmatprep.subr.bf16.mxu0 %v2287_v34 }
  0x7f   :  { %1984 = vset.pattern.permute.xlu1 %v2091_v20  ;;  %v681_v63 = vpop.permute.xlu0 %680 }
  0x80   :  { %1939 = vmatpush3.bf16.msra.mxu0 %v2287_v34 }
  0x81   :  { %1864 = vmatprep.subr.bf16.mxu0 %v2203_v14 }
  0x82   :  { %v495_v62 = vpop.permute.xlu1 %494 }
  0x83   :  { %v740_v30 = vpop.permute.xlu0 %739 }
  0x86   :  { %v683_v0 = vpop.permute.xlu1 %682 }
  0xdd   :  { %v2305_v37 = vpop.f32.mrb[0].mxu0 }
  0xde   :  { %v1802_v38 = vpop.f32.mrb[0].mxu1  ;;  %v2307_v39 = vpop.f32.mrb[1].mxu0 }
  0xdf   :  { %v294_v40 = vmul.f32 %v1802_v38, %v2305_v37  ;;  %v196_v41 = vpop.f32.mrb[1].mxu1  ;;  %v2310_v42 = vpop.f32.mrb[2].mxu0 }
  0xe0   :  { %v292_v43 = vmul.f32 %v196_v41, %v2307_v39  ;;  %v1803_v44 = vpop.f32.mrb[2].mxu1  ;;  %v2313_v45 = vpop.f32.mrb[3].mxu0 }
  0xe1   :  { %v295_v46 = vmul.f32 %v1803_v44, %v2310_v42  ;;  %v199_v47 = vpop.f32.mrb[3].mxu1 }
  0xe2   :  { %v293_v48 = vmul.f32 %v199_v47, %v2313_v45 }
  0xe5   :  { %v1810_v49 = vpop.f32.mrb[4].mxu0 }
  0xe6   :  { %v298_v50 = vmul.f32 %v1810_v49, %v294_v40  ;;  %v431_v51 = vadd.f32 %v1810_v49, %v1802_v38  ;;  %v277_v52 = vpop.f32.mrb[5].mxu0 }
  0xe7   :  { %v296_v53 = vmul.f32 %v292_v43, %v277_v52  ;;  %v429_v54 = vadd.f32 %v277_v52, %v196_v41  ;;  %v1811_v55 = vpop.f32.mrb[6].mxu0  ;;  %v742_v43 = vpop.permute.xlu1 %741 }
  0xe8   :  { %v299_v56 = vmul.f32 %v1811_v55, %v295_v46  ;;  %v432_v57 = vadd.f32 %v1811_v55, %v1803_v44  ;;  %1286 = vrot.lane.b32.xlu0 %v431_v51, %s2086_s25  ;;  %v280_v58 = vpop.f32.mrb[7].mxu0  ;;  %v928_v44 = vpop.permute.xlu0 %927 }
  0xe9   :  { %v297_v59 = vmul.f32 %v293_v48, %v280_v58  ;;  %v430_v60 = vadd.f32 %v280_v58, %v199_v47  ;;  %1820 = vmatprep.mubr.msk.f32.mxu1 %vm74_vm0, %v296_v53 }
  0xea   :  { %1288 = vrot.lane.b32.xlu1 %v432_v57, %s2086_s25 }
  0xeb   :  { %1821 = vmatmul.mubr.msk.f32.vlgmr.msra.gmra.mrb[4].mxu1 %vm74_vm0, %v297_v59  ;;  %v930_v46 = vpop.permute.xlu1 %929 }
  0xec   :  { %1282 = vrot.lane.b32.xlu0 %v429_v54, %s2086_s25  ;;  %1823 = vmatprep.mubr.msk.f32.mxu1 %vm74_vm0, %v298_v50 }
  0xed   :  { %1835 = vmatpush3.bf16.msra.mxu1 %v2203_v14 }
  0xee   :  { %1284 = vrot.lane.b32.xlu1 %v430_v60, %s2086_s25  ;;  %1836 = vmatprep.subr.bf16.mxu1 %v2209_v15 }
  0xef   :  { %1824 = vmatmul.mubr.msk.f32.gmra.mrb[6].mxu1 %vm74_vm0, %v299_v56  ;;  %v2396_v47 = vpop.permute.xlu1 %988 }
  0xf0   :  { %1838 = vmatprep.mubr.msk.bf16.mxu1 %vm74_vm0, %v493_v61 }
  0xf1   :  { %1837 = vmatpush3.bf16.msra.mxu1 %v2209_v15 }
  0xf2   :  { %1856 = vmatprep.subr.bf16.mxu1 %v2163_v1 }
  0xf3   :  { %v414_v48 = vpop.permute.xlu1 %413 }
  0xf4   :  { %1839 = vmatmul.mubr.msk.bf16.vlgmr.msra.gmra.mrb[8].mxu1 %vm74_vm0, %v495_v62  ;;  %vm422_vm5 = vcmp.eq.s32.totalorder %v414_v48, 1 }
  0xf5   :  { %1857 = vmatpush3.bf16.msra.mxu1 %v2163_v1  ;;  %1860 = vmatprep.mubr.msk.bf16.mxu1 %vm74_vm0, %v681_v63 }
  0xf6   :  { %1858 = vmatprep.subr.bf16.mxu1 %v2177_v4 }
  0xf7   :  { %v658_v50 = vpop.permute.xlu1 %657 }
  0xf8   :  { %vm668_vm7 = vcmp.eq.s32.totalorder %v658_v50, 1 }
  0xf9   :  { %1859 = vmatpush3.bf16.msra.mxu1 %v2177_v4 }
  0xfa   :  { %1941 = vmatprep.subr.bf16.mxu1 %v2277_v31 }
  0xfb   :  { %v417_v51 = vpop.permute.xlu1 %416 }
  0xfc   :  { %1861 = vmatmul.mubr.msk.bf16.vlgmr.msra.gmra.mrb[12].mxu1 %vm74_vm0, %v683_v0  ;;  %vm423_vm11 = vcmp.eq.s32.totalorder %v417_v51, 1 }
  0xfd   :  { %1943 = vmatpush3.bf16.msra.mxu1 %v2277_v31 }
  0xfe   :  { %1945 = vmatprep.subr.bf16.mxu1 %v2287_v34 }
  0xff   :  { %v420_v53 = vpop.permute.xlu1 %419 }
 0x100   :  { %vm424_vm9 = vcmp.eq.s32.totalorder %v420_v53, 1 }
 0x101   :  { %1947 = vmatpush3.bf16.msra.mxu1 %v2287_v34 }
 0x102   :  { %1894 = vmatprep.subr.bf16.mxu1 %v2203_v14 }
 0x14e   :  { %v1832_v2 = vpop.f32.mrb[8].mxu0 }
 0x14f   :  { %v553_v3 = vmul.f32 %v1832_v2, %v2305_v37  ;;  %v477_v5 = vpop.f32.mrb[9].mxu0 }
 0x150   :  { %v551_v6 = vmul.f32 %v477_v5, %v2307_v39  ;;  %v1833_v7 = vpop.f32.mrb[10].mxu0 }
 0x151   :  { %v554_v8 = vmul.f32 %v1833_v7, %v2310_v42  ;;  %v480_v9 = vpop.f32.mrb[11].mxu0 }
 0x152   :  { %v552_v10 = vmul.f32 %v480_v9, %v2313_v45 }
 0x1be   :  { %v2345_v11 = vpop.f32.mrb[4].mxu1 }
 0x1bf   :  { %v2347_v12 = vpop.f32.mrb[5].mxu1  ;;  %v2405_v55 = vsel %vm422_vm5, %v2345_v11, -3.4028235e+38 }
 0x1c2   :  { %v2349_v13 = vpop.f32.mrb[6].mxu1 }
 0x1c3   :  { %v2351_v16 = vpop.f32.mrb[7].mxu1  ;;  %v2419_v0 = vsel %vm424_vm9, %v2349_v13, -3.4028235e+38 }
 0x1c7   :  { %v1840_v17 = vpop.f32.mrb[8].mxu1 }
 0x1c8   :  { %v557_v18 = vmul.f32 %v1840_v17, %v553_v3  ;;  %v678_v19 = vadd.f32 %v1840_v17, %v1832_v2  ;;  %v536_v20 = vpop.f32.mrb[9].mxu1 }
 0x1c9   :  { %v555_v21 = vmul.f32 %v551_v6, %v536_v20  ;;  %v676_v22 = vadd.f32 %v536_v20, %v477_v5  ;;  %v1841_v23 = vpop.f32.mrb[10].mxu1  ;;  %v2424_v5 = vsel %vm423_vm11, %v2351_v16, -3.4028235e+38 }
 0x1ca   :  { %v558_v24 = vmul.f32 %v1841_v23, %v554_v8  ;;  %v679_v25 = vadd.f32 %v1841_v23, %v1833_v7  ;;  %1330 = vrot.lane.b32.xlu0 %v678_v19, %s2086_s25  ;;  %v539_v26 = vpop.f32.mrb[11].mxu1 }
 0x1cb   :  { %v556_v27 = vmul.f32 %v552_v10, %v539_v26  ;;  %v677_v28 = vadd.f32 %v539_v26, %v480_v9  ;;  %1850 = vmatprep.mubr.msk.f32.mxu0 %vm74_vm0, %v555_v21 }
 0x1cc   :  { %1332 = vrot.lane.b32.xlu1 %v679_v25, %s2086_s25 }
 0x1cd   :  { %1851 = vmatmul.mubr.msk.f32.vlgmr.msra.gmra.mrb[12].mxu0 %vm74_vm0, %v556_v27 }
 0x1ce   :  { %1326 = vrot.lane.b32.xlu0 %v676_v22, %s2086_s25  ;;  %1853 = vmatprep.mubr.msk.f32.mxu0 %vm74_vm0, %v557_v18 }
 0x1cf   :  { %1865 = vmatpush3.bf16.msra.mxu0 %v2203_v14  ;;  %v2360_v29 = vpop.f32.mrb[12].mxu1 }
 0x1d0   :  { %v2364_v32 = vmul.f32 %v2360_v29, %v2305_v37  ;;  %v2366_v33 = vpop.f32.mrb[13].mxu1  ;;  %1328 = vrot.lane.b32.xlu1 %v677_v28, %s2086_s25  ;;  %1866 = vmatprep.subr.bf16.mxu0 %v2209_v15 }
 0x1d1   :  { %v798_v35 = vmul.f32 %v2366_v33, %v2307_v39  ;;  %1854 = vmatmul.mubr.msk.f32.gmra.mrb[14].mxu0 %vm74_vm0, %v558_v24  ;;  %v2373_v36 = vpop.f32.mrb[14].mxu1 }
 0x1d2   :  { %v801_v38 = vmul.f32 %v2373_v36, %v2310_v42  ;;  %v2377_v40 = vpop.f32.mrb[15].mxu1  ;;  %1868 = vmatprep.mubr.msk.bf16.mxu0 %vm74_vm0, %v740_v30 }
 0x1d3   :  { %v2382_v41 = vmul.f32 %v2377_v40, %v2313_v45  ;;  %1867 = vmatpush3.bf16.msra.mxu0 %v2209_v15 }
 0x1d4   :  { %1886 = vmatprep.subr.bf16.mxu0 %v2163_v1 }
 0x1d6   :  { %1869 = vmatmul.mubr.msk.bf16.vlgmr.msra.gmra.mrb[16].mxu0 %vm74_vm0, %v742_v43 }
 0x1d7   :  { %1887 = vmatpush3.bf16.msra.mxu0 %v2163_v1  ;;  %1890 = vmatprep.mubr.msk.bf16.mxu0 %vm74_vm0, %v928_v44  ;;  %v2398_v1 = vpop.permute.xlu0 %986 }
 0x1d8   :  { %1888 = vmatprep.subr.bf16.mxu0 %v2177_v4 }
 0x1db   :  { %1889 = vmatpush3.bf16.msra.mxu0 %v2177_v4  ;;  %v2400_v49 = vpop.permute.xlu0 %1154 }
 0x1dc   :  { %1949 = vmatprep.subr.bf16.mxu0 %v2277_v31  ;;  %vm1163_vm2 = vcmp.eq.s32.totalorder %v2400_v49, 1 }
 0x1de   :  { %1891 = vmatmul.mubr.msk.bf16.vlgmr.msra.gmra.mrb[20].mxu0 %vm74_vm0, %v930_v46 }
 0x1df   :  { %1951 = vmatpush3.bf16.msra.mxu0 %v2277_v31  ;;  %v411_v4 = vpop.permute.xlu0 %410 }
 0x1e0   :  { %1953 = vmatprep.subr.bf16.mxu0 %v2287_v34  ;;  %vm421_vm8 = vcmp.eq.s32.totalorder %v411_v4, 1 }
 0x1e1   :  { %v2410_v59 = vsel %vm421_vm8, %v2347_v12, -3.4028235e+38 }
 0x1e3   :  { %1955 = vmatpush3.bf16.msra.mxu0 %v2287_v34  ;;  %v2402_v52 = vpop.permute.xlu0 %1252  ;;  %v667_v34 = vpop.permute.xlu1 %666 }
 0x1e4   :  { %vm671_vm10 = vcmp.eq.s32.totalorder %v667_v34, 1 }
 0x1e7   :  { %v661_v54 = vpop.permute.xlu0 %660 }
 0x1e8   :  { %vm669_vm6 = vcmp.eq.s32.totalorder %v661_v54, 1 }
 0x1eb   :  { %v664_v58 = vpop.permute.xlu0 %663 }
 0x1ec   :  { %vm670_vm12 = vcmp.eq.s32.totalorder %v664_v58, 1 }
 0x2a0   :  { %v1852_v31 = vpop.f32.mrb[12].mxu0 }
 0x2a1   :  { %v2407_v56 = vsel %vm669_vm6, %v1852_v31, -3.4028235e+38  ;;  %v637_v57 = vpop.f32.mrb[13].mxu0 }
 0x2a2   :  { %v1175_v60 = vmax.f32 %v2405_v55, %v2407_v56  ;;  %v2414_v61 = vsel %vm668_vm7, %v637_v57, -3.4028235e+38 }
 0x2a3   :  { %v1174_v62 = vmax.f32 %v2410_v59, %v2414_v61 }
 0x2a4   :  { %v1855_v63 = vpop.f32.mrb[14].mxu0 }
 0x2a5   :  { %v2421_v2 = vsel %vm671_vm10, %v1855_v63, -3.4028235e+38  ;;  %v647_v3 = vpop.f32.mrb[15].mxu0  ;;  %v1996_v63 = vld [vmem:[%s2649_s7] sm:$0xff]  }
 0x2a6   :  { %v1177_v6 = vmax.f32 %v2419_v0, %v2421_v2  ;;  %v2428_v7 = vsel %vm670_vm12, %v647_v3, -3.4028235e+38  ;;  %v1997_v3 = vld [vmem:[%s2649_s7 + $0x8] sm:$0xff]  }
 0x2a7   :  { %v1176_v8 = vmax.f32 %v2424_v5, %v2428_v7 }
 0x2a9   :  { %v1870_v9 = vpop.f32.mrb[16].mxu0 }
 0x2aa   :  { %v804_v10 = vmul.f32 %v1870_v9, %v2364_v32  ;;  %v925_v11 = vadd.f32 %v1870_v9, %v2360_v29  ;;  %v783_v12 = vpop.f32.mrb[17].mxu0  ;;  %v908_v32 = vpop.permute.xlu1 %907 }
 0x2ab   :  { %v802_v13 = vmul.f32 %v798_v35, %v783_v12  ;;  %v923_v17 = vadd.f32 %v783_v12, %v2366_v33  ;;  %v1871_v18 = vpop.f32.mrb[18].mxu0  ;;  %vm916_vm13 = vcmp.eq.s32.totalorder %v908_v32, 1 }
 0x2ac   :  { %v805_v16 = vmul.f32 %v1871_v18, %v801_v38  ;;  %v926_v19 = vadd.f32 %v1871_v18, %v2373_v36  ;;  %1378 = vrot.lane.b32.xlu0 %v925_v11, %s2086_s25  ;;  %v786_v20 = vpop.f32.mrb[19].mxu0 }
 0x2ad   :  { %v803_v21 = vmul.f32 %v2382_v41, %v786_v20  ;;  %v924_v22 = vadd.f32 %v786_v20, %v2377_v40  ;;  %1880 = vmatprep.mubr.msk.f32.mxu1 %vm74_vm0, %v802_v13 }
 0x2ae   :  { %1380 = vrot.lane.b32.xlu1 %v926_v19, %s2086_s25  ;;  %v911_v38 = vpop.permute.xlu1 %910 }
 0x2af   :  { %1881 = vmatmul.mubr.msk.f32.vlgmr.msra.gmra.mrb[16].mxu1 %vm74_vm0, %v803_v21  ;;  %vm917_vm1 = vcmp.eq.s32.totalorder %v911_v38, 1 }
 0x2b0   :  { %1374 = vrot.lane.b32.xlu0 %v923_v17, %s2086_s25  ;;  %1883 = vmatprep.mubr.msk.f32.mxu1 %vm74_vm0, %v804_v10 }
 0x2b1   :  { %1895 = vmatpush3.bf16.msra.mxu1 %v2203_v14  ;;  %v1892_v23 = vpop.f32.mrb[20].mxu0 }
 0x2b2   :  { %v1047_v24 = vmul.f32 %v1892_v23, %v2305_v37  ;;  %v971_v25 = vpop.f32.mrb[21].mxu0  ;;  %1376 = vrot.lane.b32.xlu1 %v924_v22, %s2086_s25  ;;  %1896 = vmatprep.subr.bf16.mxu1 %v2209_v15  ;;  %v2457_v37 = vpop.permute.xlu0 %1303 }
 0x2b3   :  { %v1045_v26 = vmul.f32 %v971_v25, %v2307_v39  ;;  %1884 = vmatmul.mubr.msk.f32.gmra.mrb[18].mxu1 %vm74_vm0, %v805_v16  ;;  %v1893_v27 = vpop.f32.mrb[22].mxu0 }
 0x2b4   :  { %v1048_v28 = vmul.f32 %v1893_v27, %v2310_v42  ;;  %v974_v29 = vpop.f32.mrb[23].mxu0  ;;  %1898 = vmatprep.mubr.msk.bf16.mxu1 %vm74_vm0, %v2398_v1 }
 0x2b5   :  { %v1046_v14 = vmul.f32 %v974_v29, %v2313_v45  ;;  %1897 = vmatpush3.bf16.msra.mxu1 %v2209_v15 }
 0x2b6   :  { %v2459_v30 = vpop.permute.xlu0 %1307  ;;  %1916 = vmatprep.subr.bf16.mxu1 %v1996_v63 }
 0x2b8   :  { %1899 = vmatmul.mubr.msk.bf16.vlgmr.msra.gmra.mrb[20].mxu1 %vm74_vm0, %v2396_v47 }
 0x2b9   :  { %1917 = vmatpush3.bf16.msra.mxu1 %v1996_v63 }
 0x2ba   :  { %v905_v39 = vpop.permute.xlu0 %904  ;;  %1918 = vmatprep.subr.bf16.mxu1 %v1997_v3 }
 0x2bb   :  { %vm915_vm14 = vcmp.eq.s32.totalorder %v905_v39, 1 }
 0x2bd   :  { %1919 = vmatpush3.bf16.msra.mxu1 %v1997_v3 }
 0x2be   :  { %v914_v33 = vpop.permute.xlu0 %913 }
 0x2bf   :  { %vm918_vm15 = vcmp.eq.s32.totalorder %v914_v33, 1 }
 0x2c2   :  { %v2507_v20 = vpop.permute.xlu0 %1347 }
 0x382   :  { %v1882_v42 = vpop.f32.mrb[16].mxu1 }
 0x383   :  { %v2461_v35 = vsel %vm916_vm13, %v1882_v42, -3.4028235e+38  ;;  %v884_v36 = vpop.f32.mrb[17].mxu1 }
 0x384   :  { %v1179_v15 = vmax.f32 %v1175_v60, %v2461_v35  ;;  %v2464_v45 = vsel %vm915_vm14, %v884_v36, -3.4028235e+38 }
 0x385   :  { %v1178_v40 = vmax.f32 %v1174_v62, %v2464_v45 }
 0x386   :  { %v1885_v41 = vpop.f32.mrb[18].mxu1 }
 0x387   :  { %v2467_v43 = vsel %vm918_vm15, %v1885_v41, -3.4028235e+38  ;;  %v894_v44 = vpop.f32.mrb[19].mxu1 }
 0x388   :  { %v2470_v46 = vmax.f32 %v1177_v6, %v2467_v43  ;;  %v2472_v47 = vsel %vm917_vm1, %v894_v44, -3.4028235e+38  ;;  %v1152_v6 = vpop.permute.xlu1 %1151 }
 0x389   :  { %v2475_v1 = vmax.f32 %v1176_v8, %v2472_v47  ;;  %vm1162_vm3 = vcmp.eq.s32.totalorder %v1152_v6, 1 }
 0x38b   :  { %v1900_v48 = vpop.f32.mrb[20].mxu1 }
 0x38c   :  { %v1051_v50 = vmul.f32 %v1900_v48, %v1047_v24  ;;  %v1172_v4 = vadd.f32 %v1900_v48, %v1892_v23  ;;  %v1030_v51 = vpop.f32.mrb[21].mxu1  ;;  %v1158_v8 = vpop.permute.xlu1 %1157 }
 0x38d   :  { %v1049_v53 = vmul.f32 %v1045_v26, %v1030_v51  ;;  %v1170_v54 = vadd.f32 %v1030_v51, %v971_v25  ;;  %v1901_v31 = vpop.f32.mrb[22].mxu1  ;;  %vm1164_vm5 = vcmp.eq.s32.totalorder %v1158_v8, 1 }
 0x38e   :  { %v1052_v34 = vmul.f32 %v1901_v31, %v1048_v28  ;;  %v1173_v57 = vadd.f32 %v1901_v31, %v1893_v27  ;;  %v1033_v58 = vpop.f32.mrb[23].mxu1  ;;  %v2512_v28 = vpop.permute.xlu0 %1359 }
 0x38f   :  { %v1050_v60 = vmul.f32 %v1046_v14, %v1033_v58  ;;  %v1171_v62 = vadd.f32 %v1033_v58, %v974_v29  ;;  %1422 = vrot.lane.b32.xlu0 %v1170_v54, %s2086_s25  ;;  %1910 = vmatprep.mubr.msk.f32.mxu0 %vm74_vm0, %v1049_v53 }
 0x390   :  { %v1161_v9 = vpop.permute.xlu1 %1160 }
 0x391   :  { %1424 = vrot.lane.b32.xlu1 %v1171_v62, %s2086_s25  ;;  %1911 = vmatmul.mubr.msk.f32.vlgmr.msra.gmra.mrb[24].mxu0 %vm74_vm0, %v1050_v60  ;;  %vm1165_vm4 = vcmp.eq.s32.totalorder %v1161_v9, 1 }
 0x392   :  { %1913 = vmatprep.mubr.msk.f32.mxu0 %vm74_vm0, %v1051_v50 }
 0x393   :  { %1426 = vrot.lane.b32.xlu0 %v1172_v4, %s2086_s25  ;;  %v2523_v4 = vpop.permute.xlu0 %1399 }
 0x394   :  { %v2491_v10 = vpop.permute.xlu1 %1257 }
 0x395   :  { %1428 = vrot.lane.b32.xlu1 %v1173_v57, %s2086_s25  ;;  %1914 = vmatmul.mubr.msk.f32.gmra.mrb[26].mxu0 %vm74_vm0, %v1052_v34 }
 0x397   :  { %v2534_v6 = vpop.permute.xlu0 %1286 }
 0x398   :  { %v2493_v11 = vpop.permute.xlu1 %1299 }
 0x39c   :  { %v2495_v12 = vpop.permute.xlu1 %1262 }
 0x3a0   :  { %v2497_v13 = vpop.permute.xlu1 %1267 }
 0x3a4   :  { %v2499_v17 = vpop.permute.xlu1 %1311 }
 0x3a8   :  { %v2501_v18 = vpop.permute.xlu1 %1351 }
 0x3ac   :  { %v2503_v16 = vpop.permute.xlu1 %1355 }
 0x3b0   :  { %v2505_v19 = vpop.permute.xlu1 %1395 }
 0x3b4   :  { %v2510_v21 = vpop.permute.xlu1 %1403 }
 0x3b8   :  { %v2520_v41 = vpop.permute.xlu1 %1407 }
 0x3bc   :  { %v2529_v57 = vpop.permute.xlu1 %1288 }
 0x464   :  { %v1912_v22 = vpop.f32.mrb[24].mxu0 }
 0x465   :  { %v1167_v23 = vsel %vm1163_vm2, %v1912_v22, -3.4028235e+38  ;;  %v1131_v24 = vpop.f32.mrb[25].mxu0 }
 0x466   :  { %v1183_v25 = vmax.f32 %v1179_v15, %v1167_v23  ;;  %v1166_v26 = vsel %vm1162_vm3, %v1131_v24, -3.4028235e+38 }
 0x467   :  { %v1182_v27 = vmax.f32 %v1178_v40, %v1166_v26 }
 0x468   :  { %v1187_v29 = vsub.f32 %v2405_v55, %v1183_v25  ;;  %v1199_v14 = vsub.f32 %v2407_v56, %v1183_v25  ;;  %v1211_v39 = vsub.f32 %v2461_v35, %v1183_v25  ;;  %v1223_v32 = vsub.f32 %v1167_v23, %v1183_v25  ;;  %v1915_v42 = vpop.f32.mrb[26].mxu0 }
 0x469   :  { %v1186_v49 = vsub.f32 %v2410_v59, %v1182_v27  ;;  %v1198_v33 = vsub.f32 %v2414_v61, %v1182_v27  ;;  %v1210_v36 = vsub.f32 %v2464_v45, %v1182_v27  ;;  %v1222_v38 = vsub.f32 %v1166_v26, %v1182_v27  ;;  %v1141_v15 = vpop.f32.mrb[27].mxu0  ;;  %v1283_v27 = vpop.permute.xlu0 %1282 }
 0x46a   :  { %v1192_v40 = vmul.f32 1.442695, %v1187_v29  ;;  %v1204_v44 = vmul.f32 1.442695, %v1199_v14  ;;  %v1216_v48 = vmul.f32 1.442695, %v1211_v39 }
 0x46b   :  { %v1228_v55 = vmul.f32 1.442695, %v1223_v32  ;;  %v1190_v56 = vmul.f32 1.442695, %v1186_v49  ;;  %v1169_v35 = vsel %vm1165_vm4, %v1915_v42, -3.4028235e+38 }
 0x46c   :  { %1998 = vpow2.f32 %v1192_v40  ;;  %v1202_v50 = vmul.f32 1.442695, %v1198_v33  ;;  %v1185_v59 = vmax.f32 %v2470_v46, %v1169_v35  ;;  %v1168_v61 = vsel %vm1164_vm5, %v1141_v15, -3.4028235e+38 }
 0x46d   :  { %2000 = vpow2.f32 %v1204_v44  ;;  %v1214_v45 = vmul.f32 1.442695, %v1210_v36  ;;  %v1226_v51 = vmul.f32 1.442695, %v1222_v38  ;;  %v1184_v53 = vmax.f32 %v2475_v1, %v1168_v61  ;;  %v2538_v38 = vpop.permute.xlu0 %1330 }
 0x46e   :  { %2002 = vpow2.f32 %v1216_v48  ;;  %v1189_v54 = vsub.f32 %v2419_v0, %v1185_v59  ;;  %v1201_v31 = vsub.f32 %v2421_v2, %v1185_v59  ;;  %v1213_v34 = vsub.f32 %v2467_v43, %v1185_v59 }
 0x46f   :  { %2004 = vpow2.f32 %v1228_v55  ;;  %v1225_v58 = vsub.f32 %v1169_v35, %v1185_v59  ;;  %v1188_v46 = vsub.f32 %v2424_v5, %v1184_v53  ;;  %v1200_v60 = vsub.f32 %v2428_v7, %v1184_v53  ;;  %v1285_v5 = vpop.permute.xlu1 %1284 }
 0x470   :  { %2006 = vpow2.f32 %v1190_v56  ;;  %v1196_v62 = vmul.f32 1.442695, %v1189_v54  ;;  %v1208_v63 = vmul.f32 1.442695, %v1201_v31  ;;  %v1220_v1 = vmul.f32 1.442695, %v1213_v34 }
 0x471   :  { %2008 = vpow2.f32 %v1202_v50  ;;  %v1232_v3 = vmul.f32 1.442695, %v1225_v58  ;;  %v1212_v0 = vsub.f32 %v2472_v47, %v1184_v53  ;;  %v1224_v2 = vsub.f32 %v1168_v61, %v1184_v53 }
 0x472   :  { %2010 = vpow2.f32 %v1214_v45  ;;  %v1194_v43 = vmul.f32 1.442695, %v1188_v46  ;;  %v1206_v8 = vmul.f32 1.442695, %v1200_v60  ;;  %v1327_v45 = vpop.permute.xlu0 %1326 }
 0x473   :  { %2012 = vpow2.f32 %v1226_v51  ;;  %v1218_v22 = vmul.f32 1.442695, %v1212_v0  ;;  %v1230_v26 = vmul.f32 1.442695, %v1224_v2  ;;  %v2536_v29 = vpop.permute.xlu1 %1332 }
 0x474   :  { %2014 = vpow2.f32 %v1196_v62 }
 0x475   :  { %2016 = vpow2.f32 %v1208_v63 }
 0x476   :  { %v1999_v9 = vpop.eup %1998  ;;  %2018 = vpow2.f32 %v1220_v1 }
 0x477   :  { %v2001_v7 = vpop.eup %2000  ;;  %2020 = vpow2.f32 %v1232_v3  ;;  %v1329_v48 = vpop.permute.xlu1 %1328  ;;  %v1271_v60 = vmul.f32 %v1999_v9, %v2491_v10 }
 0x478   :  { %v2003_v23 = vpop.eup %2002  ;;  %v1235_v24 = vadd.f32 %v2001_v7, %v1999_v9  ;;  %2022 = vpow2.f32 %v1194_v43  ;;  %v1315_v62 = vmul.f32 %v2001_v7, %v2457_v37  ;;  %v2546_v3 = vpop.permute.xlu0 %1378 }
 0x479   :  { %v2005_v25 = vpop.eup %2004  ;;  %2024 = vpow2.f32 %v1206_v8  ;;  %v1363_v63 = vmul.f32 %v2003_v23, %v2501_v18 }
 0x47a   :  { %v2007_v47 = vpop.eup %2006  ;;  %v1239_v14 = vadd.f32 %v2003_v23, %v1235_v24  ;;  %2026 = vpow2.f32 %v1218_v22  ;;  %v1411_v46 = vmul.f32 %v2005_v25, %v2523_v4 }
 0x47b   :  { %v2009_v39 = vpop.eup %2008  ;;  %2028 = vpow2.f32 %v1230_v26  ;;  %v2540_v51 = vpop.permute.xlu1 %1380  ;;  %v1270_v26 = vmul.f32 %v2007_v47, %v2402_v52 }
 0x47c   :  { %v2011_v32 = vpop.eup %2010  ;;  %v1243_v42 = vadd.f32 %v2005_v25, %v1239_v14  ;;  %v1234_v49 = vadd.f32 %v2009_v39, %v2007_v47  ;;  %v1314_v4 = vmul.f32 %v2009_v39, %v2493_v11 }
 0x47d   :  { %v2013_v33 = vpop.eup %2012  ;;  %v1362_v37 = vmul.f32 %v2011_v32, %v2507_v20 }
 0x47e   :  { %v2015_v36 = vpop.eup %2014  ;;  %2030 = vrcp.f32 %v1243_v42  ;;  %v1238_v15 = vadd.f32 %v2011_v32, %v1234_v49  ;;  %v1410_v18 = vmul.f32 %v2013_v33, %v2505_v19 }
 0x47f   :  { %v2017_v40 = vpop.eup %2016  ;;  %v1377_v24 = vpop.permute.xlu1 %1376 }
 0x480   :  { %v2019_v44 = vpop.eup %2018  ;;  %v1242_v55 = vadd.f32 %v2013_v33, %v1238_v15  ;;  %v1237_v56 = vadd.f32 %v2017_v40, %v2015_v36  ;;  %v1375_v15 = vpop.permute.xlu0 %1374  ;;  %v1317_v32 = vmul.f32 %v2017_v40, %v2499_v17 }
 0x481   :  { %v2021_v35 = vpop.eup %2020  ;;  %v1365_v19 = vmul.f32 %v2019_v44, %v2512_v28 }
 0x482   :  { %v2023_v50 = vpop.eup %2022  ;;  %2032 = vrcp.f32 %v1242_v55  ;;  %v1241_v59 = vadd.f32 %v2019_v44, %v1237_v56  ;;  %v1273_v56 = vmul.f32 %v2015_v36, %v2497_v13  ;;  %v1413_v52 = vmul.f32 %v2021_v35, %v2520_v41 }
 0x483   :  { %v2025_v61 = vpop.eup %2024  ;;  %v1425_v55 = vpop.permute.xlu1 %1424  ;;  %v1272_v13 = vmul.f32 %v2023_v50, %v2495_v12 }
 0x484   :  { %v1245_v53 = vadd.f32 %v2021_v35, %v1241_v59  ;;  %v1236_v54 = vadd.f32 %v2025_v61, %v2023_v50  ;;  %v2027_v31 = vpop.eup %2026  ;;  %v1316_v41 = vmul.f32 %v2025_v61, %v2459_v30 }
 0x485   :  { %v2029_v58 = vpop.eup %2028  ;;  %v1364_v28 = vmul.f32 %v2027_v31, %v2503_v16 }
 0x486   :  { %2034 = vrcp.f32 %v1245_v53  ;;  %v1240_v34 = vadd.f32 %v2027_v31, %v1236_v54  ;;  %v1412_v35 = vmul.f32 %v2029_v58, %v2510_v21 }
 0x487   :  { %v1429_v61 = vpop.permute.xlu1 %1428 }
 0x488   :  { %v2031_v1 = vpop.eup %2030  ;;  %v1244_v0 = vadd.f32 %v2029_v58, %v1240_v34 }
 0x489   :  { %v1275_v2 = vmul.f32 %v2031_v1, %v1271_v60  ;;  %v1319_v43 = vmul.f32 %v2031_v1, %v1315_v62  ;;  %v1367_v8 = vmul.f32 %v2031_v1, %v1363_v63  ;;  %v1415_v22 = vmul.f32 %v2031_v1, %v1411_v46  ;;  %v1423_v46 = vpop.permute.xlu0 %1422 }
 0x48a   :  { %2036 = vrcp.f32 %v1244_v0 }
 0x48b   :  { %v1295_v14 = vmul.f32 %v1285_v5, %v1275_v2  ;;  %v1339_v10 = vmul.f32 %v1329_v48, %v1319_v43  ;;  %v1387_v7 = vmul.f32 %v1377_v24, %v1367_v8  ;;  %v1435_v48 = vmul.f32 %v1425_v55, %v1415_v22 }
 0x48c   :  { %v2033_v9 = vpop.eup %2032 }
 0x48d   :  { %v1274_v23 = vmul.f32 %v2033_v9, %v1270_v26  ;;  %v1318_v25 = vmul.f32 %v2033_v9, %v1314_v4  ;;  %v1343_v42 = vadd.f32 %v1339_v10, %v1295_v14  ;;  %v1366_v49 = vmul.f32 %v2033_v9, %v1362_v37  ;;  %v1427_v31 = vpop.permute.xlu0 %1426 }
 0x48e   :  { %v1414_v5 = vmul.f32 %v2033_v9, %v1410_v18  ;;  %v2056_v18 = vld [vmem:[%s2642_s0 + $0x8] sm:$0xff] }
 0x48f   :  { %v1294_v47 = vmul.f32 %v1283_v27, %v1274_v23  ;;  %v1338_v11 = vmul.f32 %v1327_v45, %v1318_v25  ;;  %v1391_v39 = vadd.f32 %v1387_v7, %v1343_v42  ;;  %v1386_v33 = vmul.f32 %v1375_v15, %v1366_v49  ;;  %v2057_v42 = vld [vmem:[%s2642_s0 + $0x18] sm:$0xff] }
 0x490   :  { %v2035_v20 = vpop.eup %2034  ;;  %v1434_v60 = vmul.f32 %v1423_v46, %v1414_v5 }
 0x491   :  { %v1417_v59 = vmul.f32 %v2035_v20, %v1413_v52  ;;  %v1342_v53 = vadd.f32 %v1338_v11, %v1294_v47  ;;  %v1439_v54 = vadd.f32 %v1435_v48, %v1391_v39  ;;  %v1277_v34 = vmul.f32 %v2035_v20, %v1273_v56 }
 0x492   :  { %v1321_v36 = vmul.f32 %v2035_v20, %v1317_v32  ;;  %v1369_v27 = vmul.f32 %v2035_v20, %v1365_v19 }
 0x493   :  { %v1390_v45 = vadd.f32 %v1386_v33, %v1342_v53  ;;  %v1297_v17 = vmul.f32 %v2529_v57, %v1277_v34  ;;  %v1437_v43 = vmul.f32 %v1429_v61, %v1417_v59 }
 0x494   :  { %v2037_v40 = vpop.eup %2036  ;;  %v1341_v44 = vmul.f32 %v2536_v29, %v1321_v36  ;;  %v1389_v30 = vmul.f32 %v2540_v51, %v1369_v27 }
 0x495   :  { %v1416_v62 = vmul.f32 %v2037_v40, %v1412_v35  ;;  %v1438_v63 = vadd.f32 %v1434_v60, %v1390_v45  ;;  %v1276_v1 = vmul.f32 %v2037_v40, %v1272_v13  ;;  %v1320_v0 = vmul.f32 %v2037_v40, %v1316_v41  ;;  %v2058_v35 = vld [vmem:[%s2645_s3] sm:$0xff]  ;;  %v2059_v45 = vld [vmem:[%s2645_s3 + $0x10] sm:$0xff]  ;;  %v2060_v60 = vld [vmem:[%s2645_s3 + $0x8] sm:$0xff] }
 0x496   :  { %v1345_v12 = vadd.f32 %v1341_v44, %v1297_v17  ;;  %v1368_v50 = vmul.f32 %v2037_v40, %v1364_v28  ;;  %v2061_v17 = vld [vmem:[%s2645_s3 + $0x18] sm:$0xff] }
 0x497   :  { %v1442_v2 = vpack.c.bf16 %v1439_v54, %v1438_v63  ;;  %v1296_v21 = vmul.f32 %v2534_v6, %v1276_v1  ;;  %v1340_v58 = vmul.f32 %v2538_v38, %v1320_v0  ;;  %v1436_v24 = vmul.f32 %v1427_v31, %v1416_v62  ;;  %v2054_v6 = vld [vmem:[%s2642_s0] sm:$0xff] }
 0x498   :  { %v1393_v57 = vadd.f32 %v1389_v30, %v1345_v12  ;;  %v1388_v29 = vmul.f32 %v2546_v3, %v1368_v50  ;;  %v2055_v3 = vld [vmem:[%s2642_s0 + $0x10] sm:$0xff] }
 0x499   :  { %1920 = vmatprep.mubr.msk.bf16.mxu1 %vm74_vm0, %v1442_v2  ;;  %v1344_v16 = vadd.f32 %v1340_v58, %v1296_v21 }
 0x49a   :  { %v1441_v8 = vadd.f32 %v1437_v43, %v1393_v57 }
 0x49b   :  { %v1392_v22 = vadd.f32 %v1388_v29, %v1344_v16 }
 0x49d   :  { %v1440_v26 = vadd.f32 %v1436_v24, %v1392_v22 }
 0x49f   :  { %v1443_v14 = vpack.c.bf16 %v1441_v8, %v1440_v26 }
 0x4a1   :  { %1921 = vmatmul.mubr.msk.bf16.vlgmr.msra.gmra.mrb[24].mxu1 %vm74_vm0, %v1443_v14 }
 0x574   :  { %v1922_v51 = vpop.f32.mrb[24].mxu1 }
 0x575   :  { %v1500_v4 = vpop.f32.mrb[25].mxu1  ;;  %v1517_v9 = vadd.f32 %v2055_v3, %v1922_v51 }
 0x576   :  { %v1515_v38 = vadd.f32 %v2054_v6, %v1500_v4  ;;  %v1923_v10 = vpop.f32.mrb[26].mxu1 }
 0x577   :  { %v1503_v37 = vpop.f32.mrb[27].mxu1  ;;  %v1518_v49 = vadd.f32 %v2057_v42, %v1923_v10  ;;  %v1527_v15 = vsel %vm74_vm0, %v1517_v9, 0.0  ;;  %v1714_v42 = vld [vmem:[%s2651_s9] ss:$0 sm:$0xff]  ;;  %s2094_s9 = smov [#allocation2]  }
 0x578   :  { %v1516_v7 = vadd.f32 %v2056_v18, %v1503_v37  ;;  %v1521_v23 = vsel %vm74_vm0, %v1515_v38, 0.0 }
 0x579   :  { %1522 = vadd.xlane.f32.xlu0 %v1521_v23  ;;  %v1530_v55 = vsel %vm74_vm0, %v1518_v49, 0.0 }
 0x57a   :  { %v1524_v25 = vsel %vm74_vm0, %v1516_v7, 0.0 }
 0x57b   :  { %1525 = vadd.xlane.f32.xlu1 %v1524_v25 }
 0x57d   :  { %1528 = vadd.xlane.f32.xlu0 %v1527_v15 }
 0x581   :  { %1531 = vadd.xlane.f32.xlu0 %v1530_v55 }
 0x606   :  { %v1523_v56 = vpop.xlane.xlu0 %1522 }
 0x607   :  { %v1534_v5 = vmul.f32 0.03125, %v1523_v56  ;;  %v1715_v56 = vld [vmem:[%s2652_s10] ss:$0 sm:$0xff]  ;;  %s1655_s10 = sshll.u32 %s2094_s9, 4  ;;  %s1656_s10 = int_to_ptr.vmem [resolvable:$true] %s1655_s10 }
 0x608   :  { %v1526_v52 = vpop.xlane.xlu1 %1525  ;;  %s2062_s15 = scalar_lea.vmem %s1656_s10, 512  ;;  %p2067_p1 = scmp.lt.s32.totalorder %s1656_s10, %s1656_s10 }
 0x609   :  { %v1535_v47 = vmul.f32 0.03125, %v1526_v52  ;;  %v2586_v20 = vsub.f32 %v1515_v38, %v1534_v5  ;;  %p2063_p0 = scmp.ne.s32.totalorder %s1656_s10, %s2062_s15  ;;  %p2068_p2 = scmp.lt.s32.totalorder %s2062_s15, %s2062_s15 }
 0x60a   :  { %v1529_v11 = vpop.xlane.xlu0 %1528 }
 0x60b   :  { %v2584_v39 = vsub.f32 %v1516_v7, %v1535_v47  ;;  %v1536_v48 = vmul.f32 0.03125, %v1529_v11  ;;  %v1542_v13 = vmul.f32 %v2586_v20, %v2586_v20  ;;  %p2069_p3 = por %p2068_p2, %p2067_p1 }
 0x60d   :  { %v2588_v32 = vsub.f32 %v1517_v9, %v1536_v48  ;;  %v1543_v19 = vmul.f32 %v2584_v39, %v2584_v39  ;;  %v1546_v36 = vsel %vm74_vm0, %v1542_v13, 0.0  ;;  %v1609_v15 = vmul.f32 %v1714_v42, %v2584_v39  ;;  %p2070_p4 = pnand %p2069_p3, %p2063_p0 }
 0x60e   :  { %v1532_v33 = vpop.xlane.xlu0 %1531  ;;  %v1608_v39 = vmul.f32 %v1714_v42, %v2586_v20 }
 0x60f   :  { %v1537_v59 = vmul.f32 0.03125, %v1532_v33  ;;  %v1549_v53 = vsel %vm74_vm0, %v1543_v19, 0.0  ;;  %v1544_v54 = vmul.f32 %v2588_v32, %v2588_v32  ;;  %v1610_v52 = vmul.f32 %v1714_v42, %v2588_v32 }
 0x610   :  { %1550 = vadd.xlane.f32.xlu0 %v1549_v53 }
 0x611   :  { %v2595_v34 = vsub.f32 %v1518_v49, %v1537_v59  ;;  %v1552_v46 = vsel %vm74_vm0, %v1544_v54, 0.0 }
 0x612   :  { %1553 = vadd.xlane.f32.xlu1 %v1552_v46 }
 0x613   :  { %v1545_v41 = vmul.f32 %v2595_v34, %v2595_v34  ;;  %v1611_v59 = vmul.f32 %v1714_v42, %v2595_v34 }
 0x615   :  { %v1555_v27 = vsel %vm74_vm0, %v1545_v41, 0.0 }
 0x616   :  { %1547 = vadd.xlane.f32.xlu1 %v1546_v36  ;;  %1556 = vadd.xlane.f32.xlu0 %v1555_v27 }
 0x627   :  { %1627 = vperm.xlu1 %1984, %v2058_v35  }
 0x62b   :  { %1635 = vperm.xlu1 %1984, %v2059_v45  }
 0x62c   :  { %1631 = vperm.xlu0 %1985, %v2060_v60  }
 0x62f   :  { %1639 = vperm.xlu1 %1984, %v2061_v17  }
 0x69d   :  { %v1551_v40 = vpop.xlane.xlu0 %1550 }
 0x69e   :  { %v1559_v28 = vmul.f32 0.032258064, %v1551_v40 }
 0x69f   :  { %v1554_v44 = vpop.xlane.xlu1 %1553 }
 0x6a0   :  { %v1563_v62 = vadd.f32 1e-06, %v1559_v28  ;;  %v1560_v63 = vmul.f32 0.032258064, %v1554_v44 }
 0x6a2   :  { %2038 = vrsqrt.f32 %v1563_v62  ;;  %v1564_v1 = vadd.f32 1e-06, %v1560_v63  ;;  %vm1575_vm6 = vcmp.eq.f32.partialorder %v1563_v62, inf  ;;  %v1578_v43 = vand.u32 2147483648, %v1563_v62 }
 0x6a3   :  { %v1557_v0 = vpop.xlane.xlu0 %1556  ;;  %v1548_v12 = vpop.xlane.xlu1 %1547  ;;  %vm1577_vm7 = vcmp.eq.f32.partialorder %v1563_v62, 0.0 }
 0x6a4   :  { %2040 = vrsqrt.f32 %v1564_v1  ;;  %v1561_v50 = vmul.f32 0.032258064, %v1557_v0  ;;  %v1558_v30 = vmul.f32 0.032258064, %v1548_v12  ;;  %vm1582_vm8 = vcmp.eq.f32.partialorder %v1564_v1, inf }
 0x6a5   :  { %v1585_v31 = vand.u32 2147483648, %v1564_v1  ;;  %vm1584_vm9 = vcmp.eq.f32.partialorder %v1564_v1, 0.0 }
 0x6a6   :  { %v1565_v61 = vadd.f32 1e-06, %v1561_v50  ;;  %v1562_v2 = vadd.f32 1e-06, %v1558_v30 }
 0x6a7   :  { %v1628_v49 = vpop.permute.xlu1 %1627 }
 0x6a8   :  { %2042 = vrsqrt.f32 %v1565_v61  ;;  %vm1589_vm10 = vcmp.eq.f32.partialorder %v1565_v61, inf  ;;  %v1592_v38 = vand.u32 2147483648, %v1565_v61  ;;  %vm1591_vm11 = vcmp.eq.f32.partialorder %v1565_v61, 0.0 }
 0x6a9   :  { %2044 = vrsqrt.f32 %v1562_v2  ;;  %vm1568_vm12 = vcmp.eq.f32.partialorder %v1562_v2, inf  ;;  %v1571_v37 = vand.u32 2147483648, %v1562_v2  ;;  %vm1570_vm13 = vcmp.eq.f32.partialorder %v1562_v2, 0.0 }
 0x6ab   :  { %v1632_v11 = vpop.permute.xlu0 %1631  ;;  %v1636_v33 = vpop.permute.xlu1 %1635 }
 0x6ac   :  { %v2039_v21 = vpop.eup %2038 }
 0x6ad   :  { %v1574_v58 = vmul.f32 %v2039_v21, %v1563_v62 }
 0x6ae   :  { %v2041_v57 = vpop.eup %2040 }
 0x6af   :  { %v1581_v16 = vmul.f32 %v2041_v57, %v1564_v1  ;;  %v1576_v29 = vsel %vm1575_vm6, %v1563_v62, %v1574_v58  ;;  %v1640_v45 = vpop.permute.xlu1 %1639 }
 0x6b0   :  { %v1579_v8 = vsel %vm1577_vm7, %v1578_v43, %v1576_v29 }
 0x6b1   :  { %v1583_v22 = vsel %vm1582_vm8, %v1564_v1, %v1581_v16  ;;  %v1595_v24 = vadd.f32 1e-06, %v1579_v8 }
 0x6b2   :  { %v2043_v26 = vpop.eup %2042  ;;  %v1586_v14 = vsel %vm1584_vm9, %v1585_v31, %v1583_v22 }
 0x6b3   :  { %v2045_v51 = vpop.eup %2044  ;;  %v1588_v4 = vmul.f32 %v2043_v26, %v1565_v61  ;;  %v1596_v6 = vadd.f32 1e-06, %v1586_v14  ;;  %2046 = vrcp.f32 %v1595_v24 }
 0x6b4   :  { %v1567_v10 = vmul.f32 %v2045_v51, %v1562_v2 }
 0x6b5   :  { %2048 = vrcp.f32 %v1596_v6  ;;  %v1590_v3 = vsel %vm1589_vm10, %v1565_v61, %v1588_v4 }
 0x6b6   :  { %v1569_v9 = vsel %vm1568_vm12, %v1562_v2, %v1567_v10  ;;  %v1593_v18 = vsel %vm1591_vm11, %v1592_v38, %v1590_v3 }
 0x6b7   :  { %v1572_v7 = vsel %vm1570_vm13, %v1571_v37, %v1569_v9  ;;  %v1597_v23 = vadd.f32 1e-06, %v1593_v18 }
 0x6b8   :  { %v1594_v25 = vadd.f32 1e-06, %v1572_v7 }
 0x6b9   :  { %2050 = vrcp.f32 %v1597_v23 }
 0x6ba   :  { %2052 = vrcp.f32 %v1594_v25 }
 0x6bd   :  { %v2047_v55 = vpop.eup %2046 }
 0x6be   :  { %v1613_v5 = vmul.f32 %v2047_v55, %v1609_v15 }
 0x6bf   :  { %v2049_v47 = vpop.eup %2048 }
 0x6c0   :  { %v1614_v48 = vmul.f32 %v2049_v47, %v1610_v52  ;;  %v1623_v19 = vadd.f32 %v1715_v56, %v1613_v5 }
 0x6c2   :  { %v1624_v53 = vadd.f32 %v1715_v56, %v1614_v48  ;;  %v1643_v54 = vmul.f32 %v1632_v11, %v1623_v19 }
 0x6c3   :  { %v2051_v46 = vpop.eup %2050 }
 0x6c4   :  { %v2053_v13 = vpop.eup %2052  ;;  %v1644_v41 = vmul.f32 %v1636_v33, %v1624_v53  ;;  %v1615_v36 = vmul.f32 %v2051_v46, %v1611_v59  ;;  %1647 = vst.msk [vmem:[#allocation2 + $0x8] sm:$0xff] %vm74_vm0, %v1643_v54 }
 0x6c5   :  { %v1612_v27 = vmul.f32 %v2053_v13, %v1608_v39 }
 0x6c6   :  { %1648 = vst.msk [vmem:[#allocation2 + $0x10] sm:$0xff] %vm74_vm0, %v1644_v41  ;;  %v1625_v32 = vadd.f32 %v1715_v56, %v1615_v36 }
 0x6c7   :  { %v1622_v35 = vadd.f32 %v1715_v56, %v1612_v27 }
 0x6c8   :  { %v1645_v60 = vmul.f32 %v1640_v45, %v1625_v32 }
 0x6c9   :  { %v1642_v34 = vmul.f32 %v1628_v49, %v1622_v35 }
 0x6ca   :  { %1649 = vst.msk [vmem:[#allocation2 + $0x18] sm:$0xff] %vm74_vm0, %v1645_v60 }
 0x6cb   :  { %1646 = vst.msk [vmem:[#allocation2] sm:$0xff] %vm74_vm0, %v1642_v34 }
 0x6cc   :  { %2073 = shalt.err (!%p2070_p4)
}
 0x6cd   :  { %s2074_s18 = scalar_lea.hbm %s2653_s11, 512 }
 0x6ce   :  { %p2075_p5 = scmp.ne.s32.totalorder %s2653_s11, %s2074_s18  ;;  %p2078_p6 = scmp.lt.u32.totalorder %s2074_s18, %s2653_s11 }
 0x6d0   :  { %p2080_p7 = pnand %p2078_p6, %p2075_p5 }
 0x6d2   :  { %2083 = shalt.err (!%p2080_p7)
}
 0x6d3   :  { %s2095_s7 = smov 128   ;;  %s2096_s25 = smov 8  }
 0x6d4   :  { %1661 = dma.vmem_to_hbm [thread:$0]  %s1656_s10, 512, %s2653_s11, [#allocation3], %s2095_s7, %s2095_s7, %s2096_s25  }
 0x6d5   :  { %2084 = dma.done.wait [#allocation3], 512  }
 0x6d6   :  { %2085 = vsyncadd [#allocation3], 4294966784 }
 0x6d7   :  { %1665 = vsyncpa [#allocation3], 1 }

</bundles_post_ra>
